<compile_context>
chip_gen: v6e
topology: v6e:2x2x1
jax: 0.10.0
libtpu: 0.0.40
codegen_flags: <defaults>
</compile_context>

<pallas_src>
import functools
import math

import jax
import jax.numpy as jnp
from jax import lax
from jax.experimental import pallas as pl
from jax.experimental.pallas import tpu as pltpu


def _device_kind() -> str:
    try:
        return jax.devices()[0].device_kind.lower()
    except Exception:
        return ""


def _bf16_eup_available() -> bool:
    """bf16 transcendental path exists on v6e (Trillium) and v7x; not on v2–v5."""
    kind = _device_kind()
    return any(tag in kind for tag in ("v6", "trillium", "v7", "7x"))


def _single_tensorcore_chip() -> bool:
    """v5e / v6e expose one TensorCore per chip (grid is a serial loop there)."""
    kind = _device_kind()
    return any(tag in kind for tag in ("v5e", "v5 lite", "v5lite", "v6", "trillium"))


def _mha_kernel(x_ref, wqkv_ref, bqkv_ref, wo_ref, bo_ref, o_ref, ctx_ref,
                *, n_heads: int, d_k: int, seq_len: int, batch_block: int,
                exp_in_bf16: bool):
    """One grid step == `batch_block` batch elements (flattened along rows).

    x_ref   : (Bt*S, D)  bf16 VMEM tile
    wqkv_ref: (D, 3*D)   bf16 VMEM (pre-transposed to (in, out), q-cols pre-scaled)
    bqkv_ref: (1, 3*D)   f32  VMEM (q part pre-scaled by 1/sqrt(d_k))
    wo_ref  : (D, D)     bf16 VMEM (pre-transposed to (in, out))
    bo_ref  : (1, D)     f32  VMEM
    o_ref   : (Bt*S, D)  f32  VMEM tile
    ctx_ref : (Bt*S, D)  bf16 VMEM scratch (per-head contexts, lane-offset stores)
    """
    D = n_heads * d_k
    S = seq_len

    # Fused Q/K/V projection: one (M, D) @ (D, 3D) MXU matmul, f32 accumulation.
    qkv = jnp.dot(x_ref[...], wqkv_ref[...],
                  preferred_element_type=jnp.float32) + bqkv_ref[0]

    # 256-lane-aligned slices: layout-free.  Softmax scale is already folded in.
    q = qkv[:, 0 * D:1 * D].astype(jnp.bfloat16)
    k = qkv[:, 1 * D:2 * D].astype(jnp.bfloat16)
    v = qkv[:, 2 * D:3 * D].astype(jnp.bfloat16)

    for b in range(batch_block):                         # static, small unroll
        r0 = b * S
        qb = q[r0:r0 + S, :]
        kb = k[r0:r0 + S, :]
        vb = v[r0:r0 + S, :]
        for h in range(n_heads):                         # static, small unroll
            c0 = h * d_k
            # 64-lane head slices: expected to lower to XLU rotates/selects
            # (near-free); verify with pl.lower_as_mlir when tuning further.
            qh = qb[:, c0:c0 + d_k]
            kh = kb[:, c0:c0 + d_k]
            vh = vb[:, c0:c0 + d_k]

            # scores = qh @ kh^T, contracting last dims -> no transpose emitted.
            s = lax.dot_general(qh, kh, (((1,), (1,)), ((), ())),
                                preferred_element_type=jnp.float32)      # (S, S) f32

            # Numerically-stable softmax with deferred normalization.
            m = jnp.max(s, axis=-1, keepdims=True)
            z = s - m
            if exp_in_bf16:
                # bf16 EUP path (v6e/v7x); keep the row-sum accumulation in f32.
                e = jnp.exp(z.astype(jnp.bfloat16))
                l = jnp.sum(e, axis=-1, keepdims=True, dtype=jnp.float32)
            else:
                e = jnp.exp(z)                                           # f32 (v5e)
                l = jnp.sum(e, axis=-1, keepdims=True)
            inv_l = pl.reciprocal(l, approx=True)                        # EUP slot

            ctx = jnp.dot(e.astype(jnp.bfloat16), vh,
                          preferred_element_type=jnp.float32) * inv_l    # (S, d_k)

            # Lane-offset store into the context scratch (cheap vst work; no XLU
            # concat and no thin K=64 output-projection matmuls).
            ctx_ref[pl.ds(r0, S), pl.ds(c0, d_k)] = ctx.astype(jnp.bfloat16)

    # ONE dense output projection with K = D (fully feeds the MXU contraction).
    out = jnp.dot(ctx_ref[...], wo_ref[...],
                  preferred_element_type=jnp.float32) + bo_ref[0]
    o_ref[...] = out.astype(o_ref.dtype)


def multi_head_attention(x, params, *, n_heads: int, batch_block=None):
    """x: (B, S, D) f32. params: PyTorch-layout weights (out, in) + biases (D,)."""
    B, S, D = x.shape
    assert D % n_heads == 0
    d_k = D // n_heads

    if batch_block is None:
        # Single-TC chips (v5e/v6e): fold the whole batch into one grid step.
        # Dual-TC v7x: keep grid=(B,) "parallel" so both TensorCores get work.
        batch_block = B if _single_tensorcore_chip() else 1
    assert B % batch_block == 0
    Bt = batch_block
    M = Bt * S

    f32 = jnp.float32
    scale = 1.0 / math.sqrt(d_k)

    # One-time prep: (out, in) -> (in, out), fuse QKV, fold the softmax scale into
    # the q columns, cast weights to bf16 (MXU operands), keep biases f32.
    wqkv = jnp.concatenate(
        [jnp.asarray(params["wq"], f32).T * scale,
         jnp.asarray(params["wk"], f32).T,
         jnp.asarray(params["wv"], f32).T], axis=1).astype(jnp.bfloat16)   # (D, 3D)
    bqkv = jnp.concatenate(
        [jnp.asarray(params["bq"], f32) * scale,
         jnp.asarray(params["bk"], f32),
         jnp.asarray(params["bv"], f32)]).reshape(1, 3 * D)                # (1, 3D)
    wo = jnp.asarray(params["wo"], f32).T.astype(jnp.bfloat16)             # (D, D)
    bo = jnp.asarray(params["bo"], f32).reshape(1, D)                      # (1, D)

    # Pre-cast x to bf16 and flatten batch*seq -> rows (halves the input DMA).
    x_rows = x.reshape(B * S, D).astype(jnp.bfloat16)

    kernel = functools.partial(
        _mha_kernel, n_heads=n_heads, d_k=d_k, seq_len=S, batch_block=Bt,
        exp_in_bf16=_bf16_eup_available())

    out = pl.pallas_call(
        kernel,
        out_shape=jax.ShapeDtypeStruct((B * S, D), x.dtype),
        grid_spec=pltpu.PrefetchScalarGridSpec(
            num_scalar_prefetch=0,
            grid=(B // Bt,),
            in_specs=[
                pl.BlockSpec((M, D), lambda g: (g, 0)),        # x rows
                pl.BlockSpec((D, 3 * D), lambda g: (0, 0)),    # fused Wqkv
                pl.BlockSpec((1, 3 * D), lambda g: (0, 0)),    # fused bias qkv
                pl.BlockSpec((D, D), lambda g: (0, 0)),        # Wo
                pl.BlockSpec((1, D), lambda g: (0, 0)),        # bo
            ],
            out_specs=pl.BlockSpec((M, D), lambda g: (g, 0)),
            scratch_shapes=[pltpu.VMEM((M, D), jnp.bfloat16)],  # per-head ctx slab
        ),
        compiler_params=pltpu.CompilerParams(
            dimension_semantics=("parallel",),     # megacore/v7x: shard batch steps
            vmem_limit_bytes=32 * 1024 * 1024,     # raise v5e's 16 MiB scoped default
        ),
    )(x_rows, wqkv, bqkv, wo, bo)

    return out.reshape(B, S, D)


def _reference(x, params, n_heads):
    """Pure-JAX f32 reference mirroring the PyTorch forward (eval mode, mask=None)."""
    B, S, D = x.shape
    d_k = D // n_heads

    def lin(y, w, b):
        return y @ w.T + b

    q = lin(x, params["wq"], params["bq"]).reshape(B, S, n_heads, d_k).transpose(0, 2, 1, 3)
    k = lin(x, params["wk"], params["bk"]).reshape(B, S, n_heads, d_k).transpose(0, 2, 1, 3)
    v = lin(x, params["wv"], params["bv"]).reshape(B, S, n_heads, d_k).transpose(0, 2, 1, 3)
    scores = jnp.einsum("bhqd,bhkd->bhqk", q, k) / jnp.sqrt(jnp.float32(d_k))
    attn = jax.nn.softmax(scores, axis=-1)
    ctx = jnp.einsum("bhqk,bhkd->bhqd", attn, v).transpose(0, 2, 1, 3).reshape(B, S, D)
    return lin(ctx, params["wo"], params["bo"])


if __name__ == "__main__":
    # Small but MXU/lane-friendly shapes: 128 rows per batch element, lane-dense
    # (256-wide) stores, d_k = 64, 4 heads.
    # TODO(synk): nn.Dropout / mask are not modeled (eval mode, mask=None -> identity).
    B, S, D, H = 2, 128, 256, 4

    key = jax.random.PRNGKey(0)
    keys = jax.random.split(key, 9)
    bound = 1.0 / math.sqrt(D)   # mimic nn.Linear default uniform init scale

    params = {
        "wq": jax.random.uniform(keys[0], (D, D), jnp.float32, -bound, bound),
        "bq": jax.random.uniform(keys[1], (D,),   jnp.float32, -bound, bound),
        "wk": jax.random.uniform(keys[2], (D, D), jnp.float32, -bound, bound),
        "bk": jax.random.uniform(keys[3], (D,),   jnp.float32, -bound, bound),
        "wv": jax.random.uniform(keys[4], (D, D), jnp.float32, -bound, bound),
        "bv": jax.random.uniform(keys[5], (D,),   jnp.float32, -bound, bound),
        "wo": jax.random.uniform(keys[6], (D, D), jnp.float32, -bound, bound),
        "bo": jax.random.uniform(keys[7], (D,),   jnp.float32, -bound, bound),
    }
    x = jax.random.normal(keys[8], (B, S, D), jnp.float32)

    out = multi_head_attention(x, params, n_heads=H)
    out = jax.block_until_ready(out)

    ref = _reference(x, params, H)
    assert out.shape == (B, S, D)
    # bf16 MXU operands + (on v6e/v7x) bf16 exp + approx reciprocal -> small drift
    # vs the f32 reference.
    err = float(jnp.max(jnp.abs(out - ref)))
    assert jnp.allclose(out, ref, atol=4e-2, rtol=4e-2), \
        f"mismatch vs reference (max abs err {err})"

    print("KERNEL_OK")
</pallas_src>

<mosaic_0001>
module attributes {stable_mosaic.version = 11 : i64} {
  func.func @_mha_kernel(%arg0: i32, %arg1: memref<128x256xbf16, #tpu.memory_space<vmem>>, %arg2: memref<256x768xbf16, #tpu.memory_space<vmem>>, %arg3: memref<1x768xf32, #tpu.memory_space<vmem>>, %arg4: memref<256x256xbf16, #tpu.memory_space<vmem>>, %arg5: memref<1x256xf32, #tpu.memory_space<vmem>>, %arg6: memref<128x256xf32, #tpu.memory_space<vmem>>, %arg7: memref<128x256xbf16, #tpu.memory_space<vmem>>) attributes {dimension_semantics = [#tpu.dimension_semantics<parallel>], iteration_bounds = array<i64: 2>, scalar_prefetch = 0 : i64, scratch_operands = 1 : i64, tpu.core_type = #tpu.core_type<tc>, window_params = [{transform_indices = @transform_0, window_bounds = array<i64: 128, 256>}, {pipeline_mode = #tpu.pipeline_mode<synchronous>, transform_indices = @transform_1, window_bounds = array<i64: 256, 768>}, {pipeline_mode = #tpu.pipeline_mode<synchronous>, transform_indices = @transform_2, window_bounds = array<i64: 1, 768>}, {pipeline_mode = #tpu.pipeline_mode<synchronous>, transform_indices = @transform_3, window_bounds = array<i64: 256, 256>}, {pipeline_mode = #tpu.pipeline_mode<synchronous>, transform_indices = @transform_4, window_bounds = array<i64: 1, 256>}, {transform_indices = @transform_5, window_bounds = array<i64: 128, 256>}]} {
    %c0 = arith.constant 0 : index
    %c0_0 = arith.constant 0 : index
    %0 = vector.load %arg1[%c0, %c0_0] : memref<128x256xbf16, #tpu.memory_space<vmem>>, vector<128x256xbf16>
    %c0_1 = arith.constant 0 : index
    %c0_2 = arith.constant 0 : index
    %1 = vector.load %arg2[%c0_1, %c0_2] : memref<256x768xbf16, #tpu.memory_space<vmem>>, vector<256x768xbf16>
    %cst = arith.constant dense<0.000000e+00> : vector<128x768xf32>
    %2 = tpu.matmul %0, %1, %cst {dimension_numbers = #tpu.dot_dimension_numbers<[1], [0], [0], [1], [0, 0, 1, 1], [], []>} : vector<128x256xbf16>, vector<256x768xbf16>, vector<128x768xf32> -> vector<128x768xf32>
    %c0_3 = arith.constant 0 : index
    %c0_4 = arith.constant 0 : index
    %3 = vector.load %arg3[%c0_3, %c0_4] : memref<1x768xf32, #tpu.memory_space<vmem>>, vector<1x768xf32>
    %4 = vector.shape_cast %3 : vector<1x768xf32> to vector<768xf32>
    %5 = vector.shape_cast %4 : vector<768xf32> to vector<1x768xf32>
    %6 = vector.broadcast %5 : vector<1x768xf32> to vector<128x768xf32>
    %7 = arith.addf %2, %6 : vector<128x768xf32>
    %8 = vector.extract_strided_slice %7 {offsets = [0, 0], sizes = [128, 256], strides = [1, 1]} : vector<128x768xf32> to vector<128x256xf32>
    %9 = arith.truncf %8 : vector<128x256xf32> to vector<128x256xbf16>
    %10 = vector.extract_strided_slice %7 {offsets = [0, 256], sizes = [128, 256], strides = [1, 1]} : vector<128x768xf32> to vector<128x256xf32>
    %11 = arith.truncf %10 : vector<128x256xf32> to vector<128x256xbf16>
    %12 = vector.extract_strided_slice %7 {offsets = [0, 512], sizes = [128, 256], strides = [1, 1]} : vector<128x768xf32> to vector<128x256xf32>
    %13 = arith.truncf %12 : vector<128x256xf32> to vector<128x256xbf16>
    %14 = vector.extract_strided_slice %9 {offsets = [0, 0], sizes = [128, 64], strides = [1, 1]} : vector<128x256xbf16> to vector<128x64xbf16>
    %15 = vector.extract_strided_slice %11 {offsets = [0, 0], sizes = [128, 64], strides = [1, 1]} : vector<128x256xbf16> to vector<128x64xbf16>
    %16 = vector.extract_strided_slice %13 {offsets = [0, 0], sizes = [128, 64], strides = [1, 1]} : vector<128x256xbf16> to vector<128x64xbf16>
    %cst_5 = arith.constant dense<0.000000e+00> : vector<128x128xf32>
    %17 = tpu.matmul %14, %15, %cst_5 {dimension_numbers = #tpu.dot_dimension_numbers<[1], [1], [0], [0], [0, 0, 1, 0], [], []>} : vector<128x64xbf16>, vector<128x64xbf16>, vector<128x128xf32> -> vector<128x128xf32>
    %cst_6 = arith.constant dense<0xFF800000> : vector<128xf32>
    %18 = vector.multi_reduction <maximumf>, %17, %cst_6 [1] : vector<128x128xf32> to vector<128xf32>
    %19 = vector.shape_cast %18 : vector<128xf32> to vector<128x1xf32>
    %20 = vector.broadcast %19 : vector<128x1xf32> to vector<128x128xf32>
    %21 = arith.subf %17, %20 : vector<128x128xf32>
    %22 = math.exp %21 : vector<128x128xf32>
    %cst_7 = arith.constant dense<0.000000e+00> : vector<128xf32>
    %23 = vector.multi_reduction <add>, %22, %cst_7 [1] : vector<128x128xf32> to vector<128xf32>
    %24 = vector.shape_cast %23 : vector<128xf32> to vector<128x1xf32>
    %25 = tpu.reciprocal %24 {approx = true} : vector<128x1xf32> -> vector<128x1xf32>
    %26 = arith.truncf %22 : vector<128x128xf32> to vector<128x128xbf16>
    %cst_8 = arith.constant dense<0.000000e+00> : vector<128x64xf32>
    %27 = tpu.matmul %26, %16, %cst_8 {dimension_numbers = #tpu.dot_dimension_numbers<[1], [0], [0], [1], [0, 0, 1, 1], [], []>} : vector<128x128xbf16>, vector<128x64xbf16>, vector<128x64xf32> -> vector<128x64xf32>
    %28 = vector.broadcast %25 : vector<128x1xf32> to vector<128x64xf32>
    %29 = arith.mulf %27, %28 : vector<128x64xf32>
    %30 = arith.truncf %29 : vector<128x64xf32> to vector<128x64xbf16>
    %c0_9 = arith.constant 0 : index
    %c0_10 = arith.constant 0 : index
    %31 = vector.load %arg7[%c0_9, %c0_10] : memref<128x256xbf16, #tpu.memory_space<vmem>>, vector<128x64xbf16>
    tpu.vector_store %arg7[%c0_9, %c0_10], %30 {strides = array<i32>} : memref<128x256xbf16, #tpu.memory_space<vmem>>, vector<128x64xbf16>,
    %32 = vector.extract_strided_slice %9 {offsets = [0, 64], sizes = [128, 64], strides = [1, 1]} : vector<128x256xbf16> to vector<128x64xbf16>
    %33 = vector.extract_strided_slice %11 {offsets = [0, 64], sizes = [128, 64], strides = [1, 1]} : vector<128x256xbf16> to vector<128x64xbf16>
    %34 = vector.extract_strided_slice %13 {offsets = [0, 64], sizes = [128, 64], strides = [1, 1]} : vector<128x256xbf16> to vector<128x64xbf16>
    %cst_11 = arith.constant dense<0.000000e+00> : vector<128x128xf32>
    %35 = tpu.matmul %32, %33, %cst_11 {dimension_numbers = #tpu.dot_dimension_numbers<[1], [1], [0], [0], [0, 0, 1, 0], [], []>} : vector<128x64xbf16>, vector<128x64xbf16>, vector<128x128xf32> -> vector<128x128xf32>
    %cst_12 = arith.constant dense<0xFF800000> : vector<128xf32>
    %36 = vector.multi_reduction <maximumf>, %35, %cst_12 [1] : vector<128x128xf32> to vector<128xf32>
    %37 = vector.shape_cast %36 : vector<128xf32> to vector<128x1xf32>
    %38 = vector.broadcast %37 : vector<128x1xf32> to vector<128x128xf32>
    %39 = arith.subf %35, %38 : vector<128x128xf32>
    %40 = math.exp %39 : vector<128x128xf32>
    %cst_13 = arith.constant dense<0.000000e+00> : vector<128xf32>
    %41 = vector.multi_reduction <add>, %40, %cst_13 [1] : vector<128x128xf32> to vector<128xf32>
    %42 = vector.shape_cast %41 : vector<128xf32> to vector<128x1xf32>
    %43 = tpu.reciprocal %42 {approx = true} : vector<128x1xf32> -> vector<128x1xf32>
    %44 = arith.truncf %40 : vector<128x128xf32> to vector<128x128xbf16>
    %cst_14 = arith.constant dense<0.000000e+00> : vector<128x64xf32>
    %45 = tpu.matmul %44, %34, %cst_14 {dimension_numbers = #tpu.dot_dimension_numbers<[1], [0], [0], [1], [0, 0, 1, 1], [], []>} : vector<128x128xbf16>, vector<128x64xbf16>, vector<128x64xf32> -> vector<128x64xf32>
    %46 = vector.broadcast %43 : vector<128x1xf32> to vector<128x64xf32>
    %47 = arith.mulf %45, %46 : vector<128x64xf32>
    %48 = arith.truncf %47 : vector<128x64xf32> to vector<128x64xbf16>
    %c0_15 = arith.constant 0 : index
    %c64 = arith.constant 64 : index
    %49 = vector.load %arg7[%c0_15, %c64] : memref<128x256xbf16, #tpu.memory_space<vmem>>, vector<128x64xbf16>
    tpu.vector_store %arg7[%c0_15, %c64], %48 {strides = array<i32>} : memref<128x256xbf16, #tpu.memory_space<vmem>>, vector<128x64xbf16>,
    %50 = vector.extract_strided_slice %9 {offsets = [0, 128], sizes = [128, 64], strides = [1, 1]} : vector<128x256xbf16> to vector<128x64xbf16>
    %51 = vector.extract_strided_slice %11 {offsets = [0, 128], sizes = [128, 64], strides = [1, 1]} : vector<128x256xbf16> to vector<128x64xbf16>
    %52 = vector.extract_strided_slice %13 {offsets = [0, 128], sizes = [128, 64], strides = [1, 1]} : vector<128x256xbf16> to vector<128x64xbf16>
    %cst_16 = arith.constant dense<0.000000e+00> : vector<128x128xf32>
    %53 = tpu.matmul %50, %51, %cst_16 {dimension_numbers = #tpu.dot_dimension_numbers<[1], [1], [0], [0], [0, 0, 1, 0], [], []>} : vector<128x64xbf16>, vector<128x64xbf16>, vector<128x128xf32> -> vector<128x128xf32>
    %cst_17 = arith.constant dense<0xFF800000> : vector<128xf32>
    %54 = vector.multi_reduction <maximumf>, %53, %cst_17 [1] : vector<128x128xf32> to vector<128xf32>
    %55 = vector.shape_cast %54 : vector<128xf32> to vector<128x1xf32>
    %56 = vector.broadcast %55 : vector<128x1xf32> to vector<128x128xf32>
    %57 = arith.subf %53, %56 : vector<128x128xf32>
    %58 = math.exp %57 : vector<128x128xf32>
    %cst_18 = arith.constant dense<0.000000e+00> : vector<128xf32>
    %59 = vector.multi_reduction <add>, %58, %cst_18 [1] : vector<128x128xf32> to vector<128xf32>
    %60 = vector.shape_cast %59 : vector<128xf32> to vector<128x1xf32>
    %61 = tpu.reciprocal %60 {approx = true} : vector<128x1xf32> -> vector<128x1xf32>
    %62 = arith.truncf %58 : vector<128x128xf32> to vector<128x128xbf16>
    %cst_19 = arith.constant dense<0.000000e+00> : vector<128x64xf32>
    %63 = tpu.matmul %62, %52, %cst_19 {dimension_numbers = #tpu.dot_dimension_numbers<[1], [0], [0], [1], [0, 0, 1, 1], [], []>} : vector<128x128xbf16>, vector<128x64xbf16>, vector<128x64xf32> -> vector<128x64xf32>
    %64 = vector.broadcast %61 : vector<128x1xf32> to vector<128x64xf32>
    %65 = arith.mulf %63, %64 : vector<128x64xf32>
    %66 = arith.truncf %65 : vector<128x64xf32> to vector<128x64xbf16>
    %c0_20 = arith.constant 0 : index
    %c128 = arith.constant 128 : index
    %67 = vector.load %arg7[%c0_20, %c128] : memref<128x256xbf16, #tpu.memory_space<vmem>>, vector<128x64xbf16>
    tpu.vector_store %arg7[%c0_20, %c128], %66 {strides = array<i32>} : memref<128x256xbf16, #tpu.memory_space<vmem>>, vector<128x64xbf16>,
    %68 = vector.extract_strided_slice %9 {offsets = [0, 192], sizes = [128, 64], strides = [1, 1]} : vector<128x256xbf16> to vector<128x64xbf16>
    %69 = vector.extract_strided_slice %11 {offsets = [0, 192], sizes = [128, 64], strides = [1, 1]} : vector<128x256xbf16> to vector<128x64xbf16>
    %70 = vector.extract_strided_slice %13 {offsets = [0, 192], sizes = [128, 64], strides = [1, 1]} : vector<128x256xbf16> to vector<128x64xbf16>
    %cst_21 = arith.constant dense<0.000000e+00> : vector<128x128xf32>
    %71 = tpu.matmul %68, %69, %cst_21 {dimension_numbers = #tpu.dot_dimension_numbers<[1], [1], [0], [0], [0, 0, 1, 0], [], []>} : vector<128x64xbf16>, vector<128x64xbf16>, vector<128x128xf32> -> vector<128x128xf32>
    %cst_22 = arith.constant dense<0xFF800000> : vector<128xf32>
    %72 = vector.multi_reduction <maximumf>, %71, %cst_22 [1] : vector<128x128xf32> to vector<128xf32>
    %73 = vector.shape_cast %72 : vector<128xf32> to vector<128x1xf32>
    %74 = vector.broadcast %73 : vector<128x1xf32> to vector<128x128xf32>
    %75 = arith.subf %71, %74 : vector<128x128xf32>
    %76 = math.exp %75 : vector<128x128xf32>
    %cst_23 = arith.constant dense<0.000000e+00> : vector<128xf32>
    %77 = vector.multi_reduction <add>, %76, %cst_23 [1] : vector<128x128xf32> to vector<128xf32>
    %78 = vector.shape_cast %77 : vector<128xf32> to vector<128x1xf32>
    %79 = tpu.reciprocal %78 {approx = true} : vector<128x1xf32> -> vector<128x1xf32>
    %80 = arith.truncf %76 : vector<128x128xf32> to vector<128x128xbf16>
    %cst_24 = arith.constant dense<0.000000e+00> : vector<128x64xf32>
    %81 = tpu.matmul %80, %70, %cst_24 {dimension_numbers = #tpu.dot_dimension_numbers<[1], [0], [0], [1], [0, 0, 1, 1], [], []>} : vector<128x128xbf16>, vector<128x64xbf16>, vector<128x64xf32> -> vector<128x64xf32>
    %82 = vector.broadcast %79 : vector<128x1xf32> to vector<128x64xf32>
    %83 = arith.mulf %81, %82 : vector<128x64xf32>
    %84 = arith.truncf %83 : vector<128x64xf32> to vector<128x64xbf16>
    %c0_25 = arith.constant 0 : index
    %c192 = arith.constant 192 : index
    %85 = vector.load %arg7[%c0_25, %c192] : memref<128x256xbf16, #tpu.memory_space<vmem>>, vector<128x64xbf16>
    tpu.vector_store %arg7[%c0_25, %c192], %84 {strides = array<i32>} : memref<128x256xbf16, #tpu.memory_space<vmem>>, vector<128x64xbf16>,
    %c0_26 = arith.constant 0 : index
    %c0_27 = arith.constant 0 : index
    %86 = vector.load %arg7[%c0_26, %c0_27] : memref<128x256xbf16, #tpu.memory_space<vmem>>, vector<128x256xbf16>
    %c0_28 = arith.constant 0 : index
    %c0_29 = arith.constant 0 : index
    %87 = vector.load %arg4[%c0_28, %c0_29] : memref<256x256xbf16, #tpu.memory_space<vmem>>, vector<256x256xbf16>
    %cst_30 = arith.constant dense<0.000000e+00> : vector<128x256xf32>
    %88 = tpu.matmul %86, %87, %cst_30 {dimension_numbers = #tpu.dot_dimension_numbers<[1], [0], [0], [1], [0, 0, 1, 1], [], []>} : vector<128x256xbf16>, vector<256x256xbf16>, vector<128x256xf32> -> vector<128x256xf32>
    %c0_31 = arith.constant 0 : index
    %c0_32 = arith.constant 0 : index
    %89 = vector.load %arg5[%c0_31, %c0_32] : memref<1x256xf32, #tpu.memory_space<vmem>>, vector<1x256xf32>
    %90 = vector.shape_cast %89 : vector<1x256xf32> to vector<256xf32>
    %91 = vector.shape_cast %90 : vector<256xf32> to vector<1x256xf32>
    %92 = vector.broadcast %91 : vector<1x256xf32> to vector<128x256xf32>
    %93 = arith.addf %88, %92 : vector<128x256xf32>
    %c0_33 = arith.constant 0 : index
    %c0_34 = arith.constant 0 : index
    %94 = vector.load %arg6[%c0_33, %c0_34] : memref<128x256xf32, #tpu.memory_space<vmem>>, vector<128x256xf32>
    tpu.vector_store %arg6[%c0_33, %c0_34], %93 {strides = array<i32>} : memref<128x256xf32, #tpu.memory_space<vmem>>, vector<128x256xf32>,
    return
  }
  func.func @transform_0(%arg0: i32) -> (i32, i32) {
    %c0_i32 = arith.constant 0 : i32
    %c0_i32_0 = arith.constant 0 : i32
    return %arg0, %c0_i32 : i32, i32
  }
  func.func @transform_1(%arg0: i32) -> (i32, i32) {
    %c0_i32 = arith.constant 0 : i32
    %c0_i32_0 = arith.constant 0 : i32
    %c0_i32_1 = arith.constant 0 : i32
    return %c0_i32, %c0_i32_0 : i32, i32
  }
  func.func @transform_2(%arg0: i32) -> (i32, i32) {
    %c0_i32 = arith.constant 0 : i32
    %c0_i32_0 = arith.constant 0 : i32
    %c0_i32_1 = arith.constant 0 : i32
    return %c0_i32, %c0_i32_0 : i32, i32
  }
  func.func @transform_3(%arg0: i32) -> (i32, i32) {
    %c0_i32 = arith.constant 0 : i32
    %c0_i32_0 = arith.constant 0 : i32
    %c0_i32_1 = arith.constant 0 : i32
    return %c0_i32, %c0_i32_0 : i32, i32
  }
  func.func @transform_4(%arg0: i32) -> (i32, i32) {
    %c0_i32 = arith.constant 0 : i32
    %c0_i32_0 = arith.constant 0 : i32
    %c0_i32_1 = arith.constant 0 : i32
    return %c0_i32, %c0_i32_0 : i32, i32
  }
  func.func @transform_5(%arg0: i32) -> (i32, i32) {
    %c0_i32 = arith.constant 0 : i32
    %c0_i32_0 = arith.constant 0 : i32
    return %arg0, %c0_i32 : i32, i32
  }
}

</mosaic_0001>

<bundles_post_ra>
// kernel: tpu_custom_call.1
= control target key start
LH: loop header
LB: loop body
LE: loop exit
PB: predicated region body
PF: predicated region fallthrough
CT: control target
= control target key end

     0   :  { %10 = vsyncpa [#allocation4], 0  ;;  %s7249_s0 = inlined_call_operand.hbm [shape: bf16[256,256], index: 0, kind: input, shape index: {}]   ;;  %s7250_s1 = inlined_call_operand.hbm [shape: bf16[256,768], index: 1, kind: input, shape index: {}]   ;;  %s7251_s2 = inlined_call_operand.hbm [shape: f32[1,768], index: 2, kind: input, shape index: {}]   ;;  %s7252_s3 = inlined_call_operand.hbm [shape: bf16[256,256], index: 3, kind: input, shape index: {}]   ;;  %s7253_s4 = inlined_call_operand.vmem [shape: f32[1,256], index: 4, kind: input, shape index: {}]   ;;  %s7254_s5 = inlined_call_operand.hbm [shape: f32[256,256], index: 5, kind: output, shape index: {}]  }
   0x1   :  { %12 = vsyncpa [#allocation4 + $0x1], 0 }
   0x2   :  { %13 = vsyncpa [#allocation7], 0 }
   0x3   :  { %14 = vsyncpa [#allocation10], 0 }
   0x4   :  { %15 = vsyncpa [#allocation5], 0 }
   0x5   :  { %17 = vsyncpa [#allocation5 + $0x1], 0  ;;  %s5628_s18 = smov 0   ;;  %s5630_s19 = smov 0  }
   0x6   :  { %s5632_s20 = smov 0   ;;  %s5634_s21 = smov 0  }
   0x7 LB: > { %s5649_s22 = sadd.s32 4294967295, %s5584_s21   ;;  %s4065_s23 = sadd.s32 4294967294, %s5584_s21   ;;  %s5584_s21 = sphi %s5634_s21, %s7377_s21   ;;  %s5580_s20 = sphi %s5632_s20, %s7376_s20   ;;  %s5576_s19 = sphi %s5630_s19, %s7375_s19   ;;  %s5572_s18 = sphi %s5628_s18, %s7374_s18  }
   0x8   : > { %p43_p0 = scmp.ne.s32.totalorder %s5576_s19, %s5572_s18  ;;  %p7255_p1 = scmp.eq.s32.totalorder %s5649_s22, 0 }
   0x9   : > { %p157_p3 = scmp.eq.s32.totalorder %s4065_s23, 1  ;;  %p4066_p5 = scmp.ge.s32.totalorder %s5584_s21, 1 }
   0xa   : > { %p5658_p4 = por %p7255_p1, %p43_p0  ;;  %p164_p7 = scmp.lt.s32.totalorder %s5584_s21, 3 }
   0xb   : > { %p5663_p6 = por %p157_p3, %p43_p0  ;;  %s5586_s27 = smov [#allocation6]  }
   0xc   : > { %s7282_s24 = scalar_select %p5658_p4, 1, 0 }
   0xd   : > { %s7283_s25 = scalar_select %p5663_p6, 1, 0 }
   0xe   : > { %p5668_p8 = pnand %p4066_p5, %p164_p7  ;;  %s176_s28 = sshll.u32 %s5586_s27, 4  ;;  %s177_s28 = int_to_ptr.vmem [resolvable:$true] %s176_s28 }
   0xf   : > { %s5587_s30 = smov [#allocation8]   ;;  %s5588_s7 = smov [#allocation9]  }
  0x10   : > { %s7284_s26 = scalar_select %p5668_p8, 1, 0 }
  0x11   : > { %p4843_p9 = pneg %p5668_p8  ;;  %s190_s6 = sshll.u32 %s5587_s30, 4  ;;  %s191_s6 = int_to_ptr.vmem [resolvable:$true] %s190_s6 }
  0x12   : > { %s200_s8 = sshll.u32 %s5588_s7, 4  ;;  %s5417_s9 = scalar_lea.vmem %s177_s28, 12288  ;;  %s201_s8 = int_to_ptr.vmem [resolvable:$true] %s200_s8 }
  0x13   : > { %p5677_p11 = pnand %p4843_p9, %p7255_p1  ;;  %p5418_p13 = scmp.ne.s32.totalorder %s177_s28, %s5417_s9 }
  0x14   : > { %p5425_p5 = scmp.lt.s32.totalorder %s177_s28, %s177_s28  ;;  %p5426_p7 = scmp.lt.s32.totalorder %s5417_s9, %s5417_s9 }
  0x15   : > { %p5408_p12 = pneg %p5677_p11 }
  0x16   : > { %p5427_p9 = por %p5426_p7, %p5425_p5 }
  0x17   : > { %p5420_p0 = pnand %p5418_p13, %p5408_p12 }
  0x19   : > { %p5421_p3 = pneg %p5420_p0 }
  0x1b   : > { %p5428_p10 = pnand %p5427_p9, %p5421_p3 }
  0x1d   : > { %5431 = shalt.err (!%p5428_p10)
}
  0x1e   : > { %s5589_s10 = smov 384   ;;  %s5590_s11 = smov 24  }
  0x1f   : > { %4846 = dma.hbm_to_vmem [thread:$0]  (!%p5677_p11), %s7250_s1, 12288, %s177_s28, [#allocation7], %s5589_s10, %s5589_s10, %s5590_s11  }
  0x20   : > { %s5443_s14 = scalar_lea.vmem %s191_s6, 96  ;;  %p5451_p2 = scmp.lt.s32.totalorder %s191_s6, %s191_s6 }
  0x21   : > { %p5444_p1 = scmp.ne.s32.totalorder %s191_s6, %s5443_s14  ;;  %p5452_p6 = scmp.lt.s32.totalorder %s5443_s14, %s5443_s14 }
  0x23   : > { %p5446_p13 = pnand %p5444_p1, %p5408_p12  ;;  %p5453_p5 = por %p5452_p6, %p5451_p2 }
  0x25   : > { %p5447_p0 = pneg %p5446_p13 }
  0x27   : > { %p5454_p3 = pnand %p5453_p5, %p5447_p0 }
  0x29   : > { %5457 = shalt.err (!%p5454_p3)
}
  0x2a   : > { %4849 = dma.hbm_to_vmem [thread:$0]  (!%p5677_p11), %s7251_s2, 96, %s191_s6, [#allocation7]  }
  0x2b   : > { %s5469_s17 = scalar_lea.vmem %s201_s8, 4096  ;;  %p5477_p9 = scmp.lt.s32.totalorder %s201_s8, %s201_s8 }
  0x2c   : > { %p5470_p10 = scmp.ne.s32.totalorder %s201_s8, %s5469_s17  ;;  %p5478_p13 = scmp.lt.s32.totalorder %s5469_s17, %s5469_s17 }
  0x2e   : > { %p5472_p7 = pnand %p5470_p10, %p5408_p12  ;;  %p5479_p4 = por %p5478_p13, %p5477_p9 }
  0x30   : > { %p5473_p1 = pneg %p5472_p7 }
  0x32   : > { %p5480_p2 = pnand %p5479_p4, %p5473_p1 }
  0x34   : > { %5483 = shalt.err (!%p5480_p2)
}
  0x35   : > { %s7257_s23 = smov 128   ;;  %s5592_s27 = smov 8  }
  0x36   : > { %4852 = dma.hbm_to_vmem [thread:$0]  (!%p5677_p11), %s7252_s3, 4096, %s201_s8, [#allocation10], %s7257_s23, %s7257_s23, %s5592_s27  }
  0x37   : > { %s5711_s6 = sadd.s32 1, %s5584_s21   ;;  %s30_s9 = sadd.s32 1, %s5580_s20 }
  0x38   : > { %s27_s7 = ssub.s32 %s5584_s21, %s5711_s6  ;;  %p37_p6 = scmp.ne.s32.totalorder %s5580_s20, %s5576_s19 }
  0x39   : > { %p28_p4 = scmp.eq.s32.totalorder %s27_s7, 0  ;;  %p38_p12 = scmp.eq.s32.totalorder %s5584_s21, 0 }
  0x3a   : > { %p4864_p0 = scmp.lt.s32.totalorder %s5584_s21, 2  ;;  %p7286_p3 = scmp.eq.s32.totalorder %s5649_s22, 1 }
  0x3b   : > { %s5721_s10 = scalar_select %p28_p4, %s5580_s20, %s30_s9  }
  0x3c   : > { %p39_p5 = por %p38_p12, %p37_p6  ;;  %p5725_p10 = por %p7286_p3, %p37_p6 }
  0x3d   : > { %s217_s11 = sand.u32 1, %s5580_s20   ;;  %s4344_s12 = sshll.u32 %s5584_s21, 11 }
  0x3e   : > { %s7287_s29 = scalar_select %p5725_p10, 1, 0 }
  0x3f   : > { %s4071_s8 = sshll.u32 %s217_s11, 7  ;;  %s5734_s15 = scalar_lea.hbm %s7249_s0, %s4344_s12 }
  0x40   : > { %s221_s16 = scalar_lea.vmem [#allocation3], %s4071_s8  ;;  %p5736_p11 = pnand %p4864_p0, %p39_p5 }
  0x41   : > { %s229_s17 = sshll.u32 %s221_s16, 4  ;;  %s5742_s30 = scalar_lea.sflag [#allocation4], %s217_s11  ;;  %s5740_s17 = int_to_ptr.vmem [resolvable:$true] %s229_s17 }
  0x42   : > { %s5484_s7 = scalar_lea.hbm %s5734_s15, 2048  ;;  %p5486_p1 = pneg %p5736_p11 }
  0x43   : > { %p5485_p7 = scmp.ne.s32.totalorder %s5734_s15, %s5484_s7  ;;  %s5489_s8 = scalar_lea.hbm %s7249_s0, 4096 }
  0x44   : > { %p5490_p2 = scmp.lt.s32.totalorder %s5734_s15, %s7249_s0  ;;  %p5491_p4 = scmp.lt.s32.totalorder %s5489_s8, %s5484_s7 }
  0x45   : > { %p5487_p9 = pnand %p5486_p1, %p5485_p7 }
  0x46   : > { %p5492_p6 = por %p5491_p4, %p5490_p2 }
  0x47   : > { %p5488_p13 = pneg %p5487_p9 }
  0x49   : > { %p5493_p12 = pnand %p5492_p6, %p5488_p13 }
  0x4b   : > { %5496 = shalt.err (!%p5493_p12)
}
  0x4c   : > { %s5497_s11 = scalar_lea.vmem %s5740_s17, 2048  ;;  %s5593_s16 = smov [#allocation3]  }
  0x4d   : > { %p5498_p0 = scmp.ne.s32.totalorder %s5740_s17, %s5497_s11  ;;  %s5502_s23 = sshll.u32 %s5593_s16, 4  ;;  %s5503_s23 = int_to_ptr.vmem [resolvable:$false] %s5502_s23 }
  0x4e   : > { %s5504_s9 = scalar_lea.vmem %s5503_s23, 4096  ;;  %p5505_p7 = scmp.lt.s32.totalorder %s5740_s17, %s5503_s23 }
  0x4f   : > { %p5500_p5 = pnand %p5498_p0, %p5486_p1  ;;  %p5506_p9 = scmp.lt.s32.totalorder %s5504_s9, %s5497_s11 }
  0x51   : > { %p5501_p3 = pneg %p5500_p5  ;;  %p5507_p10 = por %p5506_p9, %p5505_p7 }
  0x53   : > { %p5508_p8 = pnand %p5507_p10, %p5501_p3 }
  0x55   : > { %5511 = shalt.err (!%p5508_p8)
}
  0x56   : > { %s7289_s7 = smov 128   ;;  %p7290_p1 = scmp.ne.s32.totalorder %s7284_s26, 0 }
  0x57   : > { %4856 = dma.hbm_to_vmem [thread:$0]  (!%p5736_p11), %s5734_s15, 2048, %s5740_s17, %s5742_s30, %s7289_s7, %s7289_s7, %s5592_s27  }
  0x58   : > { %241 = sbr.rel (%p7290_p1) target bundleno = 2220 (0x8ac), region = 40 }
  0x5d   : > { %s5769_s12 = sand.u32 1, %s5576_s19   ;;  %p7291_p8 = scmp.ne.s32.totalorder %s7282_s24, 0 }
  0x5e   : > { %s4076_s23 = sshll.u32 %s5769_s12, 7  ;;  %s244_s8 = scalar_lea.sflag [#allocation4], %s5769_s12 }
  0x5f   : > { %s5773_s13 = scalar_lea.vmem [#allocation3], %s4076_s23 }
  0x60   : > { %5555 = dma.done.wait (%p7291_p8), %s244_s8, 2048  }
  0x61   : > { %5557 = vsyncadd (%p7291_p8), %s244_s8, 4294965248  ;;  %p7292_p10 = scmp.eq.s32.totalorder %s5649_s22, 0 }
  0x63   : > { %5559 = dma.done.wait (%p7292_p10), [#allocation7], 12384   ;;  %p7293_p11 = pmov %p7292_p10 }
  0x64   : > { %p7294_p13 = pmov %p7292_p10 }
  0x65   : > { %5561 = vsyncadd (%p7293_p11), [#allocation7], 4294954912 }
  0x66   : > { %5563 = dma.done.wait (%p7294_p13), [#allocation10], 4096   ;;  %p7295_p2 = pmov %p7292_p10 }
  0x67   : > { %v4911_v0 = vld [vmem:[#allocation6 + $0x154] ss:$24 sps:$4 sm:$0xff]   ;;  %v4913_v1 = vld [vmem:[#allocation6 + $0x150] ss:$24 sps:$4 sm:$0xff]   ;;  %v4914_v2 = vld [vmem:[#allocation6 + $0x124] ss:$24 sps:$4 sm:$0xff]  }
  0x68   : > { %5565 = vsyncadd (%p7295_p2), [#allocation10], 4294963200  ;;  %993 = vmatprep.subr.bf16.mxu1 %v4911_v0  ;;  %v4916_v3 = vld [vmem:[#allocation6 + $0x120] ss:$24 sps:$4 sm:$0xff]   ;;  %v4917_v4 = vld [vmem:[#allocation6 + $0xf4] ss:$24 sps:$4 sm:$0xff]  }
  0x69   : > { %994 = vmatpush1.bf16.msra.mxu1 %v4913_v1  ;;  %v4919_v5 = vld [vmem:[#allocation6 + $0xf0] ss:$24 sps:$4 sm:$0xff]   ;;  %v4920_v6 = vld [vmem:[#allocation6 + $0xc4] ss:$24 sps:$4 sm:$0xff]   ;;  %v4922_v7 = vld [vmem:[#allocation6 + $0xc0] ss:$24 sps:$4 sm:$0xff]  }
  0x6a   : > { %995 = vmatprep.subr.bf16.mxu1 %v4914_v2  ;;  %v4923_v8 = vld [vmem:[#allocation6 + $0x94] ss:$24 sps:$4 sm:$0xff]   ;;  %v4925_v9 = vld [vmem:[#allocation6 + $0x90] ss:$24 sps:$4 sm:$0xff]   ;;  %v4926_v10 = vld [vmem:[#allocation6 + $0x64] ss:$24 sps:$4 sm:$0xff]  }
  0x6b   : > { %v4928_v11 = vld [vmem:[#allocation6 + $0x60] ss:$24 sps:$4 sm:$0xff]   ;;  %v4929_v12 = vld [vmem:[#allocation6 + $0x34] ss:$24 sps:$4 sm:$0xff]   ;;  %v4931_v14 = vld [vmem:[#allocation6 + $0x30] ss:$24 sps:$4 sm:$0xff]  }
  0x6c   : > { %v5788_v13 = vld [vmem:[%s5773_s13 + $0x4] ss:$8 sps:$4 sm:$0xff]   ;;  %v4934_v16 = vld [vmem:[#allocation6] ss:$24 sps:$4 sm:$0xff]   ;;  %v4937_v18 = vld [vmem:[#allocation6 + $0x2d0] ss:$24 sps:$4 sm:$0xff]  }
  0x6d   : > { %996 = vmatpush1.bf16.msra.mxu1 %v4916_v3  ;;  %v4932_v15 = vld [vmem:[#allocation6 + $0x4] ss:$24 sps:$4 sm:$0xff]   ;;  %1025 = vmatprep.mubr.bf16.mxu1 %v5788_v13  ;;  %v4935_v17 = vld [vmem:[#allocation6 + $0x2d4] ss:$24 sps:$4 sm:$0xff]   ;;  %v4985_v21 = vld [vmem:[#allocation6 + $0x160] ss:$24 sps:$4 sm:$0xff]  }
  0x6e   : > { %997 = vmatprep.subr.bf16.mxu1 %v4917_v4  ;;  %1251 = vmatprep.mubr.bf16.mxu0 %v5788_v13  ;;  %v4938_v19 = vld [vmem:[#allocation6 + $0x2a4] ss:$24 sps:$4 sm:$0xff]   ;;  %v4940_v22 = vld [vmem:[#allocation6 + $0x2a0] ss:$24 sps:$4 sm:$0xff]   ;;  %v4989_v23 = vld [vmem:[#allocation6 + $0x134] ss:$24 sps:$4 sm:$0xff]  }
  0x6f   : > { %v4983_v20 = vld [vmem:[#allocation6 + $0x164] ss:$24 sps:$4 sm:$0xff]   ;;  %v4991_v24 = vld [vmem:[#allocation6 + $0x130] ss:$24 sps:$4 sm:$0xff]   ;;  %v4941_v25 = vld [vmem:[#allocation6 + $0x274] ss:$24 sps:$4 sm:$0xff]  }
  0x70   : > { %1219 = vmatprep.subr.bf16.mxu0 %v4983_v20  ;;  %v4943_v26 = vld [vmem:[#allocation6 + $0x270] ss:$24 sps:$4 sm:$0xff]   ;;  %v4998_v27 = vld [vmem:[#allocation6 + $0x104] ss:$24 sps:$4 sm:$0xff]   ;;  %v5000_v28 = vld [vmem:[#allocation6 + $0x100] ss:$24 sps:$4 sm:$0xff]  }
  0x71   : > { %998 = vmatpush1.bf16.msra.mxu1 %v4919_v5  ;;  %1220 = vmatpush1.bf16.msra.mxu0 %v4985_v21  ;;  %v4944_v29 = vld [vmem:[#allocation6 + $0x244] ss:$24 sps:$4 sm:$0xff]   ;;  %v5004_v30 = vld [vmem:[#allocation6 + $0xd4] ss:$24 sps:$4 sm:$0xff]   ;;  %v4946_v31 = vld [vmem:[#allocation6 + $0x240] ss:$24 sps:$4 sm:$0xff]  }
  0x72   : > { %999 = vmatprep.subr.bf16.mxu1 %v4920_v6  ;;  %1221 = vmatprep.subr.bf16.mxu0 %v4989_v23  ;;  %v5006_v32 = vld [vmem:[#allocation6 + $0xd0] ss:$24 sps:$4 sm:$0xff]   ;;  %v4947_v33 = vld [vmem:[#allocation6 + $0x214] ss:$24 sps:$4 sm:$0xff]   ;;  %v5013_v35 = vld [vmem:[#allocation6 + $0xa4] ss:$24 sps:$4 sm:$0xff]  }
  0x73   : > { %v4949_v34 = vld [vmem:[#allocation6 + $0x210] ss:$24 sps:$4 sm:$0xff]   ;;  %v4950_v36 = vld [vmem:[#allocation6 + $0x1e4] ss:$24 sps:$4 sm:$0xff]   ;;  %v5015_v37 = vld [vmem:[#allocation6 + $0xa0] ss:$24 sps:$4 sm:$0xff]  }
  0x74   : > { %v5019_v38 = vld [vmem:[#allocation6 + $0x74] ss:$24 sps:$4 sm:$0xff]   ;;  %v4952_v39 = vld [vmem:[#allocation6 + $0x1e0] ss:$24 sps:$4 sm:$0xff]   ;;  %v5021_v41 = vld [vmem:[#allocation6 + $0x70] ss:$24 sps:$4 sm:$0xff]  }
  0x75   : > { %1000 = vmatpush1.bf16.msra.mxu1 %v4922_v7  ;;  %1222 = vmatpush1.bf16.msra.mxu0 %v4991_v24  ;;  %v4953_v40 = vld [vmem:[#allocation6 + $0x1b4] ss:$24 sps:$4 sm:$0xff]   ;;  %v5028_v42 = vld [vmem:[#allocation6 + $0x44] ss:$24 sps:$4 sm:$0xff]   ;;  %v4955_v43 = vld [vmem:[#allocation6 + $0x1b0] ss:$24 sps:$4 sm:$0xff]  }
  0x76   : > { %1001 = vmatprep.subr.bf16.mxu1 %v4923_v8  ;;  %1223 = vmatprep.subr.bf16.mxu0 %v4998_v27  ;;  %v4956_v44 = vld [vmem:[#allocation6 + $0x184] ss:$24 sps:$4 sm:$0xff]   ;;  %v5030_v45 = vld [vmem:[#allocation6 + $0x40] ss:$24 sps:$4 sm:$0xff]   ;;  %v5034_v46 = vld [vmem:[#allocation6 + $0x14] ss:$24 sps:$4 sm:$0xff]  }
  0x77   : > { %v4958_v47 = vld [vmem:[#allocation6 + $0x180] ss:$24 sps:$4 sm:$0xff]   ;;  %v4964_v48 = vld [vmem:[#allocation6 + $0x15c] ss:$24 sps:$4 sm:$0xff]   ;;  %v5036_v49 = vld [vmem:[#allocation6 + $0x10] ss:$24 sps:$4 sm:$0xff]  }
  0x78   : > { %v5043_v50 = vld [vmem:[#allocation6 + $0x2e4] ss:$24 sps:$4 sm:$0xff]   ;;  %v5793_v51 = vld [vmem:[%s5773_s13] ss:$8 sps:$4 sm:$0xff]   ;;  %v4962_v52 = vld [vmem:[#allocation6 + $0x158] ss:$24 sps:$4 sm:$0xff]  }
  0x79   : > { %1002 = vmatpush1.bf16.msra.mxu1 %v4925_v9  ;;  %1224 = vmatpush1.bf16.msra.mxu0 %v5000_v28  ;;  %v4967_v53 = vld [vmem:[#allocation6 + $0x12c] ss:$24 sps:$4 sm:$0xff]   ;;  %v5796_v54 = vld [vmem:[%s5773_s13 + $0x14] ss:$8 sps:$4 sm:$0xff]   ;;  %v5045_v55 = vld [vmem:[#allocation6 + $0x2e0] ss:$24 sps:$4 sm:$0xff]  }
  0x7a   : > { %1003 = vmatprep.subr.bf16.mxu1 %v4926_v10  ;;  %1225 = vmatprep.subr.bf16.mxu0 %v5004_v30  ;;  %v5049_v56 = vld [vmem:[#allocation6 + $0x2b4] ss:$24 sps:$4 sm:$0xff]   ;;  %v4965_v57 = vld [vmem:[#allocation6 + $0x128] ss:$24 sps:$4 sm:$0xff]   ;;  %v5058_v60 = vld [vmem:[#allocation6 + $0x284] ss:$24 sps:$4 sm:$0xff]  }
  0x7b   : > { %v4973_v58 = vld [vmem:[#allocation6 + $0xfc] ss:$24 sps:$4 sm:$0xff]   ;;  %v5051_v59 = vld [vmem:[#allocation6 + $0x2b0] ss:$24 sps:$4 sm:$0xff]   ;;  %v4976_v63 = vld [vmem:[#allocation6 + $0xcc] ss:$24 sps:$4 sm:$0xff]  }
  0x7c   : > { %v5801_v61 = vld [vmem:[%s5773_s13 + $0x10] ss:$8 sps:$4 sm:$0xff]   ;;  %v5804_v0 = vld [vmem:[%s5773_s13 + $0x24] ss:$8 sps:$4 sm:$0xff]   ;;  %v4974_v3 = vld [vmem:[#allocation6 + $0xc8] ss:$24 sps:$4 sm:$0xff]  }
  0x7d   : > { %1004 = vmatpush1.bf16.msra.mxu1 %v4928_v11  ;;  %1226 = vmatpush1.bf16.msra.mxu0 %v5006_v32  ;;  %v4971_v62 = vld [vmem:[#allocation6 + $0xf8] ss:$24 sps:$4 sm:$0xff]   ;;  %v5064_v2 = vld [vmem:[#allocation6 + $0x254] ss:$24 sps:$4 sm:$0xff]   ;;  %v5067_v6 = vld [vmem:[#allocation6 + $0x224] ss:$24 sps:$4 sm:$0xff]  }
  0x7e   : > { %1005 = vmatprep.subr.bf16.mxu1 %v4929_v12  ;;  %1227 = vmatprep.subr.bf16.mxu0 %v5013_v35  ;;  %v5060_v1 = vld [vmem:[#allocation6 + $0x280] ss:$24 sps:$4 sm:$0xff]   ;;  %v4982_v4 = vld [vmem:[#allocation6 + $0x9c] ss:$24 sps:$4 sm:$0xff]   ;;  %v5066_v5 = vld [vmem:[#allocation6 + $0x250] ss:$24 sps:$4 sm:$0xff]  }
  0x7f   : > { %v5809_v7 = vld [vmem:[%s5773_s13 + $0x20] ss:$8 sps:$4 sm:$0xff]   ;;  %v4980_v8 = vld [vmem:[#allocation6 + $0x98] ss:$24 sps:$4 sm:$0xff]   ;;  %v5812_v9 = vld [vmem:[%s5773_s13 + $0x34] ss:$8 sps:$4 sm:$0xff]  }
  0x80   : > { %v4988_v10 = vld [vmem:[#allocation6 + $0x6c] ss:$24 sps:$4 sm:$0xff]   ;;  %v5069_v11 = vld [vmem:[#allocation6 + $0x220] ss:$24 sps:$4 sm:$0xff]   ;;  %v5027_v32 = vld [vmem:[#allocation6 + $0x27c] ss:$24 sps:$4 sm:$0xff]  }
  0x81   : > { %1006 = vmatpush1.bf16.msra.mxu1 %v4931_v14  ;;  %1228 = vmatpush1.bf16.msra.mxu0 %v5015_v37  ;;  %v5070_v12 = vld [vmem:[#allocation6 + $0x1f4] ss:$24 sps:$4 sm:$0xff]   ;;  %v4986_v14 = vld [vmem:[#allocation6 + $0x68] ss:$24 sps:$4 sm:$0xff]   ;;  %v5010_v28 = vld [vmem:[#allocation6 + $0x2d8] ss:$24 sps:$4 sm:$0xff]  }
  0x82   : > { %1007 = vmatprep.subr.bf16.mxu1 %v4932_v15  ;;  %1229 = vmatprep.subr.bf16.mxu0 %v5019_v38  ;;  %v4997_v15 = vld [vmem:[#allocation6 + $0x3c] ss:$24 sps:$4 sm:$0xff]   ;;  %v5820_v20 = vld [vmem:[%s5773_s13 + $0x44] ss:$8 sps:$4 sm:$0xff]   ;;  %v5001_v24 = vld [vmem:[#allocation6 + $0x8] ss:$24 sps:$4 sm:$0xff]  }
  0x83   : > { %v5003_v21 = vld [vmem:[#allocation6 + $0xc] ss:$24 sps:$4 sm:$0xff]   ;;  %v5825_v27 = vld [vmem:[%s5773_s13 + $0x40] ss:$8 sps:$4 sm:$0xff]   ;;  %v5042_v38 = vld [vmem:[#allocation6 + $0x21c] ss:$24 sps:$4 sm:$0xff]  }
  0x84   : > { %v5076_v23 = vld [vmem:[#allocation6 + $0x194] ss:$24 sps:$4 sm:$0xff]   ;;  %v5031_v37 = vld [vmem:[#allocation6 + $0x248] ss:$24 sps:$4 sm:$0xff]   ;;  %vm1380_vm0 = vcmask 523264   ;;  %s5594_s24 = smov 64  }
  0x85   : > { %1008 = vmatpush1.bf16.msra.mxu1 %v4934_v16  ;;  %1230 = vmatpush1.bf16.msra.mxu0 %v5021_v41  ;;  %v5072_v16 = vld [vmem:[#allocation6 + $0x1f0] ss:$24 sps:$4 sm:$0xff]   ;;  %v5018_v30 = vld [vmem:[#allocation6 + $0x2ac] ss:$24 sps:$4 sm:$0xff]   ;;  %v5052_v41 = vld [vmem:[%s5773_s13 + $0x74] ss:$8 sps:$4 sm:$0xff]  }
  0x86   : > { %1009 = vmatprep.subr.bf16.mxu1 %v4935_v17  ;;  %1231 = vmatprep.subr.bf16.mxu0 %v5028_v42  ;;  %v5073_v17 = vld [vmem:[#allocation6 + $0x1c4] ss:$24 sps:$4 sm:$0xff]   ;;  %vm1839_vm1 = vcmask 519168   ;;  %vm2426_vm2 = vcmask 1043968   ;;  %s4080_s15 = sshll.u32 %s5769_s12, 8  ;;  %s4410_s28 = sshll.u32 %s5649_s22, 12 }
  0x87   : > { %v5037_v35 = vld [vmem:[%s5773_s13 + $0x64] ss:$8 sps:$4 sm:$0xff]   ;;  %s7134_s17 = scalar_lea.vmem [#allocation11], %s4080_s15  ;;  %s7201_s16 = scalar_lea.hbm %s7254_s5, %s4410_s28 }
  0x88   : > { %v5048_v42 = vld [vmem:[#allocation6 + $0x1ec] ss:$24 sps:$4 sm:$0xff]   ;;  %s3963_s30 = sshll.u32 %s7134_s17, 4  ;;  %s3949_s22 = scalar_lea.sflag [#allocation5], %s5769_s12  ;;  %s7203_s30 = int_to_ptr.vmem [resolvable:$true] %s3963_s30 }
  0x89   : > { %1010 = vmatpush2.bf16.msra.mxu1 %v4937_v18  ;;  %1232 = vmatpush1.bf16.msra.mxu0 %v5030_v45  ;;  %v5817_v18 = vld [vmem:[%s5773_s13 + $0x30] ss:$8 sps:$4 sm:$0xff]   ;;  %s5512_s9 = scalar_lea.vmem %s7203_s30, 4096  ;;  %p7371_p6 = scmp.ne.s32.totalorder %s7287_s29, 0 }
  0x8a   : > { %1011 = vmatprep.subr.bf16.mxu1 %v4938_v19  ;;  %1233 = vmatprep.subr.bf16.mxu0 %v5034_v46  ;;  %v4995_v19 = vld [vmem:[#allocation6 + $0x38] ss:$24 sps:$4 sm:$0xff]   ;;  %p5513_p4 = scmp.ne.s32.totalorder %s7203_s30, %s5512_s9  ;;  %s5595_s7 = smov [#allocation11]  }
  0x8b   : > { %v5054_v45 = vld [vmem:[%s5773_s13 + $0x70] ss:$8 sps:$4 sm:$0xff]   ;;  %s5516_s23 = sshll.u32 %s5595_s7, 4  ;;  %s5517_s23 = int_to_ptr.vmem [resolvable:$false] %s5516_s23 }
  0x8c   : > { %v5055_v46 = vld [vmem:[#allocation6 + $0x1b8] ss:$24 sps:$4 sm:$0xff]   ;;  %p5514_p12 = pnand %p5513_p4, %p7371_p6  ;;  %s5518_s8 = scalar_lea.vmem %s5517_s23, 8192 }
  0x8d   : > { %1012 = vmatpush2.bf16.msra.mxu1 %v4940_v22  ;;  %1234 = vmatpush1.bf16.msra.mxu0 %v5036_v49  ;;  %v5075_v22 = vld [vmem:[#allocation6 + $0x1c0] ss:$24 sps:$4 sm:$0xff]   ;;  %p5519_p5 = scmp.lt.s32.totalorder %s7203_s30, %s5517_s23  ;;  %p5520_p3 = scmp.lt.s32.totalorder %s5518_s8, %s5512_s9 }
  0x8e   : > { %1013 = vmatprep.subr.bf16.mxu1 %v4941_v25  ;;  %1235 = vmatprep.subr.bf16.mxu0 %v5043_v50  ;;  %v5012_v25 = vld [vmem:[#allocation6 + $0x2dc] ss:$24 sps:$4 sm:$0xff]   ;;  %p5515_p0 = pneg %p5514_p12 }
  0x8f   : > { %p5521_p7 = por %p5520_p3, %p5519_p5 }
  0x91   : > { %1014 = vmatpush2.bf16.msra.mxu1 %v4943_v26  ;;  %1236 = vmatpush2.bf16.msra.mxu0 %v5045_v55  ;;  %v5078_v26 = vld [vmem:[#allocation6 + $0x190] ss:$24 sps:$4 sm:$0xff]   ;;  %p5522_p9 = pnand %p5521_p7, %p5515_p0 }
  0x92   : > { %1015 = vmatprep.subr.bf16.mxu1 %v4944_v29  ;;  %1237 = vmatprep.subr.bf16.mxu0 %v5049_v56  ;;  %v5828_v29 = vld [vmem:[%s5773_s13 + $0x54] ss:$8 sps:$4 sm:$0xff]  }
  0x95   : > { %1016 = vmatpush2.bf16.msra.mxu1 %v4946_v31  ;;  %1238 = vmatpush2.bf16.msra.mxu0 %v5051_v59  ;;  %v5016_v31 = vld [vmem:[#allocation6 + $0x2a8] ss:$24 sps:$4 sm:$0xff]  }
  0x96   : > { %1017 = vmatprep.subr.bf16.mxu1 %v4947_v33  ;;  %1239 = vmatprep.subr.bf16.mxu0 %v5058_v60  ;;  %v5024_v33 = vld [vmem:[%s5773_s13 + $0x50] ss:$8 sps:$4 sm:$0xff]  }
  0x99   : > { %1018 = vmatpush2.bf16.msra.mxu1 %v4949_v34  ;;  %1240 = vmatpush2.bf16.msra.mxu0 %v5060_v1  ;;  %v5025_v34 = vld [vmem:[#allocation6 + $0x278] ss:$24 sps:$4 sm:$0xff]  }
  0x9a   : > { %1019 = vmatprep.subr.bf16.mxu1 %v4950_v36  ;;  %1241 = vmatprep.subr.bf16.mxu0 %v5064_v2  ;;  %v5033_v36 = vld [vmem:[#allocation6 + $0x24c] ss:$24 sps:$4 sm:$0xff]  }
  0x9d   : > { %1020 = vmatpush2.bf16.msra.mxu1 %v4952_v39  ;;  %1242 = vmatpush2.bf16.msra.mxu0 %v5066_v5  ;;  %v5039_v39 = vld [vmem:[%s5773_s13 + $0x60] ss:$8 sps:$4 sm:$0xff]  }
  0x9e   : > { %1021 = vmatprep.subr.bf16.mxu1 %v4953_v40  ;;  %1243 = vmatprep.subr.bf16.mxu0 %v5067_v6  ;;  %v5040_v40 = vld [vmem:[#allocation6 + $0x218] ss:$24 sps:$4 sm:$0xff]  }
  0xa1   : > { %1022 = vmatpush2.bf16.msra.mxu1 %v4955_v43  ;;  %1244 = vmatpush2.bf16.msra.mxu0 %v5069_v11  ;;  %v5046_v43 = vld [vmem:[#allocation6 + $0x1e8] ss:$24 sps:$4 sm:$0xff]  }
  0xa2   : > { %1023 = vmatprep.subr.bf16.mxu1 %v4956_v44  ;;  %1245 = vmatprep.subr.bf16.mxu0 %v5070_v12  ;;  %v5057_v44 = vld [vmem:[#allocation6 + $0x1bc] ss:$24 sps:$4 sm:$0xff]  }
  0xa5   : > { %1024 = vmatpush2.bf16.msra.mxu1 %v4958_v47  ;;  %1246 = vmatpush2.bf16.msra.mxu0 %v5072_v16  ;;  %v5063_v47 = vld [vmem:[#allocation6 + $0x18c] ss:$24 sps:$4 sm:$0xff]  }
  0xa6   : > { %1106 = vmatprep.subr.bf16.mxu1 %v4964_v48  ;;  %1247 = vmatprep.subr.bf16.mxu0 %v5073_v17  ;;  %v5061_v48 = vld [vmem:[#allocation6 + $0x188] ss:$24 sps:$4 sm:$0xff]  }
  0xa8   : > { %1026 = vmatmul.mubr.bf16.vlgmr.msra.gmra.mxu1 %v5793_v51 }
  0xa9   : > { %1107 = vmatpush1.bf16.msra.mxu1 %v4962_v52  ;;  %1035 = vmatprep.mubr.bf16.mxu1 %v5796_v54 }
  0xaa   : > { %1108 = vmatprep.subr.bf16.mxu1 %v4967_v53  ;;  %1248 = vmatpush2.bf16.msra.mxu0 %v5075_v22 }
  0xab   : > { %1249 = vmatprep.subr.bf16.mxu0 %v5076_v23 }
  0xad   : > { %1109 = vmatpush1.bf16.msra.mxu1 %v4965_v57 }
  0xae   : > { %1110 = vmatprep.subr.bf16.mxu1 %v4973_v58  ;;  %1250 = vmatpush2.bf16.msra.mxu0 %v5078_v26 }
  0xb0   : > { %1036 = vmatmul.mubr.bf16.gmra.mxu1 %v5801_v61 }
  0xb1   : > { %1111 = vmatpush1.bf16.msra.mxu1 %v4971_v62  ;;  %1045 = vmatprep.mubr.bf16.mxu1 %v5804_v0 }
  0xb2   : > { %1112 = vmatprep.subr.bf16.mxu1 %v4976_v63  ;;  %1252 = vmatmul.mubr.bf16.vlgmr.msra.gmra.mxu0 %v5793_v51 }
  0xb3   : > { %1261 = vmatprep.mubr.bf16.mxu0 %v5796_v54 }
  0xb5   : > { %1113 = vmatpush1.bf16.msra.mxu1 %v4974_v3 }
  0xb6   : > { %1114 = vmatprep.subr.bf16.mxu1 %v4982_v4 }
  0xb8   : > { %1046 = vmatmul.mubr.bf16.gmra.mxu1 %v5809_v7 }
  0xb9   : > { %1115 = vmatpush1.bf16.msra.mxu1 %v4980_v8  ;;  %1055 = vmatprep.mubr.bf16.mxu1 %v5812_v9 }
  0xba   : > { %1116 = vmatprep.subr.bf16.mxu1 %v4988_v10  ;;  %1262 = vmatmul.mubr.bf16.gmra.mxu0 %v5801_v61 }
  0xbb   : > { %1271 = vmatprep.mubr.bf16.mxu0 %v5804_v0 }
  0xbd   : > { %1117 = vmatpush1.bf16.msra.mxu1 %v4986_v14 }
  0xbe   : > { %1118 = vmatprep.subr.bf16.mxu1 %v4997_v15 }
  0xc0   : > { %1056 = vmatmul.mubr.bf16.gmra.mxu1 %v5817_v18 }
  0xc1   : > { %1119 = vmatpush1.bf16.msra.mxu1 %v4995_v19  ;;  %1065 = vmatprep.mubr.bf16.mxu1 %v5820_v20 }
  0xc2   : > { %1120 = vmatprep.subr.bf16.mxu1 %v5003_v21  ;;  %1272 = vmatmul.mubr.bf16.gmra.mxu0 %v5809_v7 }
  0xc3   : > { %1281 = vmatprep.mubr.bf16.mxu0 %v5812_v9 }
  0xc5   : > { %1121 = vmatpush1.bf16.msra.mxu1 %v5001_v24 }
  0xc6   : > { %1122 = vmatprep.subr.bf16.mxu1 %v5012_v25 }
  0xc8   : > { %1066 = vmatmul.mubr.bf16.gmra.mxu1 %v5825_v27 }
  0xc9   : > { %1123 = vmatpush2.bf16.msra.mxu1 %v5010_v28  ;;  %1075 = vmatprep.mubr.bf16.mxu1 %v5828_v29 }
  0xca   : > { %1124 = vmatprep.subr.bf16.mxu1 %v5018_v30  ;;  %1282 = vmatmul.mubr.bf16.gmra.mxu0 %v5817_v18 }
  0xcb   : > { %1291 = vmatprep.mubr.bf16.mxu0 %v5820_v20 }
  0xcd   : > { %1125 = vmatpush2.bf16.msra.mxu1 %v5016_v31 }
  0xce   : > { %1126 = vmatprep.subr.bf16.mxu1 %v5027_v32 }
  0xd0   : > { %1076 = vmatmul.mubr.bf16.gmra.mxu1 %v5024_v33 }
  0xd1   : > { %1127 = vmatpush2.bf16.msra.mxu1 %v5025_v34  ;;  %1085 = vmatprep.mubr.bf16.mxu1 %v5037_v35 }
  0xd2   : > { %1128 = vmatprep.subr.bf16.mxu1 %v5033_v36  ;;  %1292 = vmatmul.mubr.bf16.gmra.mxu0 %v5825_v27 }
  0xd3   : > { %1301 = vmatprep.mubr.bf16.mxu0 %v5828_v29 }
  0xd5   : > { %1129 = vmatpush2.bf16.msra.mxu1 %v5031_v37 }
  0xd6   : > { %1130 = vmatprep.subr.bf16.mxu1 %v5042_v38 }
  0xd8   : > { %1086 = vmatmul.mubr.bf16.gmra.mxu1 %v5039_v39 }
  0xd9   : > { %1131 = vmatpush2.bf16.msra.mxu1 %v5040_v40  ;;  %1095 = vmatprep.mubr.bf16.mxu1 %v5052_v41 }
  0xda   : > { %1132 = vmatprep.subr.bf16.mxu1 %v5048_v42  ;;  %1302 = vmatmul.mubr.bf16.gmra.mxu0 %v5024_v33 }
  0xdb   : > { %1311 = vmatprep.mubr.bf16.mxu0 %v5037_v35 }
  0xdd   : > { %1133 = vmatpush2.bf16.msra.mxu1 %v5046_v43 }
  0xde   : > { %1134 = vmatprep.subr.bf16.mxu1 %v5057_v44 }
  0xe0   : > { %1096 = vmatmul.mubr.bf16.gmra.mxu1 %v5054_v45 }
  0xe1   : > { %1135 = vmatpush2.bf16.msra.mxu1 %v5055_v46  ;;  %1138 = vmatprep.mubr.bf16.mxu1 %v5788_v13  ;;  %v403_v13 = vlaneseq }
  0xe2   : > { %1136 = vmatprep.subr.bf16.mxu1 %v5063_v47  ;;  %1312 = vmatmul.mubr.bf16.gmra.mxu0 %v5039_v39 }
  0xe3   : > { %1321 = vmatprep.mubr.bf16.mxu0 %v5052_v41  ;;  %v5858_v49 = vshrl.u32 %v403_v13, 7 }
  0xe5   : > { %1137 = vmatpush2.bf16.msra.mxu1 %v5061_v48  ;;  %7296 = vst [vmem:[#allocation16_spill] sm:$0xff] %v5858_v49  ;;  %v7261_v50 = vsub.s32 0, %v5858_v49  ;;  %v425_v19 = vsub.s32 5, %v5858_v49 }
  0xe8   : > { %1139 = vmatmul.mubr.bf16.vlgmr.msra.gmra.mxu1 %v5793_v51  ;;  %v5861_v51 = vld [vmem:[#allocation8] sm:$0x3f] }
  0xe9   : > { %1148 = vmatprep.mubr.bf16.mxu1 %v5796_v54  ;;  %v5866_v53 = vrot.slane %v5861_v51, %v7261_v50  ;;  %v5911_v25 = vrot.slane %v5861_v51, %v425_v19 }
  0xea   : > { %1322 = vmatmul.mubr.bf16.gmra.mxu0 %v5054_v45 }
  0xeb   : > { %7299 = vst [vmem:[#allocation19_spill] sm:$0xff] %v5911_v25 }
  0xf0   : > { %1149 = vmatmul.mubr.bf16.gmra.mxu1 %v5801_v61 }
  0xf1   : > { %1158 = vmatprep.mubr.bf16.mxu1 %v5804_v0 }
  0xf8   : > { %1159 = vmatmul.mubr.bf16.gmra.mxu1 %v5809_v7 }
  0xf9   : > { %1168 = vmatprep.mubr.bf16.mxu1 %v5812_v9 }
 0x100   : > { %1169 = vmatmul.mubr.bf16.gmra.mxu1 %v5817_v18  ;;  %v421_v18 = vsub.s32 4, %v5858_v49 }
 0x101   : > { %1178 = vmatprep.mubr.bf16.mxu1 %v5820_v20 }
 0x102   : > { %v5908_v24 = vrot.slane %v5861_v51, %v421_v18 }
 0x108   : > { %1179 = vmatmul.mubr.bf16.gmra.mxu1 %v5825_v27 }
 0x109   : > { %1188 = vmatprep.mubr.bf16.mxu1 %v5828_v29 }
 0x110   : > { %1189 = vmatmul.mubr.bf16.gmra.mxu1 %v5024_v33 }
 0x111   : > { %1198 = vmatprep.mubr.bf16.mxu1 %v5037_v35 }
 0x118   : > { %1199 = vmatmul.mubr.bf16.gmra.mxu1 %v5039_v39 }
 0x119   : > { %1208 = vmatprep.mubr.bf16.mxu1 %v5052_v41 }
 0x120   : > { %1209 = vmatmul.mubr.bf16.gmra.mxu1 %v5054_v45 }
 0x168   : > { %v1027_v52 = vpop.f32.mrf.mxu1 }
 0x169   : > { %v1028_v56 = vadd.f32 %v1027_v52, %v5866_v53 }
 0x16a   : > { %v5868_v54 = vpop.f32.mrf.mxu1 }
 0x16c   : > { %v1031_v55 = vpop.f32.mrf.mxu1 }
 0x16d   : > { %v1032_v57 = vadd.f32 %v1031_v55, %v5866_v53 }
 0x16e   : > { %v5872_v58 = vpop.f32.mrf.mxu1 }
 0x16f   : > { %v5874_v59 = vpack.c.bf16 %v1032_v57, %v1028_v56 }
 0x170   : > { %v1037_v60 = vpop.f32.mrf.mxu1 }
 0x171   : > { %v1038_v61 = vadd.f32 %v1037_v60, %v5866_v53  ;;  %4555 = vmatprep.mubr.msk.bf16.mxu1 %vm1380_vm0, %v5874_v59 }
 0x172   : > { %v5879_v62 = vpop.f32.mrf.mxu1  ;;  %v1253_v23 = vpop.f32.mrf.mxu0 }
 0x173   : > { %v1254_v29 = vadd.f32 %v1253_v23, %v5908_v24 }
 0x174   : > { %v1041_v63 = vpop.f32.mrf.mxu1  ;;  %v1255_v27 = vpop.f32.mrf.mxu0 }
 0x175   : > { %v1042_v0 = vadd.f32 %v1041_v63, %v5866_v53  ;;  %v1256_v33 = vadd.f32 %v1255_v27, %v5911_v25 }
 0x176   : > { %v5882_v1 = vpop.f32.mrf.mxu1  ;;  %v1257_v31 = vpop.f32.mrf.mxu0 }
 0x177   : > { %v5884_v2 = vpack.c.bf16 %v1042_v0, %v1038_v61  ;;  %v1258_v34 = vadd.f32 %v1257_v31, %v5908_v24 }
 0x178   : > { %v1047_v3 = vpop.f32.mrf.mxu1  ;;  %v1259_v36 = vpop.f32.mrf.mxu0 }
 0x179   : > { %v1048_v4 = vadd.f32 %v1047_v3, %v5866_v53  ;;  %v5922_v38 = vpack.c.bf16 %v1258_v34, %v1254_v29  ;;  %v1260_v39 = vadd.f32 %v1259_v36, %v5911_v25 }
 0x17a   : > { %v5887_v5 = vpop.f32.mrf.mxu1  ;;  %v1263_v41 = vpop.f32.mrf.mxu0 }
 0x17b   : > { %v5927_v42 = vpack.c.bf16 %v1260_v39, %v1256_v33  ;;  %v1264_v46 = vadd.f32 %v1263_v41, %v5908_v24  ;;  %v417_v33 = vsub.s32 3, %v5858_v49 }
 0x17c   : > { %v1051_v6 = vpop.f32.mrf.mxu1  ;;  %v1265_v44 = vpop.f32.mrf.mxu0 }
 0x17d   : > { %v1052_v7 = vadd.f32 %v1051_v6, %v5866_v53  ;;  %7302 = vst [vmem:[#allocation22_spill] sm:$0xff] %v5927_v42  ;;  %v1266_v52 = vadd.f32 %v1265_v44, %v5911_v25 }
 0x17e   : > { %v5890_v8 = vpop.f32.mrf.mxu1  ;;  %v1267_v48 = vpop.f32.mrf.mxu0 }
 0x17f   : > { %v5892_v9 = vpack.c.bf16 %v1052_v7, %v1048_v4  ;;  %v1268_v55 = vadd.f32 %v1267_v48, %v5908_v24 }
 0x180   : > { %v1057_v10 = vpop.f32.mrf.mxu1  ;;  %v1269_v57 = vpop.f32.mrf.mxu0 }
 0x181   : > { %v1058_v11 = vadd.f32 %v1057_v10, %v5866_v53  ;;  %v5938_v61 = vpack.c.bf16 %v1268_v55, %v1264_v46  ;;  %v1270_v63 = vadd.f32 %v1269_v57, %v5911_v25  ;;  %v7260_v10 = vsub.s32 1, %v5858_v49 }
 0x182   : > { %v5895_v12 = vpop.f32.mrf.mxu1  ;;  %v5943_v3 = vpop.f32.mrf.mxu0 }
 0x183   : > { %7297 = vst [vmem:[#allocation17_spill] sm:$0xff] %v5895_v12  ;;  %v5945_v4 = vpack.c.bf16 %v1270_v63, %v1266_v52  ;;  %v5959_v23 = vrot.slane %v5861_v51, %v7260_v10 }
 0x184   : > { %v1061_v14 = vpop.f32.mrf.mxu1  ;;  %v1275_v7 = vpop.f32.mrf.mxu0 }
 0x185   : > { %v1062_v15 = vadd.f32 %v1061_v14, %v5866_v53  ;;  %7305 = vst [vmem:[#allocation25_spill] sm:$0xff] %v5945_v4  ;;  %v1276_v19 = vadd.f32 %v1275_v7, %v5911_v25 }
 0x186   : > { %v5898_v16 = vpop.f32.mrf.mxu1 }
 0x187   : > { %v5900_v17 = vpack.c.bf16 %v1062_v15, %v1058_v11  ;;  %v5951_v15 = vpop.f32.mrf.mxu0 }
 0x188   : > { %v1067_v20 = vpop.f32.mrf.mxu1 }
 0x189   : > { %v1068_v21 = vadd.f32 %v1067_v20, %v5866_v53 }
 0x18a   : > { %v5905_v22 = vpop.f32.mrf.mxu1 }
 0x18b   : > { %7298 = vst [vmem:[#allocation18_spill] sm:$0xff] %v5905_v22 }
 0x18c   : > { %v1071_v26 = vpop.f32.mrf.mxu1 }
 0x18d   : > { %v1072_v28 = vadd.f32 %v1071_v26, %v5866_v53 }
 0x18e   : > { %v5915_v30 = vpop.f32.mrf.mxu1 }
 0x18f   : > { %7300 = vst [vmem:[#allocation20_spill] sm:$0xff] %v5915_v30  ;;  %v5917_v32 = vpack.c.bf16 %v1072_v28, %v1068_v21  ;;  %v1279_v21 = vpop.f32.mrf.mxu0 }
 0x190   : > { %v1077_v35 = vpop.f32.mrf.mxu1  ;;  %v1280_v27 = vadd.f32 %v1279_v21, %v5911_v25 }
 0x191   : > { %v1078_v37 = vadd.f32 %v1077_v35, %v5866_v53  ;;  %v5963_v29 = vpop.f32.mrf.mxu0 }
 0x192   : > { %v5925_v40 = vpop.f32.mrf.mxu1  ;;  %v5967_v34 = vpack.c.bf16 %v1280_v27, %v1276_v19 }
 0x193   : > { %7301 = vst [vmem:[#allocation21_spill] sm:$0xff] %v5925_v40  ;;  %v1285_v36 = vpop.f32.mrf.mxu0 }
 0x194   : > { %v1081_v43 = vpop.f32.mrf.mxu1  ;;  %7307 = vst [vmem:[#allocation27_spill] sm:$0xff] %v5967_v34  ;;  %v1286_v46 = vadd.f32 %v1285_v36, %v5911_v25 }
 0x195   : > { %v1082_v45 = vadd.f32 %v1081_v43, %v5866_v53  ;;  %v5970_v41 = vpop.f32.mrf.mxu0 }
 0x196   : > { %v5931_v47 = vpop.f32.mrf.mxu1 }
 0x197   : > { %7303 = vst [vmem:[#allocation23_spill] sm:$0xff] %v5931_v47  ;;  %v5933_v13 = vpack.c.bf16 %v1082_v45, %v1078_v37  ;;  %v5976_v45 = vrot.slane %v5861_v51, %v417_v33  ;;  %v1289_v52 = vpop.f32.mrf.mxu0 }
 0x198   : > { %v1087_v56 = vpop.f32.mrf.mxu1 }
 0x199   : > { %v1088_v60 = vadd.f32 %v1087_v56, %v5866_v53  ;;  %v1290_v56 = vadd.f32 %v1289_v52, %v5911_v25  ;;  %v5984_v57 = vpop.f32.mrf.mxu0 }
 0x19a   : > { %v5941_v0 = vpop.f32.mrf.mxu1 }
 0x19b   : > { %7304 = vst [vmem:[#allocation24_spill] sm:$0xff] %v5941_v0  ;;  %v5987_v63 = vpack.c.bf16 %v1290_v56, %v1286_v46  ;;  %v1295_v7 = vpop.f32.mrf.mxu0 }
 0x19c   : > { %v1091_v6 = vpop.f32.mrf.mxu1  ;;  %v1296_v21 = vadd.f32 %v1295_v7, %v5911_v25 }
 0x19d   : > { %v1092_v11 = vadd.f32 %v1091_v6, %v5866_v53  ;;  %7309 = vst [vmem:[#allocation29_spill] sm:$0xff] %v5987_v63  ;;  %v5991_v19 = vpop.f32.mrf.mxu0 }
 0x19e   : > { %v5949_v14 = vpop.f32.mrf.mxu1 }
 0x19f   : > { %7306 = vst [vmem:[#allocation26_spill] sm:$0xff] %v5949_v14  ;;  %v5953_v18 = vpack.c.bf16 %v1092_v11, %v1088_v60  ;;  %v1299_v27 = vpop.f32.mrf.mxu0 }
 0x1a0   : > { %v1097_v20 = vpop.f32.mrf.mxu1 }
 0x1a1   : > { %v1098_v26 = vadd.f32 %v1097_v20, %v5866_v53 }
 0x1a2   : > { %v1099_v28 = vpop.f32.mrf.mxu1 }
 0x1a3   : > { %v1100_v31 = vadd.f32 %v1099_v28, %v5959_v23 }
 0x1a4   : > { %v1101_v35 = vpop.f32.mrf.mxu1 }
 0x1a5   : > { %v1102_v37 = vadd.f32 %v1101_v35, %v5866_v53  ;;  %v6000_v35 = vpop.f32.mrf.mxu0 }
 0x1a6   : > { %v1103_v39 = vpop.f32.mrf.mxu1 }
 0x1a7   : > { %v5972_v43 = vpack.c.bf16 %v1102_v37, %v1098_v26  ;;  %v1104_v44 = vadd.f32 %v1103_v39, %v5959_v23 }
 0x1a8   : > { %v5979_v48 = vpop.f32.mrf.mxu1 }
 0x1a9   : > { %v5981_v55 = vpack.c.bf16 %v1104_v44, %v1100_v31  ;;  %v1300_v31 = vadd.f32 %v1299_v27, %v5911_v25  ;;  %v1305_v44 = vpop.f32.mrf.mxu0 }
 0x1aa   : > { %v1142_v53 = vpop.f32.mrf.mxu1 }
 0x1ab   : > { %7308 = vst [vmem:[#allocation28_spill] sm:$0xff] %v5981_v55  ;;  %v1143_v60 = vadd.f32 %v1142_v53, %v5976_v45  ;;  %v6003_v37 = vpack.c.bf16 %v1300_v31, %v1296_v21  ;;  %v6007_v52 = vpop.f32.mrf.mxu0  ;;  %v1306_v53 = vadd.f32 %v1305_v44, %v5911_v25 }
 0x1ac   : > { %v5989_v6 = vpop.f32.mrf.mxu1 }
 0x1ad   : > { %7310 = vst [vmem:[#allocation30_spill] sm:$0xff] %v6003_v37  ;;  %v1309_v7 = vpop.f32.mrf.mxu0 }
 0x1ae   : > { %v1146_v11 = vpop.f32.mrf.mxu1 }
 0x1af   : > { %v1147_v20 = vadd.f32 %v1146_v11, %v5976_v45 }
 0x1b0   : > { %v5995_v26 = vpop.f32.mrf.mxu1 }
 0x1b1   : > { %v5997_v28 = vpack.c.bf16 %v1147_v20, %v1143_v60  ;;  %v1310_v20 = vadd.f32 %v1309_v7, %v5911_v25 }
 0x1b2   : > { %v1152_v33 = vpop.f32.mrf.mxu1 }
 0x1b3   : > { %v1153_v36 = vadd.f32 %v1152_v33, %v5976_v45  ;;  %v6014_v33 = vpop.f32.mrf.mxu0  ;;  %v6017_v31 = vpack.c.bf16 %v1310_v20, %v1306_v53 }
 0x1b4   : > { %v6005_v39 = vpop.f32.mrf.mxu1 }
 0x1b5   : > { %7311 = vst [vmem:[#allocation31_spill] sm:$0xff] %v6017_v31  ;;  %v1315_v50 = vpop.f32.mrf.mxu0 }
 0x1b6   : > { %v1156_v46 = vpop.f32.mrf.mxu1 }
 0x1b7   : > { %v1157_v56 = vadd.f32 %v1156_v46, %v5976_v45  ;;  %v6019_v4 = vpop.f32.mrf.mxu0  ;;  %v1316_v46 = vadd.f32 %v1315_v50, %v5911_v25 }
 0x1b8   : > { %v1160_v60 = vpop.f32.mrf.mxu1 }
 0x1b9   : > { %v6011_v11 = vpack.c.bf16 %v1157_v56, %v1153_v36  ;;  %v1319_v56 = vpop.f32.mrf.mxu0 }
 0x1ba   : > { %v1162_v27 = vpop.f32.mrf.mxu1  ;;  %v1320_v34 = vadd.f32 %v1319_v56, %v5911_v25 }
 0x1bb   : > { %v1163_v21 = vadd.f32 %v1162_v27, %v5976_v45 }
 0x1bc   : > { %v1164_v10 = vpop.f32.mrf.mxu1  ;;  %v6029_v20 = vpack.c.bf16 %v1320_v34, %v1316_v46 }
 0x1be   : > { %v1166_v42 = vpop.f32.mrf.mxu1  ;;  %7312 = vst [vmem:[#allocation32_spill] sm:$0xff] %v6029_v20 }
 0x1bf   : > { %v1167_v44 = vadd.f32 %v1166_v42, %v5976_v45 }
 0x1c0   : > { %v6023_v36 = vpop.f32.mrf.mxu1 }
 0x1c1   : > { %v6025_v7 = vpack.c.bf16 %v1167_v44, %v1163_v21  ;;  %v413_v44 = vsub.s32 2, %v5858_v49 }
 0x1c2   : > { %v1172_v63 = vpop.f32.mrf.mxu1 }
 0x1c3   : > { %v1173_v53 = vadd.f32 %v1172_v63, %v5976_v45  ;;  %v414_v46 = vrot.slane %v5861_v51, %v413_v44 }
 0x1c4   : > { %v1174_v27 = vpop.f32.mrf.mxu1 }
 0x1c5   : > { %v1165_v51 = vadd.f32 %v1164_v10, %v414_v46 }
 0x1c6   : > { %v1176_v37 = vpop.f32.mrf.mxu1 }
 0x1c7   : > { %v1177_v31 = vadd.f32 %v1176_v37, %v5976_v45 }
 0x1c8   : > { %v1180_v55 = vpop.f32.mrf.mxu1 }
 0x1c9   : > { %v6032_v42 = vpack.c.bf16 %v1177_v31, %v1173_v53  ;;  %v1181_v49 = vadd.f32 %v1180_v55, %v414_v46 }
 0x1ca   : > { %v1182_v50 = vpop.f32.mrf.mxu1 }
 0x1cb   : > { %v1183_v0 = vadd.f32 %v1182_v50, %v5976_v45 }
 0x1cc   : > { %v1184_v40 = vpop.f32.mrf.mxu1 }
 0x1cd   : > { %v1185_v47 = vadd.f32 %v1184_v40, %v414_v46 }
 0x1ce   : > { %v1186_v21 = vpop.f32.mrf.mxu1 }
 0x1cf   : > { %v1187_v56 = vadd.f32 %v1186_v21, %v5976_v45  ;;  %v6047_v21 = vpack.c.bf16 %v1185_v47, %v1181_v49 }
 0x1d0   : > { %v1190_v25 = vpop.f32.mrf.mxu1 }
 0x1d1   : > { %v6037_v63 = vpack.c.bf16 %v1187_v56, %v1183_v0  ;;  %v1191_v31 = vadd.f32 %v1190_v25, %v414_v46  ;;  %v1161_v25 = vadd.f32 %v1160_v60, %v414_v46 }
 0x1d2   : > { %v1192_v34 = vpop.f32.mrf.mxu1 }
 0x1d3   : > { %v1193_v37 = vadd.f32 %v1192_v34, %v5976_v45  ;;  %v6054_v55 = vpack.c.bf16 %v1165_v51, %v1161_v25  ;;  %v1175_v51 = vadd.f32 %v1174_v27, %v414_v46  ;;  %v1155_v25 = vadd.f32 %v6005_v39, %v414_v46 }
 0x1d4   : > { %v1194_v20 = vpop.f32.mrf.mxu1  ;;  %v1308_v39 = vadd.f32 %v6007_v52, %v5908_v24  ;;  %v1318_v52 = vadd.f32 %v6019_v4, %v5908_v24 }
 0x1d5   : > { %v1195_v53 = vadd.f32 %v1194_v20, %v414_v46  ;;  %v1141_v20 = vadd.f32 %v5979_v48, %v414_v46 }
 0x1d6   : > { %v1196_v14 = vpop.f32.mrf.mxu1 }
 0x1d7   : > { %v1358_v50 = vpack.c.bf16 %v1195_v53, %v1191_v31  ;;  %v1197_v22 = vadd.f32 %v1196_v14, %v5976_v45  ;;  %v1145_v14 = vadd.f32 %v5989_v6, %v414_v46  ;;  %v1323_v31 = vpop.f32.mrf.mxu0 }
 0x1d8   : > { %v1200_v12 = vpop.f32.mrf.mxu1 }
 0x1d9   : > { %v6042_v30 = vpack.c.bf16 %v1197_v22, %v1193_v37  ;;  %1898 = vrot.lane.b32.xlu1 %v1358_v50, %s5594_s24  ;;  %v6061_v49 = vpack.c.bf16 %v1145_v14, %v1141_v20  ;;  %v1201_v6 = vadd.f32 %v1200_v12, %v414_v46  ;;  %v1171_v12 = vadd.f32 %v6023_v36, %v414_v46 }
 0x1da   : > { %v6045_v0 = vpop.f32.mrf.mxu1  ;;  %v1151_v20 = vadd.f32 %v5995_v26, %v414_v46  ;;  %v1304_v26 = vadd.f32 %v6000_v35, %v5908_v24  ;;  %v1278_v35 = vadd.f32 %v5951_v15, %v5908_v24  ;;  %v1288_v15 = vadd.f32 %v5970_v41, %v5908_v24 }
 0x1db   : > { %v1354_v14 = vpack.c.bf16 %v1175_v51, %v1171_v12 }
 0x1dc   : > { %v1204_v44 = vpop.f32.mrf.mxu1 }
 0x1dd   : > { %1896 = vrot.lane.b32.xlu1 %v6047_v21, %s5594_s24  ;;  %v1205_v60 = vadd.f32 %v1204_v44, %v414_v46  ;;  %v6071_v44 = vpop.f32.mrf.mxu0 }
 0x1de   : > { %v6051_v40 = vpop.f32.mrf.mxu1 }
 0x1df   : > { %v1360_v53 = vpack.c.bf16 %v1205_v60, %v1201_v6  ;;  %v1350_v60 = vpack.c.bf16 %v1155_v25, %v1151_v20  ;;  %v1298_v6 = vadd.f32 %v5991_v19, %v5908_v24  ;;  %v1314_v19 = vadd.f32 %v6014_v33, %v5908_v24 }
 0x1e0   : > { %v1210_v22 = vpop.f32.mrf.mxu1  ;;  %v1207_v4 = vadd.f32 %v6051_v40, %v5976_v45 }
 0x1e1   : > { %1892 = vrot.lane.b32.xlu1 %v6054_v55, %s5594_s24  ;;  %v1211_v56 = vadd.f32 %v1210_v22, %v414_v46  ;;  %v1327_v22 = vpop.f32.mrf.mxu0  ;;  %v1424_v27 = vsel %vm1380_vm0, %v1360_v53, 0  ;;  %v1376_v33 = vpack.c.bf16 %v1318_v52, %v1314_v19  ;;  %v1409_v12 = vsel %vm1380_vm0, %v1350_v60, 0 }
 0x1e2   : > { %v6059_v10 = vpop.f32.mrf.mxu1  ;;  %v1328_v36 = vadd.f32 %v1327_v22, %v5908_v24  ;;  %v2480_v52 = vsel %vm1380_vm0, %v6037_v63, 0 }
 0x1e4   : > { %v1214_v47 = vpop.f32.mrf.mxu1 }
 0x1e5   : > { %v1215_v34 = vadd.f32 %v1214_v47, %v414_v46  ;;  %1888 = vrot.lane.b32.xlu1 %v6061_v49, %s5594_s24  ;;  %v1324_v47 = vadd.f32 %v1323_v31, %v5908_v24 }
 0x1e6   : > { %v1216_v41 = vpop.f32.mrf.mxu1 }
 0x1e7   : > { %v1362_v37 = vpack.c.bf16 %v1215_v34, %v1211_v56  ;;  %v1378_v46 = vpack.c.bf16 %v1328_v36, %v1324_v47  ;;  %v1421_v56 = vsel %vm1380_vm0, %v1358_v50, 0  ;;  %v1294_v34 = vadd.f32 %v5984_v57, %v5908_v24 }
 0x1e8   : > { %v1217_v40 = vadd.f32 %v1216_v41, %v5976_v45 }
 0x1e9   : > { %1902 = vrot.lane.b32.xlu0 %v1362_v37, %s5594_s24  ;;  %4795 = vmatprep.subr.msk.bf16.mxu1 %vm1380_vm0, %v1362_v37  ;;  %v1427_v48 = vsel %vm1380_vm0, %v1362_v37, 0  ;;  %v1374_v37 = vpack.c.bf16 %v1308_v39, %v1304_v26  ;;  %v1372_v57 = vpack.c.bf16 %v1298_v6, %v1294_v34 }
 0x1ea   : > { %1866 = vrot.lane.b32.xlu1 %v5884_v2, %s5594_s24  ;;  %4540 = vmatpush3.bf16.xpose.msra.mxu1 %v1427_v48  ;;  %v1412_v48 = vsel %vm1380_vm0, %v6054_v55, 0 }
 0x1eb   : > { %4796 = vmatprep.subr.msk.bf16.mxu1 %vm1380_vm0, %v1360_v53 }
 0x1ed   : > { %1900 = vrot.lane.b32.xlu0 %v1360_v53, %s5594_s24  ;;  %v1415_v53 = vsel %vm1380_vm0, %v1354_v14, 0 }
 0x1ee   : > { %1870 = vrot.lane.b32.xlu1 %v5900_v17, %s5594_s24 }
 0x1f1   : > { %1894 = vrot.lane.b32.xlu0 %v1354_v14, %s5594_s24 }
 0x1f2   : > { %1874 = vrot.lane.b32.xlu1 %v5933_v13, %s5594_s24  ;;  %4542 = vmatpush3.bf16.xpose.msra.mxu1 %v1424_v27 }
 0x1f3   : > { %4797 = vmatprep.subr.msk.bf16.mxu1 %vm1380_vm0, %v1358_v50  ;;  %v1418_v50 = vsel %vm1380_vm0, %v6047_v21, 0 }
 0x1f5   : > { %1890 = vrot.lane.b32.xlu0 %v1350_v60, %s5594_s24 }
 0x1f6   : > { %1878 = vrot.lane.b32.xlu1 %v5972_v43, %s5594_s24 }
 0x1f9   : > { %1864 = vrot.lane.b32.xlu0 %v5874_v59, %s5594_s24  ;;  %v1274_v59 = vadd.f32 %v5943_v3, %v5908_v24  ;;  %v1284_v3 = vadd.f32 %v5963_v29, %v5908_v24  ;;  %v1203_v29 = vadd.f32 %v6045_v0, %v5976_v45  ;;  %v1213_v0 = vadd.f32 %v6059_v10, %v5976_v45 }
 0x1fa   : > { %2207 = vrot.lane.b32.xlu1 %v1378_v46, %s5594_s24  ;;  %4544 = vmatpush3.bf16.xpose.msra.mxu1 %v1421_v56  ;;  %v1406_v45 = vsel %vm1380_vm0, %v6061_v49, 0 }
 0x1fb   : > { %4798 = vmatprep.subr.msk.bf16.mxu1 %vm1380_vm0, %v6047_v21  ;;  %v1368_v31 = vpack.c.bf16 %v1278_v35, %v1274_v59  ;;  %v1370_v21 = vpack.c.bf16 %v1288_v15, %v1284_v3  ;;  %v6137_v24 = vpack.c.bf16 %v1207_v4, %v1203_v29  ;;  %v6149_v51 = vpack.c.bf16 %v1217_v40, %v1213_v0 }
 0x1fc   : > { %v2483_v59 = vsel %vm1380_vm0, %v6042_v30, 0  ;;  %v1034_v35 = vadd.f32 %v5872_v58, %v5959_v23  ;;  %v2477_v58 = vsel %vm1380_vm0, %v6032_v42, 0  ;;  %v1044_v3 = vadd.f32 %v5882_v1, %v5959_v23 }
 0x1fd   : > { %1868 = vrot.lane.b32.xlu0 %v5892_v9, %s5594_s24  ;;  %v2489_v56 = vsel %vm1380_vm0, %v6149_v51, 0  ;;  %v2486_v6 = vsel %vm1380_vm0, %v6137_v24, 0  ;;  %v1054_v15 = vadd.f32 %v5890_v8, %v5959_v23  ;;  %v1050_v4 = vadd.f32 %v5887_v5, %v5959_v23  ;;  %v7313_v8 = vld [vmem:[#allocation20_spill] sm:$0xff]  ;;  %v7315_v5 = vld [vmem:[#allocation18_spill] sm:$0xff] }
 0x1fe   : > { %2203 = vrot.lane.b32.xlu1 %v1374_v37, %s5594_s24  ;;  %v1064_v1 = vadd.f32 %v5898_v16, %v5959_v23  ;;  %v1074_v29 = vadd.f32 %v7313_v8, %v5959_v23  ;;  %v1070_v41 = vadd.f32 %v7315_v5, %v5959_v23  ;;  %v7317_v16 = vld [vmem:[#allocation23_spill] sm:$0xff] }
 0x200   : > { %v6270_v0 = vpack.c.bf16 %v1074_v29, %v1070_v41 }
 0x201   : > { %1872 = vrot.lane.b32.xlu0 %v5917_v32, %s5594_s24 }
 0x202   : > { %2201 = vrot.lane.b32.xlu1 %v1372_v57, %s5594_s24  ;;  %4546 = vmatpush3.bf16.xpose.msra.mxu1 %v1418_v50  ;;  %v2471_v50 = vsel %vm1380_vm0, %v6011_v11, 0 }
 0x203   : > { %4799 = vmatprep.subr.msk.bf16.mxu1 %vm1380_vm0, %v1354_v14 }
 0x205   : > { %1876 = vrot.lane.b32.xlu0 %v5953_v18, %s5594_s24 }
 0x206   : > { %2197 = vrot.lane.b32.xlu1 %v1368_v31, %s5594_s24 }
 0x209   : > { %2205 = vrot.lane.b32.xlu0 %v1376_v33, %s5594_s24 }
 0x20a   : > { %2193 = vrot.lane.b32.xlu1 %v5922_v38, %s5594_s24  ;;  %4548 = vmatpush3.bf16.xpose.msra.mxu1 %v1415_v53  ;;  %v6254_v53 = vpack.c.bf16 %v1054_v15, %v1050_v4 }
 0x20b   : > { %4800 = vmatprep.subr.msk.bf16.mxu1 %vm1380_vm0, %v6054_v55 }
 0x20d   : > { %2199 = vrot.lane.b32.xlu0 %v1370_v21, %s5594_s24 }
 0x20e   : > { %2961 = vrot.lane.b32.xlu1 %v6137_v24, %s5594_s24 }
 0x211   : > { %2195 = vrot.lane.b32.xlu0 %v5938_v61, %s5594_s24 }
 0x212   : > { %4550 = vmatpush3.bf16.xpose.msra.mxu1 %v1412_v48  ;;  %v1084_v48 = vadd.f32 %v7317_v16, %v5959_v23 }
 0x213   : > { %4801 = vmatprep.subr.msk.bf16.mxu1 %vm1380_vm0, %v1350_v60 }
 0x215   : > { %2963 = vrot.lane.b32.xlu0 %v6149_v51, %s5594_s24 }
 0x21a   : > { %4552 = vmatpush3.bf16.xpose.msra.mxu1 %v1409_v12 }
 0x21b   : > { %4802 = vmatprep.subr.msk.bf16.mxu1 %vm1380_vm0, %v6061_v49 }
 0x222   : > { %4554 = vmatpush3.bf16.xpose.msra.mxu1 %v1406_v45  ;;  %v7319_v45 = vld [vmem:[#allocation21_spill] sm:$0xff] }
 0x223   : > { %4571 = vmatprep.subr.bf16.mxu1 %v1378_v46 }
 0x229   : > { %4556 = vmatmul.mubr.msk.bf16.vlgmr.msra.gmra.mxu1 %vm1380_vm0, %v5884_v2 }
 0x22a   : > { %4559 = vmatprep.mubr.msk.bf16.mxu1 %vm1380_vm0, %v5892_v9  ;;  %4572 = vmatpush3.bf16.msra.mxu1 %v1378_v46 }
 0x22b   : > { %4573 = vmatprep.subr.bf16.mxu1 %v1376_v33 }
 0x22e   : > { %4574 = vmatpush3.bf16.msra.mxu1 %v1376_v33  ;;  %v1040_v33 = vadd.f32 %v5879_v62, %v5959_v23  ;;  %v7314_v62 = vld [vmem:[#allocation17_spill] sm:$0xff] }
 0x22f   : > { %4575 = vmatprep.subr.bf16.mxu1 %v1374_v37 }
 0x231   : > { %4560 = vmatmul.mubr.msk.bf16.gmra.mxu1 %vm1380_vm0, %v5900_v17 }
 0x232   : > { %4563 = vmatprep.mubr.msk.bf16.mxu1 %vm1380_vm0, %v5917_v32  ;;  %4576 = vmatpush3.bf16.msra.mxu1 %v1374_v37 }
 0x233   : > { %4577 = vmatprep.subr.bf16.mxu1 %v1372_v57 }
 0x236   : > { %4578 = vmatpush3.bf16.msra.mxu1 %v1372_v57  ;;  %v1030_v57 = vadd.f32 %v5868_v54, %v5959_v23  ;;  %v2474_v54 = vsel %vm1380_vm0, %v6025_v7, 0 }
 0x237   : > { %4579 = vmatprep.subr.bf16.mxu1 %v1370_v21 }
 0x238   : > { %v6221_v19 = vpack.c.bf16 %v1034_v35, %v1030_v57 }
 0x239   : > { %4564 = vmatmul.mubr.msk.bf16.gmra.mxu1 %vm1380_vm0, %v5933_v13 }
 0x23a   : > { %4567 = vmatprep.mubr.msk.bf16.mxu1 %vm1380_vm0, %v5953_v18  ;;  %4580 = vmatpush3.bf16.msra.mxu1 %v1370_v21  ;;  %v6252_v21 = vpack.c.bf16 %v1044_v3, %v1040_v33 }
 0x23b   : > { %4581 = vmatprep.subr.bf16.mxu1 %v1368_v31 }
 0x23e   : > { %4582 = vmatpush3.bf16.msra.mxu1 %v1368_v31  ;;  %v2468_v31 = vsel %vm1380_vm0, %v5997_v28, 0 }
 0x23f   : > { %4583 = vmatprep.subr.bf16.mxu1 %v5938_v61 }
 0x241   : > { %4568 = vmatmul.mubr.msk.bf16.gmra.mxu1 %vm1380_vm0, %v5972_v43 }
 0x242   : > { %4584 = vmatpush3.bf16.msra.mxu1 %v5938_v61 }
 0x243   : > { %4585 = vmatprep.subr.bf16.mxu1 %v5922_v38 }
 0x246   : > { %4586 = vmatpush3.bf16.msra.mxu1 %v5922_v38 }
 0x24b   : > { %v1899_v2 = vpop.permute.xlu1 %1898 }
 0x24c   : > { %v1944_v27 = vsel %vm1380_vm0, %v1899_v2, 0 }
 0x24f   : > { %v1897_v9 = vpop.permute.xlu1 %1896 }
 0x250   : > { %v1941_v47 = vsel %vm1380_vm0, %v1897_v9, 0 }
 0x253   : > { %v1893_v17 = vpop.permute.xlu1 %1892 }
 0x254   : > { %v1935_v60 = vsel %vm1380_vm0, %v1893_v17, 0 }
 0x257   : > { %v1889_v32 = vpop.permute.xlu1 %1888 }
 0x258   : > { %v1929_v39 = vsel %vm1380_vm0, %v1889_v32, 0 }
 0x25b   : > { %v1903_v13 = vpop.permute.xlu0 %1902 }
 0x25c   : > { %v1867_v18 = vpop.permute.xlu1 %1866  ;;  %4803 = vmatprep.subr.msk.bf16.mxu0 %vm1380_vm0, %v1903_v13  ;;  %v1950_v55 = vsel %vm1380_vm0, %v1903_v13, 0 }
 0x25d   : > { %4604 = vmatpush3.bf16.xpose.msra.mxu0 %v1950_v55 }
 0x25f   : > { %v1901_v10 = vpop.permute.xlu0 %1900 }
 0x260   : > { %v1871_v49 = vpop.permute.xlu1 %1870  ;;  %4804 = vmatprep.subr.msk.bf16.mxu0 %vm1380_vm0, %v1901_v10  ;;  %v1947_v25 = vsel %vm1380_vm0, %v1901_v10, 0 }
 0x263   : > { %v1895_v61 = vpop.permute.xlu0 %1894 }
 0x264   : > { %v1875_v43 = vpop.permute.xlu1 %1874  ;;  %v1938_v36 = vsel %vm1380_vm0, %v1895_v61, 0 }
 0x265   : > { %4606 = vmatpush3.bf16.xpose.msra.mxu0 %v1947_v25 }
 0x266   : > { %4805 = vmatprep.subr.msk.bf16.mxu0 %vm1380_vm0, %v1899_v2  ;;  %v1080_v2 = vadd.f32 %v7319_v45, %v5959_v23 }
 0x267   : > { %v1891_v38 = vpop.permute.xlu0 %1890 }
 0x268   : > { %v1879_v14 = vpop.permute.xlu1 %1878  ;;  %v1932_v26 = vsel %vm1380_vm0, %v1891_v38, 0  ;;  %v6286_v13 = vpack.c.bf16 %v1084_v48, %v1080_v2 }
 0x26a   : > { %7321 = vst [vmem:[#allocation17_spill] sm:$0xff] %v6286_v13 }
 0x26b   : > { %v1865_v22 = vpop.permute.xlu0 %1864 }
 0x26c   : > { %v6182_v20 = vpop.permute.xlu1 %2207  ;;  %4619 = vmatprep.mubr.msk.bf16.mxu0 %vm1380_vm0, %v1865_v22 }
 0x26d   : > { %4608 = vmatpush3.bf16.xpose.msra.mxu0 %v1944_v27  ;;  %4635 = vmatprep.subr.bf16.mxu1 %v6182_v20 }
 0x26e   : > { %4806 = vmatprep.subr.msk.bf16.mxu0 %vm1380_vm0, %v1897_v9  ;;  %v7320_v9 = vld [vmem:[#allocation24_spill] sm:$0xff] }
 0x26f   : > { %v1869_v46 = vpop.permute.xlu0 %1868 }
 0x273   : > { %v1873_v34 = vpop.permute.xlu0 %1872 }
 0x275   : > { %4610 = vmatpush3.bf16.xpose.msra.mxu0 %v1941_v47 }
 0x276   : > { %4807 = vmatprep.subr.msk.bf16.mxu0 %vm1380_vm0, %v1895_v61 }
 0x277   : > { %v1877_v37 = vpop.permute.xlu0 %1876 }
 0x27d   : > { %4612 = vmatpush3.bf16.xpose.msra.mxu0 %v1938_v36 }
 0x27e   : > { %4808 = vmatprep.subr.msk.bf16.mxu0 %vm1380_vm0, %v1893_v17  ;;  %v1090_v17 = vadd.f32 %v7320_v9, %v5959_v23 }
 0x285   : > { %4614 = vmatpush3.bf16.xpose.msra.mxu0 %v1935_v60 }
 0x286   : > { %4809 = vmatprep.subr.msk.bf16.mxu0 %vm1380_vm0, %v1891_v38 }
 0x28d   : > { %4616 = vmatpush3.bf16.xpose.msra.mxu0 %v1932_v26 }
 0x28e   : > { %4810 = vmatprep.subr.msk.bf16.mxu0 %vm1380_vm0, %v1889_v32 }
 0x295   : > { %4618 = vmatpush3.bf16.xpose.msra.mxu0 %v1929_v39 }
 0x296   : > { %4811 = vmatprep.subr.msk.bf16.mxu0 %vm1380_vm0, %v6149_v51  ;;  %v7318_v51 = vld [vmem:[#allocation26_spill] sm:$0xff] }
 0x297   : > { %v1094_v12 = vadd.f32 %v7318_v51, %v5959_v23 }
 0x29c   : > { %4620 = vmatmul.mubr.msk.bf16.vlgmr.msra.gmra.mxu0 %vm1380_vm0, %v1867_v18  ;;  %v6289_v18 = vpack.c.bf16 %v1094_v12, %v1090_v17 }
 0x29d   : > { %4623 = vmatprep.mubr.msk.bf16.mxu0 %vm1380_vm0, %v1869_v46  ;;  %4668 = vmatpush3.bf16.xpose.msra.mxu0 %v2489_v56  ;;  %v6342_v46 = vpop.f32.mrf.mxu0 }
 0x29e   : > { %4812 = vmatprep.subr.msk.bf16.mxu0 %vm1380_vm0, %v6137_v24  ;;  %v1060_v24 = vadd.f32 %v7314_v62, %v5959_v23 }
 0x2a0   : > { %v6268_v40 = vpack.c.bf16 %v1064_v1, %v1060_v24 }
 0x2a2   : > { %7316 = vst [vmem:[#allocation20_spill] sm:$0xff] %v6268_v40 }
 0x2a4   : > { %4624 = vmatmul.mubr.msk.bf16.gmra.mxu0 %vm1380_vm0, %v1871_v49 }
 0x2a5   : > { %4627 = vmatprep.mubr.msk.bf16.mxu0 %vm1380_vm0, %v1873_v34  ;;  %4670 = vmatpush3.bf16.xpose.msra.mxu0 %v2486_v6  ;;  %v6346_v34 = vpop.permute.xlu1 %2203  ;;  %v6348_v6 = vpop.permute.xlu0 %2205 }
 0x2a6   : > { %4813 = vmatprep.subr.msk.bf16.mxu0 %vm1380_vm0, %v6042_v30 }
 0x2a9   : > { %v6359_v57 = vpop.permute.xlu1 %2201 }
 0x2ac   : > { %4628 = vmatmul.mubr.msk.bf16.gmra.mxu0 %vm1380_vm0, %v1875_v43  ;;  %v7322_v43 = vld [vmem:[#allocation28_spill] sm:$0xff] }
 0x2ad   : > { %4631 = vmatprep.mubr.msk.bf16.mxu0 %vm1380_vm0, %v1877_v37  ;;  %4672 = vmatpush3.bf16.xpose.msra.mxu0 %v2483_v59 }
 0x2ae   : > { %4814 = vmatprep.subr.msk.bf16.mxu0 %vm1380_vm0, %v6037_v63 }
 0x2b4   : > { %4632 = vmatmul.mubr.msk.bf16.gmra.mxu0 %vm1380_vm0, %v1879_v14 }
 0x2b5   : > { %4674 = vmatpush3.bf16.xpose.msra.mxu0 %v2480_v52  ;;  %4683 = vmatprep.mubr.msk.bf16.mxu0 %vm1380_vm0, %v6221_v19  ;;  %v6361_v52 = vpop.permute.xlu0 %2199 }
 0x2b6   : > { %4815 = vmatprep.subr.msk.bf16.mxu0 %vm1380_vm0, %v6032_v42 }
 0x2b9   : > { %v6373_v3 = vpop.permute.xlu0 %2195 }
 0x2bd   : > { %4676 = vmatpush3.bf16.xpose.msra.mxu0 %v2477_v58  ;;  %v6385_v8 = vpop.permute.xlu0 %2963 }
 0x2be   : > { %4816 = vmatprep.subr.msk.bf16.mxu0 %vm1380_vm0, %v6025_v7  ;;  %7323 = vst [vmem:[#allocation18_spill] sm:$0xff] %v6385_v8 }
 0x2c5   : > { %4678 = vmatpush3.bf16.xpose.msra.mxu0 %v2474_v54 }
 0x2c6   : > { %4817 = vmatprep.subr.msk.bf16.mxu0 %vm1380_vm0, %v6011_v11 }
 0x2cd   : > { %4680 = vmatpush3.bf16.xpose.msra.mxu0 %v2471_v50 }
 0x2ce   : > { %4818 = vmatprep.subr.msk.bf16.mxu0 %vm1380_vm0, %v5997_v28 }
 0x2d5   : > { %4682 = vmatpush3.bf16.xpose.msra.mxu0 %v2468_v31  ;;  %v6371_v31 = vpop.permute.xlu1 %2197 }
 0x2d9   : > { %v6383_v1 = vpop.permute.xlu1 %2193 }
 0x2dc   : > { %4684 = vmatmul.mubr.msk.bf16.vlgmr.msra.gmra.mxu0 %vm1380_vm0, %v6252_v21 }
 0x2dd   : > { %4687 = vmatprep.mubr.msk.bf16.mxu0 %vm1380_vm0, %v6254_v53  ;;  %v6395_v41 = vpop.permute.xlu1 %2961 }
 0x2de   : > { %7324 = vst [vmem:[#allocation23_spill] sm:$0xff] %v6395_v41 }
 0x2e4   : > { %4688 = vmatmul.mubr.msk.bf16.gmra.mxu0 %vm1380_vm0, %v6268_v40 }
 0x2e5   : > { %4691 = vmatprep.mubr.msk.bf16.mxu0 %vm1380_vm0, %v6270_v0 }
 0x2e9   : > { %v6284_v32 = vpop.f32.mrf.mxu1 }
 0x2ea   : > { %1530 = vmax.xlane.f32.xlu0 %v6284_v32 }
 0x2eb   : > { %v6291_v55 = vpop.f32.mrf.mxu1 }
 0x2ec   : > { %4692 = vmatmul.mubr.msk.bf16.gmra.mxu0 %vm1380_vm0, %v6286_v13 }
 0x2ed   : > { %v6295_v10 = vpop.f32.mrf.mxu1  ;;  %4695 = vmatprep.mubr.msk.bf16.mxu0 %vm1380_vm0, %v6289_v18 }
 0x2ee   : > { %1526 = vmax.xlane.f32.xlu0 %v6291_v55 }
 0x2ef   : > { %v6300_v23 = vpop.f32.mrf.mxu1 }
 0x2f0   : > { %1528 = vmax.xlane.f32.xlu1 %v6300_v23 }
 0x2f1   : > { %v6303_v49 = vpop.f32.mrf.mxu1 }
 0x2f2   : > { %1532 = vmax.xlane.f32.xlu0 %v6295_v10 }
 0x2f3   : > { %v6306_v61 = vpop.f32.mrf.mxu1 }
 0x2f4   : > { %4696 = vmatmul.mubr.msk.bf16.gmra.mxu0 %vm1380_vm0, %v7322_v43  ;;  %1538 = vmax.xlane.f32.xlu1 %v6303_v49 }
 0x2f5   : > { %v6311_v25 = vpop.f32.mrf.mxu1 }
 0x2f6   : > { %1540 = vmax.xlane.f32.xlu0 %v6311_v25 }
 0x2f7   : > { %v6314_v38 = vpop.f32.mrf.mxu1 }
 0x2f8   : > { %1534 = vmax.xlane.f32.xlu1 %v6306_v61 }
 0x2f9   : > { %v6317_v14 = vpop.f32.mrf.mxu1 }
 0x2fa   : > { %1536 = vmax.xlane.f32.xlu0 %v6314_v38 }
 0x2fb   : > { %v6320_v22 = vpop.f32.mrf.mxu1 }
 0x2fc   : > { %1546 = vmax.xlane.f32.xlu1 %v6317_v14 }
 0x2fd   : > { %v6323_v27 = vpop.f32.mrf.mxu1 }
 0x2fe   : > { %1548 = vmax.xlane.f32.xlu0 %v6323_v27 }
 0x2ff   : > { %v6326_v47 = vpop.f32.mrf.mxu1 }
 0x300   : > { %1542 = vmax.xlane.f32.xlu1 %v6320_v22 }
 0x301   : > { %v6329_v36 = vpop.f32.mrf.mxu1 }
 0x302   : > { %1544 = vmax.xlane.f32.xlu0 %v6326_v47 }
 0x303   : > { %v6332_v60 = vpop.f32.mrf.mxu1 }
 0x304   : > { %1554 = vmax.xlane.f32.xlu1 %v6329_v36 }
 0x305   : > { %v6335_v26 = vpop.f32.mrf.mxu1 }
 0x306   : > { %1556 = vmax.xlane.f32.xlu0 %v6335_v26 }
 0x307   : > { %v6339_v39 = vpop.f32.mrf.mxu1 }
 0x308   : > { %1550 = vmax.xlane.f32.xlu1 %v6332_v60 }
 0x30a   : > { %1552 = vmax.xlane.f32.xlu0 %v6339_v39 }
 0x35c   : > { %v6344_v56 = vpop.f32.mrf.mxu0 }
 0x35d   : > { %2053 = vmax.xlane.f32.xlu0 %v6344_v56 }
 0x35e   : > { %v6351_v37 = vpop.f32.mrf.mxu0 }
 0x35f   : > { %2049 = vmax.xlane.f32.xlu1 %v6351_v37 }
 0x360   : > { %v6354_v59 = vpop.f32.mrf.mxu0 }
 0x361   : > { %2055 = vmax.xlane.f32.xlu0 %v6354_v59 }
 0x362   : > { %v6357_v35 = vpop.f32.mrf.mxu0 }
 0x364   : > { %v6363_v58 = vpop.f32.mrf.mxu0 }
 0x365   : > { %2051 = vmax.xlane.f32.xlu0 %v6357_v35 }
 0x366   : > { %v6366_v54 = vpop.f32.mrf.mxu0 }
 0x367   : > { %2057 = vmax.xlane.f32.xlu1 %v6366_v54 }
 0x368   : > { %v6369_v50 = vpop.f32.mrf.mxu0 }
 0x369   : > { %2061 = vmax.xlane.f32.xlu0 %v6363_v58 }
 0x36a   : > { %v6376_v15 = vpop.f32.mrf.mxu0 }
 0x36c   : > { %v6378_v33 = vpop.f32.mrf.mxu0 }
 0x36d   : > { %2063 = vmax.xlane.f32.xlu0 %v6369_v50 }
 0x36e   : > { %v6381_v4 = vpop.f32.mrf.mxu0 }
 0x370   : > { %v6387_v29 = vpop.f32.mrf.mxu0 }
 0x371   : > { %2071 = vmax.xlane.f32.xlu1 %v6387_v29  ;;  %2059 = vmax.xlane.f32.xlu0 %v6376_v15 }
 0x372   : > { %v6391_v62 = vpop.f32.mrf.mxu0 }
 0x373   : > { %v1531_v24 = vpop.xlane.xlu0 %1530 }
 0x374   : > { %v6393_v5 = vpop.f32.mrf.mxu0  ;;  %v1560_v48 = vsub.f32 %v6284_v32, %v1531_v24 }
 0x375   : > { %2067 = vmax.xlane.f32.xlu1 %v6391_v62  ;;  %2069 = vmax.xlane.f32.xlu0 %v6378_v33 }
 0x376   : > { %v6399_v16 = vpop.f32.mrf.mxu0  ;;  %v1578_v41 = vmul.f32 1.442695, %v1560_v48 }
 0x377   : > { %v1527_v51 = vpop.xlane.xlu0 %1526 }
 0x378   : > { %v1558_v12 = vsub.f32 %v6291_v55, %v1527_v51  ;;  %v6403_v45 = vpop.f32.mrf.mxu0 }
 0x379   : > { %v1529_v2 = vpop.xlane.xlu1 %1528  ;;  %2079 = vmax.xlane.f32.xlu1 %v6403_v45  ;;  %2065 = vmax.xlane.f32.xlu0 %v6381_v4 }
 0x37a   : > { %v1574_v9 = vmul.f32 1.442695, %v1558_v12  ;;  %v1559_v17 = vsub.f32 %v6300_v23, %v1529_v2  ;;  %v6408_v8 = vpop.f32.mrf.mxu0 }
 0x37b   : > { %v1533_v43 = vpop.xlane.xlu0 %1532 }
 0x37c   : > { %v1576_v13 = vmul.f32 1.442695, %v1559_v17  ;;  %v1561_v32 = vsub.f32 %v6295_v10, %v1533_v43  ;;  %5150 = vpow2.f32 %v1574_v9 }
 0x37d   : > { %v1539_v24 = vpop.xlane.xlu1 %1538  ;;  %2075 = vmax.xlane.f32.xlu1 %v6408_v8  ;;  %2077 = vmax.xlane.f32.xlu0 %v6393_v5 }
 0x37e   : > { %5152 = vpow2.f32 %v1576_v13  ;;  %v1580_v55 = vmul.f32 1.442695, %v1561_v32  ;;  %v1564_v12 = vsub.f32 %v6303_v49, %v1539_v24 }
 0x37f   : > { %5154 = vpow2.f32 %v1578_v41  ;;  %v1541_v51 = vpop.xlane.xlu0 %1540 }
 0x380   : > { %5156 = vpow2.f32 %v1580_v55  ;;  %v1565_v23 = vsub.f32 %v6311_v25, %v1541_v51  ;;  %v1586_v13 = vmul.f32 1.442695, %v1564_v12 }
 0x381   : > { %v1535_v48 = vpop.xlane.xlu1 %1534  ;;  %2073 = vmax.xlane.f32.xlu0 %v6399_v16 }
 0x382   : > { %v1588_v2 = vmul.f32 1.442695, %v1565_v23  ;;  %v1562_v10 = vsub.f32 %v6306_v61, %v1535_v48 }
 0x383   : > { %v1537_v43 = vpop.xlane.xlu0 %1536 }
 0x384   : > { %v1582_v9 = vmul.f32 1.442695, %v1562_v10  ;;  %v1563_v17 = vsub.f32 %v6314_v38, %v1537_v43  ;;  %5158 = vpow2.f32 %v1588_v2 }
 0x385   : > { %v1547_v40 = vpop.xlane.xlu1 %1546 }
 0x386   : > { %v1584_v41 = vmul.f32 1.442695, %v1563_v17  ;;  %5160 = vpow2.f32 %v1582_v9  ;;  %v1568_v49 = vsub.f32 %v6317_v14, %v1547_v40 }
 0x387   : > { %v1549_v32 = vpop.xlane.xlu0 %1548 }
 0x388   : > { %5162 = vpow2.f32 %v1584_v41  ;;  %v1569_v25 = vsub.f32 %v6323_v27, %v1549_v32  ;;  %v1594_v9 = vmul.f32 1.442695, %v1568_v49 }
 0x389   : > { %v1543_v55 = vpop.xlane.xlu1 %1542  ;;  %v6419_v51 = vpop.eup %5150  ;;  %5164 = vpow2.f32 %v1586_v13 }
 0x38a   : > { %v1596_v61 = vmul.f32 1.442695, %v1569_v25  ;;  %v1566_v24 = vsub.f32 %v6320_v22, %v1543_v55 }
 0x38b   : > { %v6423_v23 = vpop.eup %5152  ;;  %v1545_v38 = vpop.xlane.xlu0 %1544 }
 0x38c   : > { %v6425_v48 = vpop.eup %5154  ;;  %v1590_v12 = vmul.f32 1.442695, %v1566_v24  ;;  %v1567_v2 = vsub.f32 %v6326_v47, %v1545_v38  ;;  %v1654_v27 = vpack.c.bf16 %v6423_v23, %v6419_v51  ;;  %5166 = vpow2.f32 %v1596_v61 }
 0x38d   : > { %v6430_v10 = vpop.eup %5156  ;;  %v1555_v43 = vpop.xlane.xlu1 %1554 }
 0x38e   : > { %v1592_v40 = vmul.f32 1.442695, %v1567_v2  ;;  %4587 = vmatprep.mubr.bf16.mxu1 %v1654_v27  ;;  %2957 = vrot.lane.b32.xlu1 %v6037_v63, %s5594_s24  ;;  %v1655_v14 = vpack.c.bf16 %v6430_v10, %v6425_v48  ;;  %5168 = vpow2.f32 %v1590_v12  ;;  %v1572_v13 = vsub.f32 %v6329_v36, %v1555_v43 }
 0x38f   : > { %v1557_v22 = vpop.xlane.xlu0 %1556 }
 0x390   : > { %5170 = vpow2.f32 %v1592_v40  ;;  %v1573_v47 = vsub.f32 %v6335_v26, %v1557_v22  ;;  %4588 = vmatmul.mubr.bf16.vlgmr.msra.gmra.mxu1 %v1655_v14 }
 0x391   : > { %4636 = vmatpush3.bf16.msra.mxu1 %v6182_v20  ;;  %v1551_v17 = vpop.xlane.xlu1 %1550  ;;  %5172 = vpow2.f32 %v1594_v9  ;;  %v6441_v32 = vpop.eup %5158  ;;  %v1602_v20 = vmul.f32 1.442695, %v1572_v13 }
 0x392   : > { %v1604_v41 = vmul.f32 1.442695, %v1573_v47  ;;  %4637 = vmatprep.subr.bf16.mxu1 %v6348_v6  ;;  %v1570_v63 = vsub.f32 %v6332_v60, %v1551_v17 }
 0x393   : > { %v1553_v25 = vpop.xlane.xlu0 %1552  ;;  %v6443_v55 = vpop.eup %5160 }
 0x394   : > { %v1598_v49 = vmul.f32 1.442695, %v1570_v63  ;;  %v1571_v26 = vsub.f32 %v6339_v39, %v1553_v25  ;;  %5174 = vpow2.f32 %v1604_v41  ;;  %v7329_v41 = vld [vmem:[#allocation19_spill] sm:$0xff] }
 0x395   : > { %v6446_v61 = vpop.eup %5162  ;;  %4638 = vmatpush3.bf16.msra.mxu1 %v6348_v6  ;;  %v1326_v63 = vadd.f32 %v6071_v44, %v7329_v41  ;;  %v1330_v25 = vadd.f32 %v6342_v46, %v7329_v41 }
 0x396   : > { %v1600_v36 = vmul.f32 1.442695, %v1571_v26  ;;  %4639 = vmatprep.subr.bf16.mxu1 %v6346_v34  ;;  %v1656_v60 = vpack.c.bf16 %v6446_v61, %v6443_v55  ;;  %v6452_v24 = vpop.eup %5164  ;;  %5176 = vpow2.f32 %v1598_v49 }
 0x397   : > { %v1657_v39 = vpack.c.bf16 %v6441_v32, %v6452_v24  ;;  %v6509_v26 = vpack.c.bf16 %v1330_v25, %v1326_v63 }
 0x398   : > { %5178 = vpow2.f32 %v1600_v36  ;;  %4591 = vmatprep.mubr.bf16.mxu1 %v1656_v60 }
 0x399   : > { %4640 = vmatpush3.bf16.msra.mxu1 %v6346_v34  ;;  %5180 = vpow2.f32 %v1602_v20  ;;  %v6458_v6 = vpop.eup %5166 }
 0x39a   : > { %4592 = vmatmul.mubr.bf16.gmra.mxu1 %v1657_v39  ;;  %4641 = vmatprep.subr.bf16.mxu1 %v6359_v57 }
 0x39b   : > { %v6460_v38 = vpop.eup %5168 }
 0x39c   : > { %v6462_v12 = vpop.f32.mrf.mxu0 }
 0x39d   : > { %v6464_v2 = vpop.eup %5170  ;;  %4642 = vmatpush3.bf16.msra.mxu1 %v6359_v57  ;;  %2592 = vmax.xlane.f32.xlu0 %v6462_v12 }
 0x39e   : > { %4643 = vmatprep.subr.bf16.mxu1 %v6361_v52  ;;  %v6469_v27 = vpop.f32.mrf.mxu0  ;;  %v1658_v34 = vpack.c.bf16 %v6464_v2, %v6460_v38  ;;  %v6473_v43 = vpop.eup %5172 }
 0x39f   : > { %7325 = vst [vmem:[#allocation26_spill] sm:$0xff] %v6473_v43  ;;  %v1659_v40 = vpack.c.bf16 %v6458_v6, %v6473_v43 }
 0x3a0   : > { %4595 = vmatprep.mubr.bf16.mxu1 %v1658_v34  ;;  %v6475_v9 = vpop.f32.mrf.mxu0 }
 0x3a1   : > { %4644 = vmatpush3.bf16.msra.mxu1 %v6361_v52  ;;  %2588 = vmax.xlane.f32.xlu0 %v6469_v27  ;;  %v6484_v14 = vpop.eup %5174 }
 0x3a2   : > { %4596 = vmatmul.mubr.bf16.gmra.mxu1 %v1659_v40  ;;  %4645 = vmatprep.subr.bf16.mxu1 %v6371_v31  ;;  %v6482_v57 = vpop.f32.mrf.mxu0  ;;  %7326 = vst [vmem:[#allocation21_spill] sm:$0xff] %v6484_v14 }
 0x3a3   : > { %v6486_v22 = vpop.eup %5176 }
 0x3a4   : > { %7327 = vst [vmem:[#allocation24_spill] sm:$0xff] %v6486_v22  ;;  %v6491_v17 = vpop.f32.mrf.mxu0 }
 0x3a5   : > { %v6488_v47 = vpop.eup %5178  ;;  %4646 = vmatpush3.bf16.msra.mxu1 %v6371_v31  ;;  %2594 = vmax.xlane.f32.xlu0 %v6475_v9 }
 0x3a6   : > { %4647 = vmatprep.subr.bf16.mxu1 %v6373_v3  ;;  %v1660_v52 = vpack.c.bf16 %v6488_v47, %v6486_v22  ;;  %v6497_v13 = vpop.eup %5180  ;;  %v6505_v49 = vpop.f32.mrf.mxu0 }
 0x3a7   : > { %7328 = vst [vmem:[#allocation33_spill] sm:$0xff] %v6497_v13  ;;  %v1661_v31 = vpack.c.bf16 %v6484_v14, %v6497_v13 }
 0x3a8   : > { %4599 = vmatprep.mubr.bf16.mxu1 %v1660_v52  ;;  %v6511_v20 = vpop.f32.mrf.mxu0 }
 0x3a9   : > { %4648 = vmatpush3.bf16.msra.mxu1 %v6373_v3 }
 0x3aa   : > { %4600 = vmatmul.mubr.bf16.gmra.mxu1 %v1661_v31  ;;  %4649 = vmatprep.subr.bf16.mxu1 %v6383_v1  ;;  %v6515_v44 = vpop.f32.mrf.mxu0 }
 0x3ac   : > { %v6518_v46 = vpop.f32.mrf.mxu0 }
 0x3ad   : > { %4650 = vmatpush3.bf16.msra.mxu1 %v6383_v1 }
 0x3ae   : > { %4699 = vmatprep.subr.bf16.mxu1 %v6509_v26  ;;  %v6521_v3 = vpop.f32.mrf.mxu0 }
 0x3b0   : > { %v6526_v36 = vpop.f32.mrf.mxu0 }
 0x3b2   : > { %2590 = vmax.xlane.f32.xlu1 %v6482_v57  ;;  %v6529_v1 = vpop.f32.mrf.mxu0 }
 0x3b4   : > { %v6532_v60 = vpop.f32.mrf.mxu0 }
 0x3b6   : > { %2600 = vmax.xlane.f32.xlu1 %v6491_v17  ;;  %v6543_v34 = vpop.f32.mrf.mxu0 }
 0x3ba   : > { %2602 = vmax.xlane.f32.xlu1 %v6511_v20 }
 0x3bb   : > { %2959 = vrot.lane.b32.xlu0 %v6042_v30, %s5594_s24 }
 0x3be   : > { %2598 = vmax.xlane.f32.xlu1 %v6515_v44 }
 0x3c2   : > { %2606 = vmax.xlane.f32.xlu1 %v6529_v1 }
 0x3c6   : > { %2616 = vmax.xlane.f32.xlu1 %v6532_v60 }
 0x3d7   : > { %2953 = vrot.lane.b32.xlu1 %v6025_v7, %s5594_s24 }
 0x3da   : > { %2596 = vmax.xlane.f32.xlu0 %v6505_v49 }
 0x3db   : > { %2951 = vrot.lane.b32.xlu1 %v6011_v11, %s5594_s24 }
 0x3de   : > { %2608 = vmax.xlane.f32.xlu0 %v6518_v46 }
 0x3e2   : > { %2604 = vmax.xlane.f32.xlu0 %v6521_v3 }
 0x3e6   : > { %2610 = vmax.xlane.f32.xlu0 %v6526_v36  ;;  %v2054_v30 = vpop.xlane.xlu0 %2053 }
 0x3e7   : > { %v2083_v41 = vsub.f32 %v6344_v56, %v2054_v30 }
 0x3e8   : > { %v2050_v39 = vpop.xlane.xlu1 %2049 }
 0x3e9   : > { %v2081_v40 = vsub.f32 %v6351_v37, %v2050_v39  ;;  %v2101_v14 = vmul.f32 1.442695, %v2083_v41  ;;  %v6554_v41 = vpop.f32.mrf.mxu0 }
 0x3ea   : > { %2612 = vmax.xlane.f32.xlu0 %v6543_v34  ;;  %v2056_v7 = vpop.xlane.xlu0 %2055 }
 0x3eb   : > { %v2084_v52 = vsub.f32 %v6354_v59, %v2056_v7  ;;  %v2097_v11 = vmul.f32 1.442695, %v2081_v40 }
 0x3ed   : > { %v2103_v63 = vmul.f32 1.442695, %v2084_v52  ;;  %5182 = vpow2.f32 %v2097_v11 }
 0x3ee   : > { %v2052_v25 = vpop.xlane.xlu0 %2051 }
 0x3ef   : > { %v2082_v31 = vsub.f32 %v6357_v35, %v2052_v25  ;;  %5184 = vpow2.f32 %v2103_v63  ;;  %v6569_v25 = vpop.f32.mrf.mxu0 }
 0x3f0   : > { %v2058_v43 = vpop.xlane.xlu1 %2057 }
 0x3f1   : > { %v2099_v13 = vmul.f32 1.442695, %v2082_v31  ;;  %v2085_v37 = vsub.f32 %v6366_v54, %v2058_v43 }
 0x3f2   : > { %v2062_v22 = vpop.xlane.xlu0 %2061 }
 0x3f3   : > { %5186 = vpow2.f32 %v2099_v13  ;;  %v2087_v56 = vsub.f32 %v6363_v58, %v2062_v22  ;;  %v2105_v30 = vmul.f32 1.442695, %v2085_v37 }
 0x3f4   : > { %5188 = vpow2.f32 %v2101_v14 }
 0x3f5   : > { %v2109_v11 = vmul.f32 1.442695, %v2087_v56  ;;  %5190 = vpow2.f32 %v2105_v30 }
 0x3f6   : > { %v2064_v39 = vpop.xlane.xlu0 %2063 }
 0x3f7   : > { %v2088_v59 = vsub.f32 %v6369_v50, %v2064_v39 }
 0x3f9   : > { %v2111_v52 = vmul.f32 1.442695, %v2088_v59 }
 0x3fa   : > { %v2072_v40 = vpop.xlane.xlu1 %2071  ;;  %v2060_v7 = vpop.xlane.xlu0 %2059 }
 0x3fb   : > { %v2086_v35 = vsub.f32 %v6376_v15, %v2060_v7  ;;  %v6556_v13 = vpop.eup %5182  ;;  %5192 = vpow2.f32 %v2111_v52  ;;  %v2092_v31 = vsub.f32 %v6387_v29, %v2072_v40  ;;  %v7330_v40 = vld [vmem:[#allocation32_spill] sm:$0xff] }
 0x3fc   : > { %v6558_v43 = vpop.eup %5184 }
 0x3fd   : > { %v2107_v63 = vmul.f32 1.442695, %v2086_v35 }
 0x3fe   : > { %v2068_v14 = vpop.xlane.xlu1 %2067  ;;  %v2070_v54 = vpop.xlane.xlu0 %2069 }
 0x3ff   : > { %v2090_v58 = vsub.f32 %v6391_v62, %v2068_v14  ;;  %v2091_v50 = vsub.f32 %v6378_v33, %v2070_v54  ;;  %2618 = vmax.xlane.f32.xlu1 %v6554_v41  ;;  %5194 = vpow2.f32 %v2107_v63  ;;  %v7331_v14 = vld [vmem:[#allocation31_spill] sm:$0xff] }
 0x400   : > { %v6563_v22 = vpop.eup %5186  ;;  %2955 = vrot.lane.b32.xlu0 %v6032_v42, %s5594_s24  ;;  %5196 = vpow2.f32 %v2109_v11  ;;  %v2119_v42 = vmul.f32 1.442695, %v2092_v31 }
 0x401   : > { %v6567_v15 = vpop.eup %5188  ;;  %v2177_v62 = vpack.c.bf16 %v6563_v22, %v6556_v13  ;;  %v2115_v37 = vmul.f32 1.442695, %v2090_v58  ;;  %v2117_v56 = vmul.f32 1.442695, %v2091_v50 }
 0x402   : > { %v2080_v33 = vpop.xlane.xlu1 %2079  ;;  %v2066_v39 = vpop.xlane.xlu0 %2065  ;;  %v2178_v59 = vpack.c.bf16 %v6558_v43, %v6567_v15 }
 0x403   : > { %v2089_v30 = vsub.f32 %v6381_v4, %v2066_v39  ;;  %2614 = vmax.xlane.f32.xlu1 %v6569_v25  ;;  %4651 = vmatprep.mubr.bf16.mxu1 %v2177_v62  ;;  %5198 = vpow2.f32 %v2115_v37  ;;  %v6589_v58 = vpop.eup %5190  ;;  %v7332_v62 = vld [vmem:[#allocation30_spill] sm:$0xff] }
 0x404   : > { %2929 = vrot.lane.b32.xlu0 %v6254_v53, %s5594_s24  ;;  %4652 = vmatmul.mubr.bf16.vlgmr.msra.gmra.mxu1 %v2178_v59  ;;  %5200 = vpow2.f32 %v2117_v56  ;;  %v2096_v53 = vsub.f32 %v6403_v45, %v2080_v33  ;;  %v7333_v33 = vld [vmem:[#allocation29_spill] sm:$0xff]  ;;  %v7334_v59 = vld [vmem:[#allocation27_spill] sm:$0xff] }
 0x405   : > { %v2113_v29 = vmul.f32 1.442695, %v2089_v30  ;;  %4700 = vmatpush3.bf16.msra.mxu1 %v6509_v26 }
 0x406   : > { %4701 = vmatprep.subr.bf16.mxu1 %v7330_v40  ;;  %v2076_v7 = vpop.xlane.xlu1 %2075  ;;  %v2078_v52 = vpop.xlane.xlu0 %2077 }
 0x407   : > { %v2094_v35 = vsub.f32 %v6408_v8, %v2076_v7  ;;  %v2095_v4 = vsub.f32 %v6393_v5, %v2078_v52  ;;  %5202 = vpow2.f32 %v2113_v29  ;;  %v2127_v5 = vmul.f32 1.442695, %v2096_v53  ;;  %v7335_v7 = vld [vmem:[#allocation25_spill] sm:$0xff] }
 0x408   : > { %2933 = vrot.lane.b32.xlu0 %v6270_v0, %s5594_s24  ;;  %5204 = vpow2.f32 %v2119_v42  ;;  %v6592_v50 = vpop.eup %5192 }
 0x409   : > { %v2123_v11 = vmul.f32 1.442695, %v2094_v35  ;;  %4702 = vmatpush3.bf16.msra.mxu1 %v7330_v40  ;;  %v2125_v63 = vmul.f32 1.442695, %v2095_v4 }
 0x40a   : > { %4703 = vmatprep.subr.bf16.mxu1 %v7331_v14  ;;  %v2074_v54 = vpop.xlane.xlu0 %2073 }
 0x40b   : > { %v2093_v8 = vsub.f32 %v6399_v16, %v2074_v54  ;;  %5206 = vpow2.f32 %v2123_v11  ;;  %v7337_v11 = vld [vmem:[#allocation20_spill] sm:$0xff] }
 0x40c   : > { %2937 = vrot.lane.b32.xlu0 %v6289_v18, %s5594_s24  ;;  %v6596_v0 = vpop.eup %5194  ;;  %5208 = vpow2.f32 %v2125_v63  ;;  %v7339_v63 = vld [vmem:[#allocation17_spill] sm:$0xff] }
 0x40d   : > { %v2121_v45 = vmul.f32 1.442695, %v2093_v8  ;;  %4704 = vmatpush3.bf16.msra.mxu1 %v7331_v14  ;;  %v6599_v31 = vpop.eup %5196  ;;  %v2179_v16 = vpack.c.bf16 %v6596_v0, %v6589_v58  ;;  %v7340_v8 = vld [vmem:[#allocation28_spill] sm:$0xff] }
 0x40e   : > { %4705 = vmatprep.subr.bf16.mxu1 %v7332_v62  ;;  %v2180_v37 = vpack.c.bf16 %v6592_v50, %v6599_v31 }
 0x40f   : > { %5210 = vpow2.f32 %v2121_v45  ;;  %4655 = vmatprep.mubr.bf16.mxu1 %v2179_v16 }
 0x410   : > { %3266 = vrot.lane.b32.xlu0 %v7330_v40, %s5594_s24  ;;  %5212 = vpow2.f32 %v2127_v5  ;;  %4656 = vmatmul.mubr.bf16.gmra.mxu1 %v2180_v37  ;;  %v6609_v18 = vpop.eup %5198  ;;  %v6665_v37 = vpop.permute.xlu1 %2957 }
 0x411   : > { %4706 = vmatpush3.bf16.msra.mxu1 %v7332_v62  ;;  %v6612_v39 = vpop.eup %5200 }
 0x412   : > { %4707 = vmatprep.subr.bf16.mxu1 %v7333_v33 }
 0x414   : > { %2949 = vrot.lane.b32.xlu1 %v5997_v28, %s5594_s24  ;;  %3258 = vrot.lane.b32.xlu0 %v7334_v59, %s5594_s24  ;;  %v6618_v56 = vpop.eup %5202 }
 0x415   : > { %v6620_v30 = vpop.eup %5204  ;;  %4708 = vmatpush3.bf16.msra.mxu1 %v7333_v33  ;;  %v2181_v42 = vpack.c.bf16 %v6609_v18, %v6618_v56 }
 0x416   : > { %4709 = vmatprep.subr.bf16.mxu1 %v7334_v59  ;;  %v2182_v29 = vpack.c.bf16 %v6620_v30, %v6612_v39 }
 0x417   : > { %4659 = vmatprep.mubr.bf16.mxu1 %v2181_v42 }
 0x418   : > { %2925 = vrot.lane.b32.xlu1 %v6221_v19, %s5594_s24  ;;  %4660 = vmatmul.mubr.bf16.gmra.mxu1 %v2182_v29  ;;  %v6630_v28 = vpop.eup %5206  ;;  %v7336_v19 = vld [vmem:[#allocation22_spill] sm:$0xff] }
 0x419   : > { %4710 = vmatpush3.bf16.msra.mxu1 %v7334_v59  ;;  %v6633_v40 = vpop.eup %5208 }
 0x41a   : > { %4711 = vmatprep.subr.bf16.mxu1 %v7335_v7 }
 0x41c   : > { %v6636_v52 = vpop.eup %5210  ;;  %2927 = vrot.lane.b32.xlu1 %v6252_v21, %s5594_s24  ;;  %v7338_v21 = vld [vmem:[#allocation18_spill] sm:$0xff] }
 0x41d   : > { %v2183_v35 = vpack.c.bf16 %v6630_v28, %v6636_v52  ;;  %v6642_v4 = vpop.eup %5212  ;;  %4712 = vmatpush3.bf16.msra.mxu1 %v7335_v7 }
 0x41e   : > { %4713 = vmatprep.subr.bf16.mxu1 %v7336_v19  ;;  %v2184_v53 = vpack.c.bf16 %v6642_v4, %v6633_v40 }
 0x41f   : > { %4663 = vmatprep.mubr.bf16.mxu1 %v2183_v35 }
 0x420   : > { %2931 = vrot.lane.b32.xlu1 %v7337_v11, %s5594_s24  ;;  %4664 = vmatmul.mubr.bf16.gmra.mxu1 %v2184_v53 }
 0x421   : > { %4714 = vmatpush3.bf16.msra.mxu1 %v7336_v19 }
 0x422   : > { %4819 = vmatprep.subr.msk.bf16.mxu1 %vm1380_vm0, %v7338_v21 }
 0x424   : > { %2935 = vrot.lane.b32.xlu1 %v7339_v63, %s5594_s24 }
 0x426   : > { %v2593_v54 = vpop.xlane.xlu0 %2592 }
 0x428   : > { %2939 = vrot.lane.b32.xlu1 %v7340_v8, %s5594_s24  ;;  %v3002_v8 = vsel %vm1380_vm0, %v6665_v37, 0 }
 0x42a   : > { %v2589_v5 = vpop.xlane.xlu0 %2588 }
 0x42b   : > { %v2620_v16 = vsub.f32 %v6469_v27, %v2589_v5 }
 0x42c   : > { %3268 = vrot.lane.b32.xlu1 %v6509_v26, %s5594_s24  ;;  %v2622_v26 = vsub.f32 %v6462_v12, %v2593_v54 }
 0x42e   : > { %v2595_v45 = vpop.xlane.xlu0 %2594  ;;  %v2640_v27 = vmul.f32 1.442695, %v2622_v26 }
 0x42f   : > { %v2623_v59 = vsub.f32 %v6475_v9, %v2595_v45 }
 0x430   : > { %3264 = vrot.lane.b32.xlu1 %v7331_v14, %s5594_s24  ;;  %v2636_v14 = vmul.f32 1.442695, %v2620_v16 }
 0x431   : > { %v2642_v42 = vmul.f32 1.442695, %v2623_v59 }
 0x432   : > { %5214 = vpow2.f32 %v2636_v14  ;;  %v2960_v11 = vpop.permute.xlu0 %2959 }
 0x433   : > { %1608 = vadd.xlane.f32.xlu0 %v6423_v23  ;;  %5216 = vpow2.f32 %v2642_v42 }
 0x434   : > { %3262 = vrot.lane.b32.xlu1 %v7332_v62, %s5594_s24 }
 0x437   : > { %1612 = vadd.xlane.f32.xlu0 %v6430_v10 }
 0x438   : > { %3260 = vrot.lane.b32.xlu1 %v7333_v33, %s5594_s24 }
 0x43b   : > { %v2591_v23 = vpop.xlane.xlu1 %2590  ;;  %1616 = vadd.xlane.f32.xlu0 %v6446_v61 }
 0x43c   : > { %v2621_v62 = vsub.f32 %v6482_v57, %v2591_v23  ;;  %3256 = vrot.lane.b32.xlu1 %v7335_v7, %s5594_s24 }
 0x43e   : > { %v2638_v9 = vmul.f32 1.442695, %v2621_v62 }
 0x43f   : > { %1620 = vadd.xlane.f32.xlu0 %v6441_v32  ;;  %v2601_v10 = vpop.xlane.xlu1 %2600  ;;  %v6681_v61 = vpop.eup %5214 }
 0x440   : > { %5218 = vpow2.f32 %v2638_v9  ;;  %3254 = vrot.lane.b32.xlu1 %v7336_v19, %s5594_s24  ;;  %v5217_v12 = vpop.eup %5216 }
 0x441   : > { %5220 = vpow2.f32 %v2640_v27 }
 0x443   : > { %2135 = vadd.xlane.f32.xlu0 %v6558_v43  ;;  %v2603_v7 = vpop.xlane.xlu1 %2602  ;;  %v3011_v43 = vsel %vm1380_vm0, %v7338_v21, 0 }
 0x447   : > { %2131 = vadd.xlane.f32.xlu0 %v6563_v22  ;;  %v7341_v22 = vld [vmem:[#allocation23_spill] sm:$0xff]  ;;  %v2599_v35 = vpop.xlane.xlu1 %2598 }
 0x448   : > { %v3008_v53 = vsel %vm1380_vm0, %v7341_v22, 0 }
 0x44b   : > { %2143 = vadd.xlane.f32.xlu0 %v6592_v50  ;;  %v2627_v50 = vsub.f32 %v6511_v20, %v2603_v7  ;;  %v2626_v20 = vsub.f32 %v6491_v17, %v2601_v10 }
 0x44d   : > { %v5219_v57 = vpop.eup %5218  ;;  %v2650_v19 = vmul.f32 1.442695, %v2627_v50 }
 0x44e   : > { %v6684_v33 = vpop.eup %5220  ;;  %v2716_v32 = vpack.c.bf16 %v5219_v57, %v6681_v61 }
 0x44f   : > { %v2717_v29 = vpack.c.bf16 %v5217_v12, %v6684_v33  ;;  %2139 = vadd.xlane.f32.xlu0 %v6596_v0  ;;  %v2625_v0 = vsub.f32 %v6515_v44, %v2599_v35  ;;  %5222 = vpow2.f32 %v2650_v19 }
 0x450   : > { %4715 = vmatprep.mubr.bf16.mxu1 %v2716_v32 }
 0x451   : > { %4716 = vmatmul.mubr.bf16.vlgmr.msra.gmra.mxu1 %v2717_v29  ;;  %v2646_v21 = vmul.f32 1.442695, %v2625_v0 }
 0x452   : > { %4732 = vmatpush3.bf16.xpose.msra.mxu1 %v3011_v43 }
 0x453   : > { %4820 = vmatprep.subr.msk.bf16.mxu1 %vm1380_vm0, %v7341_v22  ;;  %2151 = vadd.xlane.f32.xlu0 %v6620_v30  ;;  %5224 = vpow2.f32 %v2646_v21  ;;  %v2607_v30 = vpop.xlane.xlu1 %2606 }
 0x457   : > { %2147 = vadd.xlane.f32.xlu0 %v6609_v18  ;;  %v3005_v18 = vsel %vm1380_vm0, %v2960_v11, 0  ;;  %v2617_v42 = vpop.xlane.xlu1 %2616 }
 0x458   : > { %v2634_v50 = vsub.f32 %v6532_v60, %v2617_v42 }
 0x45a   : > { %4734 = vmatpush3.bf16.xpose.msra.mxu1 %v3008_v53 }
 0x45b   : > { %4821 = vmatprep.subr.msk.bf16.mxu1 %vm1380_vm0, %v2960_v11  ;;  %2159 = vadd.xlane.f32.xlu0 %v6642_v4  ;;  %v2648_v4 = vmul.f32 1.442695, %v2626_v20 }
 0x45c   : > { %v5223_v5 = vpop.eup %5222 }
 0x45f   : > { %2155 = vadd.xlane.f32.xlu0 %v6630_v28  ;;  %v2629_v28 = vsub.f32 %v6529_v1, %v2607_v30 }
 0x460   : > { %v5225_v1 = vpop.eup %5224 }
 0x461   : > { %v2654_v45 = vmul.f32 1.442695, %v2629_v28 }
 0x462   : > { %4736 = vmatpush3.bf16.xpose.msra.mxu1 %v3005_v18 }
 0x463   : > { %4822 = vmatprep.subr.msk.bf16.mxu1 %vm1380_vm0, %v6665_v37  ;;  %2674 = vadd.xlane.f32.xlu0 %v5217_v12  ;;  %v2597_v44 = vpop.xlane.xlu0 %2596 }
 0x464   : > { %v2624_v63 = vsub.f32 %v6505_v49, %v2597_v44  ;;  %1606 = vadd.xlane.f32.xlu1 %v6419_v51 }
 0x466   : > { %v2644_v54 = vmul.f32 1.442695, %v2624_v63 }
 0x467   : > { %2670 = vadd.xlane.f32.xlu0 %v5219_v57  ;;  %v2609_v17 = vpop.xlane.xlu0 %2608 }
 0x468   : > { %5226 = vpow2.f32 %v2644_v54  ;;  %1610 = vadd.xlane.f32.xlu1 %v6425_v48  ;;  %v2630_v49 = vsub.f32 %v6518_v46, %v2609_v17 }
 0x469   : > { %5228 = vpow2.f32 %v2648_v4 }
 0x46a   : > { %4738 = vmatpush3.bf16.xpose.msra.mxu1 %v3002_v8  ;;  %5230 = vpow2.f32 %v2654_v45  ;;  %v2656_v26 = vmul.f32 1.442695, %v2630_v49 }
 0x46b   : > { %2682 = vadd.xlane.f32.xlu0 %v5223_v5  ;;  %v2605_v51 = vpop.xlane.xlu0 %2604 }
 0x46c   : > { %v2628_v16 = vsub.f32 %v6521_v3, %v2605_v51  ;;  %1614 = vadd.xlane.f32.xlu1 %v6443_v55 }
 0x46e   : > { %v2652_v59 = vmul.f32 1.442695, %v2628_v16 }
 0x46f   : > { %2678 = vadd.xlane.f32.xlu0 %v5225_v1  ;;  %v2611_v48 = vpop.xlane.xlu0 %2610 }
 0x470   : > { %5232 = vpow2.f32 %v2652_v59  ;;  %v2631_v37 = vsub.f32 %v6526_v36, %v2611_v48  ;;  %1618 = vadd.xlane.f32.xlu1 %v6452_v24  ;;  %v2954_v24 = vpop.permute.xlu1 %2953 }
 0x471   : > { %5234 = vpow2.f32 %v2656_v26  ;;  %v2996_v57 = vsel %vm1380_vm0, %v2954_v24, 0 }
 0x472   : > { %v2658_v14 = vmul.f32 1.442695, %v2631_v37 }
 0x473   : > { %v2613_v46 = vpop.xlane.xlu0 %2612 }
 0x474   : > { %5236 = vpow2.f32 %v2658_v14  ;;  %2133 = vadd.xlane.f32.xlu1 %v6567_v15  ;;  %v2952_v32 = vpop.permute.xlu1 %2951  ;;  %v2632_v7 = vsub.f32 %v6543_v34, %v2613_v46  ;;  %v2664_v34 = vmul.f32 1.442695, %v2634_v50 }
 0x475   : > { %v6718_v3 = vpop.eup %5226  ;;  %v2993_v22 = vsel %vm1380_vm0, %v2952_v32, 0 }
 0x476   : > { %v5229_v55 = vpop.eup %5228  ;;  %v2718_v23 = vpack.c.bf16 %v5225_v1, %v6718_v3  ;;  %v2660_v19 = vmul.f32 1.442695, %v2632_v7 }
 0x477   : > { %v2956_v62 = vpop.permute.xlu0 %2955  ;;  %v2719_v27 = vpack.c.bf16 %v5223_v5, %v5229_v55  ;;  %v6725_v15 = vpop.eup %5230 }
 0x478   : > { %2129 = vadd.xlane.f32.xlu1 %v6556_v13  ;;  %4719 = vmatprep.mubr.bf16.mxu1 %v2718_v23  ;;  %v2999_v36 = vsel %vm1380_vm0, %v2956_v62, 0  ;;  %5238 = vpow2.f32 %v2660_v19 }
 0x479   : > { %4823 = vmatprep.subr.msk.bf16.mxu1 %vm1380_vm0, %v2956_v62  ;;  %4720 = vmatmul.mubr.bf16.gmra.mxu1 %v2719_v27 }
 0x47a   : > { %4740 = vmatpush3.bf16.xpose.msra.mxu1 %v2999_v36 }
 0x47b   : > { %4824 = vmatprep.subr.msk.bf16.mxu1 %vm1380_vm0, %v2954_v24  ;;  %v2930_v20 = vpop.permute.xlu0 %2929 }
 0x47c   : > { %2141 = vadd.xlane.f32.xlu1 %v6599_v31  ;;  %v6742_v31 = vpop.f32.mrf.mxu1 }
 0x47d   : > { %v6728_v9 = vpop.eup %5232 }
 0x47e   : > { %v2720_v10 = vpack.c.bf16 %v6725_v15, %v6728_v9  ;;  %v6732_v13 = vpop.eup %5234  ;;  %v6749_v35 = vpop.f32.mrf.mxu1 }
 0x47f   : > { %v2934_v28 = vpop.permute.xlu0 %2933 }
 0x480   : > { %2137 = vadd.xlane.f32.xlu1 %v6589_v58  ;;  %4723 = vmatprep.mubr.bf16.mxu1 %v2720_v10  ;;  %v6753_v11 = vpop.f32.mrf.mxu1 }
 0x481   : > { %v6735_v12 = vpop.eup %5236 }
 0x482   : > { %4742 = vmatpush3.bf16.xpose.msra.mxu1 %v2996_v57  ;;  %v2721_v29 = vpack.c.bf16 %v6735_v12, %v6732_v13  ;;  %v6758_v21 = vpop.f32.mrf.mxu1 }
 0x483   : > { %4825 = vmatprep.subr.msk.bf16.mxu1 %vm1380_vm0, %v2952_v32  ;;  %v2938_v45 = vpop.permute.xlu0 %2937 }
 0x484   : > { %2149 = vadd.xlane.f32.xlu1 %v6612_v39  ;;  %4724 = vmatmul.mubr.bf16.gmra.mxu1 %v2721_v29 }
 0x487   : > { %v3267_v59 = vpop.permute.xlu0 %3266 }
 0x488   : > { %v2619_v58 = vpop.xlane.xlu1 %2618  ;;  %2145 = vadd.xlane.f32.xlu1 %v6618_v56 }
 0x489   : > { %v2635_v43 = vsub.f32 %v6554_v41, %v2619_v58 }
 0x48a   : > { %4744 = vmatpush3.bf16.xpose.msra.mxu1 %v2993_v22 }
 0x48b   : > { %v2666_v0 = vmul.f32 1.442695, %v2635_v43 }
 0x48c   : > { %v2615_v39 = vpop.xlane.xlu1 %2614  ;;  %2157 = vadd.xlane.f32.xlu1 %v6633_v40 }
 0x48d   : > { %v2633_v53 = vsub.f32 %v6569_v25, %v2615_v39  ;;  %5240 = vpow2.f32 %v2666_v0  ;;  %v6761_v25 = vpop.f32.mrf.mxu1 }
 0x48f   : > { %v2662_v56 = vmul.f32 1.442695, %v2633_v53  ;;  %v6764_v44 = vpop.f32.mrf.mxu1 }
 0x490   : > { %v2950_v41 = vpop.permute.xlu1 %2949  ;;  %2153 = vadd.xlane.f32.xlu1 %v6636_v52  ;;  %v6766_v52 = vpop.eup %5238 }
 0x491   : > { %5242 = vpow2.f32 %v2662_v56  ;;  %4826 = vmatprep.subr.msk.bf16.mxu1 %vm1380_vm0, %v2950_v41  ;;  %v2990_v60 = vsel %vm1380_vm0, %v2950_v41, 0  ;;  %v6772_v54 = vpop.f32.mrf.mxu1 }
 0x492   : > { %5244 = vpow2.f32 %v2664_v34  ;;  %4746 = vmatpush3.bf16.xpose.msra.mxu1 %v2990_v60 }
 0x493   : > { %v6781_v5 = vpop.f32.mrf.mxu1 }
 0x494   : > { %v2926_v40 = vpop.permute.xlu1 %2925  ;;  %2672 = vadd.xlane.f32.xlu1 %v6684_v33 }
 0x495   : > { %v6784_v51 = vpop.f32.mrf.mxu1 }
 0x497   : > { %v6786_v1 = vpop.f32.mrf.mxu1 }
 0x498   : > { %v2928_v18 = vpop.permute.xlu1 %2927  ;;  %2668 = vadd.xlane.f32.xlu1 %v6681_v61 }
 0x499   : > { %v6790_v48 = vpop.f32.mrf.mxu1 }
 0x49a   : > { %v6768_v63 = vpop.eup %5240 }
 0x49b   : > { %v6792_v14 = vpop.f32.mrf.mxu1 }
 0x49c   : > { %v2932_v30 = vpop.permute.xlu1 %2931  ;;  %2680 = vadd.xlane.f32.xlu1 %v5229_v55 }
 0x49d   : > { %v6796_v46 = vpop.f32.mrf.mxu1 }
 0x49e   : > { %v6770_v4 = vpop.eup %5242  ;;  %7342 = vst [vmem:[#allocation19_spill] sm:$0xff] %v6796_v46 }
 0x49f   : > { %v6774_v33 = vpop.eup %5244  ;;  %v2722_v17 = vpack.c.bf16 %v6770_v4, %v6766_v52  ;;  %v6798_v55 = vpop.f32.mrf.mxu1 }
 0x4a0   : > { %v2936_v8 = vpop.permute.xlu1 %2935  ;;  %2676 = vadd.xlane.f32.xlu1 %v6718_v3  ;;  %v2723_v61 = vpack.c.bf16 %v6768_v63, %v6774_v33  ;;  %v3259_v3 = vpop.permute.xlu0 %3258 }
 0x4a1   : > { %4727 = vmatprep.mubr.bf16.mxu1 %v2722_v17  ;;  %v6802_v27 = vpop.f32.mrf.mxu1 }
 0x4a2   : > { %4728 = vmatmul.mubr.bf16.gmra.mxu1 %v2723_v61  ;;  %7343 = vst [vmem:[#allocation32_spill] sm:$0xff] %v6802_v27 }
 0x4a3   : > { %4747 = vmatprep.mubr.msk.bf16.mxu1 %vm1380_vm0, %v2926_v40  ;;  %v6804_v24 = vpop.f32.mrf.mxu1 }
 0x4a4   : > { %v2940_v49 = vpop.permute.xlu1 %2939 }
 0x4a8   : > { %v3269_v16 = vpop.permute.xlu1 %3268 }
 0x4a9   : > { %4763 = vmatprep.subr.bf16.mxu0 %v3269_v16 }
 0x4aa   : > { %4748 = vmatmul.mubr.msk.bf16.vlgmr.msra.gmra.mxu1 %vm1380_vm0, %v2928_v18  ;;  %4764 = vmatpush3.bf16.msra.mxu0 %v3269_v16 }
 0x4ab   : > { %4751 = vmatprep.mubr.msk.bf16.mxu1 %vm1380_vm0, %v2930_v20  ;;  %4765 = vmatprep.subr.bf16.mxu0 %v3267_v59 }
 0x4ac   : > { %v3265_v26 = vpop.permute.xlu1 %3264 }
 0x4ae   : > { %4766 = vmatpush3.bf16.msra.mxu0 %v3267_v59 }
 0x4af   : > { %4767 = vmatprep.subr.bf16.mxu0 %v3265_v26 }
 0x4b0   : > { %v3263_v37 = vpop.permute.xlu1 %3262 }
 0x4b2   : > { %4752 = vmatmul.mubr.msk.bf16.gmra.mxu1 %vm1380_vm0, %v2932_v30  ;;  %4768 = vmatpush3.bf16.msra.mxu0 %v3265_v26 }
 0x4b3   : > { %4755 = vmatprep.mubr.msk.bf16.mxu1 %vm1380_vm0, %v2934_v28  ;;  %4769 = vmatprep.subr.bf16.mxu0 %v3263_v37 }
 0x4b4   : > { %v3261_v42 = vpop.permute.xlu1 %3260 }
 0x4b6   : > { %4770 = vmatpush3.bf16.msra.mxu0 %v3263_v37 }
 0x4b7   : > { %4771 = vmatprep.subr.bf16.mxu0 %v3261_v42 }
 0x4b8   : > { %v3257_v23 = vpop.permute.xlu1 %3256 }
 0x4ba   : > { %4756 = vmatmul.mubr.msk.bf16.gmra.mxu1 %vm1380_vm0, %v2936_v8  ;;  %4772 = vmatpush3.bf16.msra.mxu0 %v3261_v42 }
 0x4bb   : > { %4759 = vmatprep.mubr.msk.bf16.mxu1 %vm1380_vm0, %v2938_v45  ;;  %4773 = vmatprep.subr.bf16.mxu0 %v3259_v3 }
 0x4bc   : > { %v1609_v62 = vpop.xlane.xlu0 %1608  ;;  %v3255_v10 = vpop.permute.xlu1 %3254 }
 0x4bd   : > { %5246 = vrcp.f32 %v1609_v62 }
 0x4be   : > { %4774 = vmatpush3.bf16.msra.mxu0 %v3259_v3 }
 0x4bf   : > { %4775 = vmatprep.subr.bf16.mxu0 %v3257_v23 }
 0x4c0   : > { %v1613_v36 = vpop.xlane.xlu0 %1612 }
 0x4c1   : > { %5248 = vrcp.f32 %v1613_v36 }
 0x4c2   : > { %4760 = vmatmul.mubr.msk.bf16.gmra.mxu1 %vm1380_vm0, %v2940_v49  ;;  %4776 = vmatpush3.bf16.msra.mxu0 %v3257_v23 }
 0x4c3   : > { %4777 = vmatprep.subr.bf16.mxu0 %v3255_v10 }
 0x4c4   : > { %v1617_v57 = vpop.xlane.xlu0 %1616  ;;  %v6807_v32 = vpop.f32.mrf.mxu1 }
 0x4c5   : > { %5250 = vrcp.f32 %v1617_v57 }
 0x4c6   : > { %4778 = vmatpush3.bf16.msra.mxu0 %v3255_v10  ;;  %v6809_v29 = vpop.f32.mrf.mxu1 }
 0x4c8   : > { %v1621_v7 = vpop.xlane.xlu0 %1620  ;;  %v6811_v43 = vpop.f32.mrf.mxu1 }
 0x4c9   : > { %5252 = vrcp.f32 %v1621_v7 }
 0x4ca   : > { %v5247_v58 = vpop.eup %5246  ;;  %v6816_v39 = vpop.f32.mrf.mxu1 }
 0x4cb   : > { %v1760_v22 = vmul.f32 %v5247_v58, %v6758_v21 }
 0x4cc   : > { %v6814_v50 = vpop.xlane.xlu0 %2135 }
 0x4cd   : > { %v4346_v19 = vpack.c.bf16 %v1760_v22, %v1760_v22 }
 0x4ce   : > { %v5249_v0 = vpop.eup %5248 }
 0x4cf   : > { %1841 = vst.msk [vmem:[#allocation2 + $0x8] sm:$0xf] %vm1839_vm1, %v4346_v19  ;;  %v1762_v53 = vmul.f32 %v5249_v0, %v6753_v11 }
 0x4d0   : > { %v6820_v34 = vpop.xlane.xlu0 %2131  ;;  %v6822_v56 = vpop.f32.mrf.mxu1 }
 0x4d1   : > { %v4348_v41 = vpack.c.bf16 %v1762_v53, %v1762_v53 }
 0x4d2   : > { %v5251_v60 = vpop.eup %5250  ;;  %v6824_v40 = vpop.f32.mrf.mxu1 }
 0x4d3   : > { %1843 = vst.msk [vmem:[#allocation2 + $0x18] sm:$0xf] %vm1839_vm1, %v4348_v41  ;;  %v1764_v21 = vmul.f32 %v5251_v60, %v6781_v5 }
 0x4d4   : > { %v6828_v20 = vpop.xlane.xlu0 %2143  ;;  %v6830_v18 = vpop.f32.mrf.mxu1 }
 0x4d5   : > { %v4350_v30 = vpack.c.bf16 %v1764_v21, %v1764_v21 }
 0x4d6   : > { %v5253_v28 = vpop.eup %5252  ;;  %v6832_v17 = vpop.f32.mrf.mxu1 }
 0x4d7   : > { %1845 = vst.msk [vmem:[#allocation2 + $0x28] sm:$0xf] %vm1839_vm1, %v4350_v30  ;;  %v1766_v11 = vmul.f32 %v5253_v28, %v6772_v54 }
 0x4d8   : > { %v6836_v8 = vpop.xlane.xlu0 %2139  ;;  %v6838_v45 = vpop.f32.mrf.mxu1 }
 0x4d9   : > { %v4352_v61 = vpack.c.bf16 %v1766_v11, %v1766_v11 }
 0x4da   : > { %v6843_v49 = vpop.f32.mrf.mxu1 }
 0x4db   : > { %1847 = vst.msk [vmem:[#allocation2 + $0x38] sm:$0xf] %vm1839_vm1, %v4352_v61  ;;  %7345 = vst [vmem:[#allocation30_spill] sm:$0xff] %v6843_v49 }
 0x4dc   : > { %v6841_v5 = vpop.xlane.xlu0 %2151  ;;  %v6845_v59 = vpop.f32.mrf.mxu1 }
 0x4dd   : > { %7344 = vst [vmem:[#allocation31_spill] sm:$0xff] %v6841_v5  ;;  %7346 = vst [vmem:[#allocation29_spill] sm:$0xff] %v6845_v59 }
 0x4de   : > { %v2286_v37 = vpop.f32.mrf.mxu1 }
 0x4e0   : > { %v2148_v16 = vpop.xlane.xlu0 %2147  ;;  %v6847_v54 = vpop.f32.mrf.mxu1 }
 0x4e1   : > { %5254 = vrcp.f32 %v2148_v16  ;;  %7347 = vst [vmem:[#allocation27_spill] sm:$0xff] %v6847_v54 }
 0x4e2   : > { %v6849_v62 = vpop.f32.mrf.mxu1 }
 0x4e4   : > { %v2160_v26 = vpop.xlane.xlu0 %2159  ;;  %v4666_v7 = vpop.f32.mrf.mxu1 }
 0x4e5   : > { %5256 = vrcp.f32 %v2160_v26 }
 0x4e6   : > { %v2302_v0 = vpop.f32.mrf.mxu1 }
 0x4e8   : > { %v2156_v42 = vpop.xlane.xlu0 %2155 }
 0x4e9   : > { %5258 = vrcp.f32 %v2156_v42 }
 0x4ec   : > { %v2675_v16 = vpop.xlane.xlu0 %2674 }
 0x4ed   : > { %v1607_v3 = vpop.xlane.xlu1 %1606 }
 0x4ee   : > { %v5255_v23 = vpop.eup %5254  ;;  %5260 = vrcp.f32 %v1607_v3 }
 0x4ef   : > { %v6851_v36 = vmul.f32 %v5255_v23, %v2286_v37 }
 0x4f1   : > { %v1611_v10 = vpop.xlane.xlu1 %1610 }
 0x4f2   : > { %v5257_v57 = vpop.eup %5256  ;;  %5262 = vrcp.f32 %v1611_v10 }
 0x4f3   : > { %v6853_v58 = vmul.f32 %v5257_v57, %v4666_v7  ;;  %v2671_v57 = vpop.xlane.xlu0 %2670 }
 0x4f5   : > { %7348 = vst [vmem:[#allocation25_spill] sm:$0xff] %v6853_v58  ;;  %v1615_v22 = vpop.xlane.xlu1 %1614 }
 0x4f6   : > { %v5259_v19 = vpop.eup %5258  ;;  %5264 = vrcp.f32 %v1615_v22 }
 0x4f7   : > { %v6855_v53 = vmul.f32 %v5259_v19, %v2302_v0 }
 0x4f9   : > { %7349 = vst [vmem:[#allocation22_spill] sm:$0xff] %v6855_v53  ;;  %v1619_v41 = vpop.xlane.xlu1 %1618 }
 0x4fa   : > { %5266 = vrcp.f32 %v1619_v41 }
 0x4fb   : > { %v5261_v60 = vpop.eup %5260 }
 0x4fc   : > { %v1759_v21 = vmul.f32 %v5261_v60, %v6749_v35 }
 0x4fd   : > { %v6858_v30 = vpop.xlane.xlu1 %2133 }
 0x4fe   : > { %v4345_v28 = vpack.c.bf16 %v1759_v21, %v1759_v21 }
 0x4ff   : > { %v5263_v11 = vpop.eup %5262 }
 0x500   : > { %1840 = vst.msk [vmem:[#allocation2] sm:$0xf] %vm1839_vm1, %v4345_v28  ;;  %v1761_v61 = vmul.f32 %v5263_v11, %v6742_v31 }
 0x501   : > { %v2130_v26 = vpop.xlane.xlu1 %2129 }
 0x502   : > { %5268 = vrcp.f32 %v2130_v26  ;;  %v4347_v37 = vpack.c.bf16 %v1761_v61, %v1761_v61 }
 0x503   : > { %v5265_v42 = vpop.eup %5264  ;;  %5270 = vrcp.f32 %v2675_v16 }
 0x504   : > { %1842 = vst.msk [vmem:[#allocation2 + $0x10] sm:$0xf] %vm1839_vm1, %v4347_v37  ;;  %v1763_v3 = vmul.f32 %v5265_v42, %v6764_v44  ;;  %5272 = vrcp.f32 %v2671_v57 }
 0x505   : > { %v6864_v23 = vpop.xlane.xlu1 %2141 }
 0x506   : > { %v4349_v35 = vpack.c.bf16 %v1763_v3, %v1763_v3 }
 0x507   : > { %v5267_v10 = vpop.eup %5266 }
 0x508   : > { %1844 = vst.msk [vmem:[#allocation2 + $0x20] sm:$0xf] %vm1839_vm1, %v4349_v35  ;;  %v1765_v7 = vmul.f32 %v5267_v10, %v6761_v25 }
 0x509   : > { %v6868_v31 = vpop.xlane.xlu1 %2137 }
 0x50a   : > { %v4351_v22 = vpack.c.bf16 %v1765_v7, %v1765_v7 }
 0x50c   : > { %1846 = vst.msk [vmem:[#allocation2 + $0x30] sm:$0xf] %vm1839_vm1, %v4351_v22  ;;  %v2683_v22 = vpop.xlane.xlu0 %2682 }
 0x50d   : > { %v6871_v19 = vpop.xlane.xlu1 %2149 }
 0x50f   : > { %v5269_v0 = vpop.eup %5268 }
 0x510   : > { %v2314_v44 = vmul.f32 %v5269_v0, %v6809_v29  ;;  %v5271_v11 = vpop.eup %5270 }
 0x511   : > { %v6874_v41 = vpop.xlane.xlu1 %2145  ;;  %v4717_v60 = vpop.f32.mrf.mxu1 }
 0x512   : > { %7350 = vst [vmem:[#allocation20_spill] sm:$0xff] %v6874_v41  ;;  %v4361_v21 = vpack.c.bf16 %v2314_v44, %v2314_v44  ;;  %v5273_v26 = vpop.eup %5272 }
 0x513   : > { %v2758_v28 = vpop.f32.mrf.mxu1 }
 0x514   : > { %2378 = vrot.lane.b32.xlu1 %v4361_v21, %s5594_s24 }
 0x515   : > { %v6877_v25 = vpop.xlane.xlu1 %2157  ;;  %v4718_v61 = vpop.f32.mrf.mxu1 }
 0x516   : > { %v2824_v16 = vmul.f32 %v5271_v11, %v4718_v61 }
 0x517   : > { %v2761_v37 = vpop.f32.mrf.mxu1 }
 0x518   : > { %v4380_v42 = vpack.c.bf16 %v2824_v16, %v2824_v16  ;;  %v2822_v3 = vmul.f32 %v5273_v26, %v2761_v37  ;;  %v2679_v16 = vpop.xlane.xlu0 %2678 }
 0x519   : > { %v6879_v35 = vpop.xlane.xlu1 %2153 }
 0x51a   : > { %2904 = vst.msk [vmem:[#allocation2 + $0x1c] sm:$0xf] %vm1839_vm1, %v4380_v42  ;;  %v4378_v29 = vpack.c.bf16 %v2822_v3, %v2822_v3 }
 0x51c   : > { %2902 = vst.msk [vmem:[#allocation2 + $0xc] sm:$0xf] %vm1839_vm1, %v4378_v29 }
 0x51d   : > { %v2673_v10 = vpop.xlane.xlu1 %2672 }
 0x51e   : > { %5274 = vrcp.f32 %v2673_v10 }
 0x521   : > { %v2669_v57 = vpop.xlane.xlu1 %2668 }
 0x522   : > { %5276 = vrcp.f32 %v2669_v57 }
 0x525   : > { %v2681_v7 = vpop.xlane.xlu1 %2680 }
 0x526   : > { %5278 = vrcp.f32 %v2681_v7 }
 0x529   : > { %v2677_v44 = vpop.xlane.xlu1 %2676 }
 0x52a   : > { %5280 = vrcp.f32 %v2677_v44 }
 0x52b   : > { %v5275_v0 = vpop.eup %5274  ;;  %5282 = vrcp.f32 %v2683_v22 }
 0x52c   : > { %v2823_v21 = vmul.f32 %v5275_v0, %v4717_v60  ;;  %5284 = vrcp.f32 %v2679_v16 }
 0x52d   : > { %5286 = vrcp.f32 %v6858_v30 }
 0x52e   : > { %v4379_v11 = vpack.c.bf16 %v2823_v21, %v2823_v21  ;;  %5288 = vrcp.f32 %v6820_v34 }
 0x52f   : > { %v5277_v61 = vpop.eup %5276  ;;  %5290 = vrcp.f32 %v6868_v31 }
 0x530   : > { %2903 = vst.msk [vmem:[#allocation2 + $0x14] sm:$0xf] %vm1839_vm1, %v4379_v11  ;;  %v2821_v26 = vmul.f32 %v5277_v61, %v2758_v28  ;;  %5292 = vrcp.f32 %v6814_v50 }
 0x532   : > { %v4377_v37 = vpack.c.bf16 %v2821_v26, %v2821_v26 }
 0x533   : > { %v5279_v42 = vpop.eup %5278 }
 0x534   : > { %2901 = vst.msk [vmem:[#allocation2 + $0x4] sm:$0xf] %vm1839_vm1, %v4377_v37 }
 0x537   : > { %v5281_v10 = vpop.eup %5280 }
 0x538   : > { %v5283_v60 = vpop.eup %5282 }
 0x539   : > { %v4721_v3 = vpop.f32.mrf.mxu1  ;;  %v5285_v21 = vpop.eup %5284 }
 0x53a   : > { %v2827_v29 = vmul.f32 %v5279_v42, %v4721_v3 }
 0x53b   : > { %v2774_v57 = vpop.f32.mrf.mxu1 }
 0x53c   : > { %v4383_v27 = vpack.c.bf16 %v2827_v29, %v2827_v29  ;;  %v2825_v7 = vmul.f32 %v5281_v10, %v2774_v57 }
 0x53d   : > { %v4722_v0 = vpop.f32.mrf.mxu1 }
 0x53e   : > { %2907 = vst.msk [vmem:[#allocation2 + $0x34] sm:$0xf] %vm1839_vm1, %v4383_v27  ;;  %v4381_v44 = vpack.c.bf16 %v2825_v7, %v2825_v7  ;;  %v2828_v22 = vmul.f32 %v5283_v60, %v4722_v0 }
 0x53f   : > { %v2777_v11 = vpop.f32.mrf.mxu1 }
 0x540   : > { %2905 = vst.msk [vmem:[#allocation2 + $0x24] sm:$0xf] %vm1839_vm1, %v4381_v44  ;;  %v4384_v28 = vpack.c.bf16 %v2828_v22, %v2828_v22  ;;  %v2826_v61 = vmul.f32 %v5285_v21, %v2777_v11 }
 0x542   : > { %2908 = vst.msk [vmem:[#allocation2 + $0x3c] sm:$0xf] %vm1839_vm1, %v4384_v28  ;;  %v4382_v16 = vpack.c.bf16 %v2826_v61, %v2826_v61 }
 0x544   : > { %2906 = vst.msk [vmem:[#allocation2 + $0x2c] sm:$0xf] %vm1839_vm1, %v4382_v16  ;;  %v6889_v26 = vpop.f32.mrf.mxu1 }
 0x546   : > { %v6891_v37 = vpop.f32.mrf.mxu1 }
 0x548   : > { %v6893_v42 = vpop.f32.mrf.mxu1 }
 0x54a   : > { %v6895_v27 = vpop.f32.mrf.mxu1 }
 0x562   : > { %v6897_v3 = vpop.f32.mrf.mxu1 }
 0x563   : > { %7351 = vst [vmem:[#allocation18_spill] sm:$0xff] %v6897_v3 }
 0x564   : > { %v6899_v29 = vpop.f32.mrf.mxu1 }
 0x566   : > { %v6901_v10 = vpop.f32.mrf.mxu1 }
 0x567   : > { %7352 = vst [vmem:[#allocation17_spill] sm:$0xff] %v6901_v10 }
 0x568   : > { %v6903_v57 = vpop.f32.mrf.mxu1 }
 0x56a   : > { %v4749_v7 = vpop.f32.mrf.mxu1 }
 0x56b   : > { %3114 = vmax.xlane.f32.xlu0 %v4749_v7 }
 0x56c   : > { %v6905_v60 = vpop.f32.mrf.mxu1 }
 0x56e   : > { %v6907_v0 = vpop.f32.mrf.mxu1 }
 0x56f   : > { %3110 = vmax.xlane.f32.xlu0 %v6905_v60 }
 0x570   : > { %v6910_v44 = vpop.f32.mrf.mxu1 }
 0x571   : > { %3112 = vmax.xlane.f32.xlu1 %v6910_v44 }
 0x572   : > { %v6913_v22 = vpop.f32.mrf.mxu1 }
 0x573   : > { %3116 = vmax.xlane.f32.xlu0 %v6907_v0 }
 0x574   : > { %v6916_v21 = vpop.f32.mrf.mxu1 }
 0x576   : > { %v6918_v11 = vpop.f32.mrf.mxu1 }
 0x577   : > { %3122 = vmax.xlane.f32.xlu0 %v6913_v22 }
 0x578   : > { %v6921_v28 = vpop.f32.mrf.mxu1 }
 0x579   : > { %3120 = vmax.xlane.f32.xlu1 %v6921_v28 }
 0x57a   : > { %v6924_v61 = vpop.f32.mrf.mxu1 }
 0x57b   : > { %3118 = vmax.xlane.f32.xlu0 %v6916_v21 }
 0x57c   : > { %v6927_v16 = vpop.f32.mrf.mxu1 }
 0x57e   : > { %v6929_v58 = vpop.f32.mrf.mxu1 }
 0x57f   : > { %3124 = vmax.xlane.f32.xlu0 %v6918_v11 }
 0x580   : > { %v6932_v53 = vpop.f32.mrf.mxu1 }
 0x581   : > { %3128 = vmax.xlane.f32.xlu1 %v6932_v53 }
 0x582   : > { %v6936_v10 = vpop.f32.mrf.mxu1 }
 0x583   : > { %3130 = vmax.xlane.f32.xlu0 %v6924_v61 }
 0x584   : > { %v6942_v46 = vpop.f32.mrf.mxu1 }
 0x585   : > { %3138 = vmax.xlane.f32.xlu1 %v6936_v10 }
 0x586   : > { %v2379_v3 = vpop.permute.xlu1 %2378  ;;  %v6947_v59 = vpop.f32.mrf.mxu1 }
 0x587   : > { %2427 = vst.msk [vmem:[#allocation2] sm:$0xf] %vm2426_vm2, %v2379_v3  ;;  %3126 = vmax.xlane.f32.xlu0 %v6927_v16  ;;  %v5287_v3 = vpop.eup %5286 }
 0x588   : > { %v6950_v49 = vpop.f32.mrf.mxu1  ;;  %v2316_v30 = vmul.f32 %v5287_v3, %v6807_v32  ;;  %v5289_v41 = vpop.eup %5288 }
 0x589   : > { %3134 = vmax.xlane.f32.xlu1 %v6942_v46  ;;  %v2315_v54 = vmul.f32 %v5289_v41, %v6816_v39  ;;  %v5291_v34 = vpop.eup %5290 }
 0x58a   : > { %v4363_v5 = vpack.c.bf16 %v2316_v30, %v2316_v30  ;;  %v2318_v32 = vmul.f32 %v5291_v34, %v6824_v40  ;;  %v5293_v39 = vpop.eup %5292 }
 0x58b   : > { %3132 = vmax.xlane.f32.xlu0 %v6929_v58 }
 0x58d   : > { %1624 = vadd.xlane.f32.xlu1 %v6464_v2  ;;  %v4362_v2 = vpack.c.bf16 %v2315_v54, %v2315_v54  ;;  %v2317_v54 = vmul.f32 %v5293_v39, %v6811_v43 }
 0x58f   : > { %3140 = vmax.xlane.f32.xlu0 %v6947_v59  ;;  %v4364_v31 = vpack.c.bf16 %v2317_v54, %v2317_v54 }
 0x593   : > { %3136 = vmax.xlane.f32.xlu0 %v6950_v49 }
 0x59e   : > { %2382 = vrot.lane.b32.xlu1 %v4363_v5, %s5594_s24  ;;  %v4365_v5 = vpack.c.bf16 %v2318_v32, %v2318_v32 }
 0x5a9   : > { %2380 = vrot.lane.b32.xlu0 %v4362_v2, %s5594_s24 }
 0x5c2   : > { %1628 = vadd.xlane.f32.xlu1 %v6458_v6 }
 0x5c8   : > { %1622 = vadd.xlane.f32.xlu0 %v6460_v38 }
 0x5cc   : > { %2684 = vadd.xlane.f32.xlu0 %v6728_v9 }
 0x5d0   : > { %2686 = vadd.xlane.f32.xlu0 %v6725_v15 }
 0x5d3   : > { %2386 = vrot.lane.b32.xlu1 %v4365_v5, %s5594_s24 }
 0x5e6   : > { %2384 = vrot.lane.b32.xlu0 %v4364_v31, %s5594_s24  ;;  %v7353_v31 = vld [vmem:[#allocation26_spill] sm:$0xff] }
 0x5f4   : > { %v3115_v6 = vpop.xlane.xlu0 %3114 }
 0x5f5   : > { %v3144_v38 = vsub.f32 %v4749_v7, %v3115_v6 }
 0x5f7   : > { %v3162_v41 = vmul.f32 1.442695, %v3144_v38  ;;  %1632 = vadd.xlane.f32.xlu1 %v6488_v47 }
 0x5f8   : > { %v3111_v9 = vpop.xlane.xlu0 %3110 }
 0x5f9   : > { %5294 = vpow2.f32 %v3162_v41  ;;  %v3142_v50 = vsub.f32 %v6905_v60, %v3111_v9 }
 0x5fa   : > { %v3113_v40 = vpop.xlane.xlu1 %3112 }
 0x5fb   : > { %v3158_v15 = vmul.f32 1.442695, %v3142_v50  ;;  %v3143_v3 = vsub.f32 %v6910_v44, %v3113_v40 }
 0x5fc   : > { %v3117_v30 = vpop.xlane.xlu0 %3116 }
 0x5fd   : > { %5296 = vpow2.f32 %v3158_v15  ;;  %v3160_v2 = vmul.f32 1.442695, %v3143_v3  ;;  %v3145_v43 = vsub.f32 %v6907_v0, %v3117_v30 }
 0x5ff   : > { %5298 = vpow2.f32 %v3160_v2  ;;  %v3164_v34 = vmul.f32 1.442695, %v3145_v43 }
 0x600   : > { %v3123_v32 = vpop.xlane.xlu0 %3122 }
 0x601   : > { %5300 = vpow2.f32 %v3164_v34  ;;  %v3148_v5 = vsub.f32 %v6913_v22, %v3123_v32 }
 0x602   : > { %v3121_v7 = vpop.xlane.xlu1 %3120  ;;  %5302 = vrcp.f32 %v6864_v23 }
 0x603   : > { %v3147_v47 = vsub.f32 %v6921_v28, %v3121_v7  ;;  %v3170_v0 = vmul.f32 1.442695, %v3148_v5 }
 0x604   : > { %v3119_v39 = vpop.xlane.xlu0 %3118 }
 0x605   : > { %v3168_v60 = vmul.f32 1.442695, %v3147_v47  ;;  %v3146_v54 = vsub.f32 %v6916_v21, %v3119_v39  ;;  %1626 = vadd.xlane.f32.xlu0 %v7353_v31 }
 0x606   : > { %v5295_v44 = vpop.eup %5294 }
 0x607   : > { %v3166_v6 = vmul.f32 1.442695, %v3146_v54  ;;  %3194 = vadd.xlane.f32.xlu1 %v5295_v44  ;;  %5304 = vpow2.f32 %v3168_v60 }
 0x608   : > { %v3125_v38 = vpop.xlane.xlu0 %3124 }
 0x609   : > { %5306 = vpow2.f32 %v3166_v6  ;;  %v3149_v41 = vsub.f32 %v6918_v11, %v3125_v38  ;;  %2688 = vadd.xlane.f32.xlu0 %v6732_v13 }
 0x60a   : > { %v5297_v22 = vpop.eup %5296  ;;  %v3129_v28 = vpop.xlane.xlu1 %3128  ;;  %5308 = vrcp.f32 %v6836_v8 }
 0x60b   : > { %v3172_v21 = vmul.f32 1.442695, %v3149_v41  ;;  %3190 = vadd.xlane.f32.xlu1 %v5297_v22  ;;  %5310 = vpow2.f32 %v3170_v0  ;;  %v3151_v23 = vsub.f32 %v6932_v53, %v3129_v28 }
 0x60c   : > { %v6980_v9 = vpop.eup %5298  ;;  %v3131_v50 = vpop.xlane.xlu0 %3130 }
 0x60d   : > { %5312 = vpow2.f32 %v3172_v21  ;;  %2690 = vadd.xlane.f32.xlu0 %v6735_v12  ;;  %v3238_v40 = vpack.c.bf16 %v6980_v9, %v5297_v22  ;;  %v3152_v15 = vsub.f32 %v6924_v61, %v3131_v50  ;;  %v3176_v3 = vmul.f32 1.442695, %v3151_v23 }
 0x60e   : > { %v6985_v11 = vpop.eup %5300  ;;  %v3139_v13 = vpop.xlane.xlu1 %3138 }
 0x60f   : > { %4779 = vmatprep.mubr.bf16.mxu0 %v3238_v40  ;;  %v3239_v8 = vpack.c.bf16 %v6985_v11, %v5295_v44  ;;  %v5303_v43 = vpop.eup %5302  ;;  %v3178_v34 = vmul.f32 1.442695, %v3152_v15  ;;  %5314 = vpow2.f32 %v3176_v3 }
 0x610   : > { %v3127_v30 = vpop.xlane.xlu0 %3126  ;;  %v2320_v39 = vmul.f32 %v5303_v43, %v6822_v56 }
 0x611   : > { %v3150_v2 = vsub.f32 %v6927_v16, %v3127_v30  ;;  %4780 = vmatmul.mubr.bf16.vlgmr.msra.gmra.mxu0 %v3239_v8 }
 0x612   : > { %v3135_v53 = vpop.xlane.xlu1 %3134  ;;  %v4367_v22 = vpack.c.bf16 %v2320_v39, %v2320_v39 }
 0x613   : > { %v3174_v32 = vmul.f32 1.442695, %v3150_v2  ;;  %v3154_v60 = vsub.f32 %v6942_v46, %v3135_v53 }
 0x614   : > { %v3133_v12 = vpop.xlane.xlu0 %3132  ;;  %v6990_v7 = vpop.eup %5304 }
 0x615   : > { %5316 = vpow2.f32 %v3174_v32  ;;  %v3153_v47 = vsub.f32 %v6929_v58, %v3133_v12  ;;  %v3156_v58 = vsub.f32 %v6936_v10, %v3139_v13  ;;  %v3182_v56 = vmul.f32 1.442695, %v3154_v60  ;;  %v7354_v60 = vld [vmem:[#allocation24_spill] sm:$0xff] }
 0x616   : > { %v5307_v61 = vpop.eup %5306  ;;  %v1625_v5 = vpop.xlane.xlu1 %1624  ;;  %5318 = vpow2.f32 %v3178_v34 }
 0x617   : > { %v3180_v16 = vmul.f32 1.442695, %v3153_v47  ;;  %v3240_v54 = vpack.c.bf16 %v6990_v7, %v5307_v61  ;;  %v5309_v31 = vpop.eup %5308  ;;  %5320 = vrcp.f32 %v1625_v5 }
 0x618   : > { %v3141_v44 = vpop.xlane.xlu0 %3140  ;;  %v5311_v6 = vpop.eup %5310  ;;  %v2319_v50 = vmul.f32 %v5309_v31, %v6832_v17 }
 0x619   : > { %5322 = vpow2.f32 %v3180_v16  ;;  %v3157_v0 = vsub.f32 %v6947_v59, %v3141_v44  ;;  %4783 = vmatprep.mubr.bf16.mxu0 %v3240_v54  ;;  %v3186_v59 = vmul.f32 1.442695, %v3156_v58 }
 0x61a   : > { %v5313_v38 = vpop.eup %5312  ;;  %v2383_v41 = vpop.permute.xlu1 %2382  ;;  %5324 = vpow2.f32 %v3182_v56  ;;  %v4366_v15 = vpack.c.bf16 %v2319_v50, %v2319_v50 }
 0x61b   : > { %2429 = vst.msk [vmem:[#allocation2 + $0x10] sm:$0xf] %vm2426_vm2, %v2383_v41  ;;  %v3241_v46 = vpack.c.bf16 %v5313_v38, %v5311_v6  ;;  %v3188_v28 = vmul.f32 1.442695, %v3157_v0 }
 0x61c   : > { %2390 = vrot.lane.b32.xlu1 %v4367_v22, %s5594_s24  ;;  %v3137_v21 = vpop.xlane.xlu0 %3136  ;;  %v5315_v13 = vpop.eup %5314 }
 0x61d   : > { %v3155_v23 = vsub.f32 %v6950_v49, %v3137_v21  ;;  %4784 = vmatmul.mubr.bf16.gmra.mxu0 %v3241_v46  ;;  %5326 = vpow2.f32 %v3188_v28 }
 0x61f   : > { %v3184_v40 = vmul.f32 1.442695, %v3155_v23 }
 0x620   : > { %v2381_v10 = vpop.permute.xlu0 %2380 }
 0x621   : > { %5328 = vpow2.f32 %v3184_v40  ;;  %2428 = vst.msk [vmem:[#allocation2 + $0x8] sm:$0xf] %vm2426_vm2, %v2381_v10 }
 0x622   : > { %v5317_v8 = vpop.eup %5316  ;;  %5330 = vpow2.f32 %v3186_v59 }
 0x623   : > { %2388 = vrot.lane.b32.xlu0 %v4366_v15, %s5594_s24  ;;  %v3242_v3 = vpack.c.bf16 %v5315_v13, %v5317_v8  ;;  %v5319_v30 = vpop.eup %5318 }
 0x624   : > { %v5321_v49 = vpop.eup %5320 }
 0x625   : > { %4787 = vmatprep.mubr.bf16.mxu0 %v3242_v3  ;;  %v1768_v17 = vmul.f32 %v5321_v49, %v6792_v14  ;;  %v7355_v3 = vld [vmem:[#allocation33_spill] sm:$0xff] }
 0x626   : > { %v5323_v2 = vpop.eup %5322 }
 0x627   : > { %v3243_v53 = vpack.c.bf16 %v5323_v2, %v5319_v30  ;;  %v4354_v43 = vpack.c.bf16 %v1768_v17, %v1768_v17  ;;  %v5325_v34 = vpop.eup %5324 }
 0x629   : > { %4788 = vmatmul.mubr.bf16.gmra.mxu0 %v3243_v53  ;;  %1849 = vst.msk [vmem:[#allocation2 + $0x48] sm:$0xf] %vm1839_vm1, %v4354_v43 }
 0x62a   : > { %v5327_v32 = vpop.eup %5326 }
 0x62e   : > { %v5329_v12 = vpop.eup %5328 }
 0x62f   : > { %v5331_v47 = vpop.eup %5330  ;;  %v3244_v5 = vpack.c.bf16 %v5329_v12, %v5325_v34 }
 0x630   : > { %v3245_v39 = vpack.c.bf16 %v5327_v32, %v5331_v47 }
 0x631   : > { %4791 = vmatprep.mubr.bf16.mxu0 %v3244_v5  ;;  %v5093_v5 = vld [vmem:[#allocation9 + $0x34] ss:$8 sps:$4 sm:$0xff]  }
 0x632   : > { %4792 = vmatmul.mubr.bf16.gmra.mxu0 %v3245_v39  ;;  %v4370_v39 = vpack.c.bf16 %v6851_v36, %v6851_v36  ;;  %v5105_v36 = vld [vmem:[#allocation9 + $0xf4] ss:$8 sps:$4 sm:$0xff]  }
 0x640   : > { %3202 = vadd.xlane.f32.xlu1 %v5311_v6 }
 0x642   : > { %1630 = vadd.xlane.f32.xlu0 %v7354_v60  ;;  %v5094_v60 = vld [vmem:[#allocation9 + $0x20] ss:$8 sps:$4 sm:$0xff]  }
 0x644   : > { %3198 = vadd.xlane.f32.xlu1 %v5307_v61 }
 0x646   : > { %2692 = vadd.xlane.f32.xlu0 %v6766_v52 }
 0x648   : > { %3210 = vadd.xlane.f32.xlu1 %v5319_v30 }
 0x64a   : > { %3196 = vadd.xlane.f32.xlu0 %v6985_v11 }
 0x64b   : > { %v1629_v14 = vpop.xlane.xlu1 %1628 }
 0x64c   : > { %5332 = vrcp.f32 %v1629_v14  ;;  %3206 = vadd.xlane.f32.xlu1 %v5317_v8  ;;  %v5081_v8 = vld [vmem:[#allocation9 + $0x74] ss:$8 sps:$4 sm:$0xff]   ;;  %v5096_v14 = vld [vmem:[#allocation9 + $0x24] ss:$8 sps:$4 sm:$0xff]  }
 0x64d   : > { %3803 = vmatprep.subr.bf16.mxu0 %v5081_v8 }
 0x64e   : > { %3192 = vadd.xlane.f32.xlu0 %v6980_v9 }
 0x64f   : > { %v2387_v16 = vpop.permute.xlu1 %2386 }
 0x650   : > { %2431 = vst.msk [vmem:[#allocation2 + $0x20] sm:$0xf] %vm2426_vm2, %v2387_v16  ;;  %3218 = vadd.xlane.f32.xlu1 %v5331_v47  ;;  %v5090_v47 = vld [vmem:[#allocation9 + $0x44] ss:$8 sps:$4 sm:$0xff]  }
 0x651   : > { %v1623_v54 = vpop.xlane.xlu0 %1622 }
 0x652   : > { %5334 = vrcp.f32 %v1623_v54  ;;  %2694 = vadd.xlane.f32.xlu0 %v6770_v4  ;;  %v5097_v54 = vld [vmem:[#allocation9 + $0x10] ss:$8 sps:$4 sm:$0xff]  }
 0x654   : > { %3214 = vadd.xlane.f32.xlu1 %v5325_v34  ;;  %v5082_v34 = vld [vmem:[#allocation9 + $0x60] ss:$8 sps:$4 sm:$0xff]  }
 0x655   : > { %v2685_v61 = vpop.xlane.xlu0 %2684 }
 0x656   : > { %5336 = vrcp.f32 %v2685_v61  ;;  %3204 = vadd.xlane.f32.xlu0 %v5313_v38  ;;  %v5099_v61 = vld [vmem:[#allocation9 + $0x14] ss:$8 sps:$4 sm:$0xff]  }
 0x659   : > { %v5333_v52 = vpop.eup %5332  ;;  %v2687_v31 = vpop.xlane.xlu0 %2686 }
 0x65a   : > { %5338 = vrcp.f32 %v2687_v31  ;;  %3200 = vadd.xlane.f32.xlu0 %v6990_v7  ;;  %v1770_v11 = vmul.f32 %v5333_v52, %v6790_v48  ;;  %v5100_v52 = vld [vmem:[#allocation9] ss:$8 sps:$4 sm:$0xff]   ;;  %v5102_v31 = vld [vmem:[#allocation9 + $0x4] ss:$8 sps:$4 sm:$0xff]  }
 0x65b   : > { %5340 = vrcp.f32 %v6828_v20 }
 0x65c   : > { %v4356_v9 = vpack.c.bf16 %v1770_v11, %v1770_v11 }
 0x65d   : > { %v2385_v44 = vpop.permute.xlu0 %2384 }
 0x65e   : > { %2430 = vst.msk [vmem:[#allocation2 + $0x18] sm:$0xf] %vm2426_vm2, %v2385_v44  ;;  %3212 = vadd.xlane.f32.xlu0 %v5323_v2  ;;  %v5106_v44 = vld [vmem:[#allocation9 + $0xe0] ss:$8 sps:$4 sm:$0xff]  }
 0x65f   : > { %1851 = vst.msk [vmem:[#allocation2 + $0x58] sm:$0xf] %vm1839_vm1, %v4356_v9  ;;  %v5335_v6 = vpop.eup %5334 }
 0x660   : > { %v1767_v4 = vmul.f32 %v5335_v6, %v6786_v1  ;;  %v5108_v6 = vld [vmem:[#allocation9 + $0xe4] ss:$8 sps:$4 sm:$0xff]  }
 0x662   : > { %3208 = vadd.xlane.f32.xlu0 %v5315_v13  ;;  %v4353_v0 = vpack.c.bf16 %v1767_v4, %v1767_v4 }
 0x663   : > { %v5337_v38 = vpop.eup %5336 }
 0x664   : > { %1848 = vst.msk [vmem:[#allocation2 + $0x40] sm:$0xf] %vm1839_vm1, %v4353_v0  ;;  %v2829_v58 = vmul.f32 %v5337_v38, %v6891_v37  ;;  %v5109_v38 = vld [vmem:[#allocation9 + $0xd0] ss:$8 sps:$4 sm:$0xff]  }
 0x666   : > { %3220 = vadd.xlane.f32.xlu0 %v5327_v32  ;;  %v4385_v7 = vpack.c.bf16 %v2829_v58, %v2829_v58  ;;  %v5084_v32 = vld [vmem:[#allocation9 + $0x64] ss:$8 sps:$4 sm:$0xff]   ;;  %v5111_v58 = vld [vmem:[#allocation9 + $0xd4] ss:$8 sps:$4 sm:$0xff]  }
 0x667   : > { %v5339_v48 = vpop.eup %5338 }
 0x668   : > { %2909 = vst.msk [vmem:[#allocation2 + $0x44] sm:$0xf] %vm1839_vm1, %v4385_v7  ;;  %v2830_v41 = vmul.f32 %v5339_v48, %v6895_v27  ;;  %v5341_v1 = vpop.eup %5340  ;;  %v5114_v7 = vld [vmem:[#allocation9 + $0xc4] ss:$8 sps:$4 sm:$0xff]  }
 0x669   : > { %v2321_v56 = vmul.f32 %v5341_v1, %v6830_v18 }
 0x66a   : > { %3216 = vadd.xlane.f32.xlu0 %v5329_v12  ;;  %v4386_v22 = vpack.c.bf16 %v2830_v41, %v2830_v41  ;;  %v5087_v12 = vld [vmem:[#allocation9 + $0x54] ss:$8 sps:$4 sm:$0xff]  }
 0x66b   : > { %v4368_v46 = vpack.c.bf16 %v2321_v56, %v2321_v56  ;;  %v5112_v56 = vld [vmem:[#allocation9 + $0xc0] ss:$8 sps:$4 sm:$0xff]  }
 0x66c   : > { %2910 = vst.msk [vmem:[#allocation2 + $0x4c] sm:$0xf] %vm1839_vm1, %v4386_v22 }
 0x680   : > { %v1633_v28 = vpop.xlane.xlu1 %1632  ;;  %2392 = vrot.lane.b32.xlu0 %v4368_v46, %s5594_s24 }
 0x681   : > { %5342 = vrcp.f32 %v1633_v28 }
 0x68e   : > { %v5343_v37 = vpop.eup %5342  ;;  %v1627_v21 = vpop.xlane.xlu0 %1626 }
 0x68f   : > { %5344 = vrcp.f32 %v1627_v21  ;;  %v1772_v23 = vmul.f32 %v5343_v37, %v6804_v24  ;;  %v5079_v24 = vld [vmem:[#allocation9 + $0x70] ss:$8 sps:$4 sm:$0xff]   ;;  %v5117_v21 = vld [vmem:[#allocation9 + $0xb4] ss:$8 sps:$4 sm:$0xff]  }
 0x690   : > { %v7026_v27 = vpop.xlane.xlu1 %3194  ;;  %3804 = vmatpush1.bf16.msra.mxu0 %v5079_v24 }
 0x691   : > { %v4358_v20 = vpack.c.bf16 %v1772_v23, %v1772_v23  ;;  %3805 = vmatprep.subr.bf16.mxu0 %v5084_v32 }
 0x692   : > { %v2689_v50 = vpop.xlane.xlu0 %2688 }
 0x693   : > { %5346 = vrcp.f32 %v2689_v50  ;;  %1853 = vst.msk [vmem:[#allocation2 + $0x68] sm:$0xf] %vm1839_vm1, %v4358_v20  ;;  %v5115_v20 = vld [vmem:[#allocation9 + $0xb0] ss:$8 sps:$4 sm:$0xff]  }
 0x694   : > { %v3191_v59 = vpop.xlane.xlu1 %3190  ;;  %3806 = vmatpush1.bf16.msra.mxu0 %v5082_v34 }
 0x695   : > { %3807 = vmatprep.subr.bf16.mxu0 %v5087_v12 }
 0x696   : > { %v2691_v40 = vpop.xlane.xlu0 %2690 }
 0x697   : > { %5348 = vrcp.f32 %v2691_v40 }
 0x698   : > { %v2391_v18 = vpop.permute.xlu1 %2390  ;;  %5350 = vrcp.f32 %v6871_v19 }
 0x699   : > { %2433 = vst.msk [vmem:[#allocation2 + $0x30] sm:$0xf] %vm2426_vm2, %v2391_v18  ;;  %5352 = vrcp.f32 %v7026_v27 }
 0x69a   : > { %v2389_v10 = vpop.permute.xlu0 %2388  ;;  %5354 = vrcp.f32 %v3191_v59 }
 0x69b   : > { %2432 = vst.msk [vmem:[#allocation2 + $0x28] sm:$0xf] %vm2426_vm2, %v2389_v10 }
 0x69c   : > { %v5345_v13 = vpop.eup %5344 }
 0x69d   : > { %v1769_v15 = vmul.f32 %v5345_v13, %v6784_v51  ;;  %v5120_v13 = vld [vmem:[#allocation9 + $0xa4] ss:$8 sps:$4 sm:$0xff]  }
 0x69f   : > { %1634 = vadd.xlane.f32.xlu0 %v7355_v3  ;;  %v4355_v30 = vpack.c.bf16 %v1769_v15, %v1769_v15  ;;  %v5118_v15 = vld [vmem:[#allocation9 + $0xa0] ss:$8 sps:$4 sm:$0xff]  }
 0x6a0   : > { %v5347_v49 = vpop.eup %5346 }
 0x6a1   : > { %1850 = vst.msk [vmem:[#allocation2 + $0x50] sm:$0xf] %vm1839_vm1, %v4355_v30  ;;  %v2831_v2 = vmul.f32 %v5347_v49, %v6889_v26  ;;  %v5085_v26 = vld [vmem:[#allocation9 + $0x50] ss:$8 sps:$4 sm:$0xff]  }
 0x6a2   : > { %3808 = vmatpush1.bf16.msra.mxu0 %v5085_v26  ;;  %v5126_v26 = vld [vmem:[#allocation9 + $0x84] ss:$8 sps:$4 sm:$0xff]  }
 0x6a3   : > { %2696 = vadd.xlane.f32.xlu0 %v6774_v33  ;;  %v4387_v17 = vpack.c.bf16 %v2831_v2, %v2831_v2  ;;  %v5088_v33 = vld [vmem:[#allocation9 + $0x40] ss:$8 sps:$4 sm:$0xff]   ;;  %3809 = vmatprep.subr.bf16.mxu0 %v5090_v47 }
 0x6a4   : > { %v5349_v53 = vpop.eup %5348 }
 0x6a5   : > { %2911 = vst.msk [vmem:[#allocation2 + $0x54] sm:$0xf] %vm1839_vm1, %v4387_v17  ;;  %v2832_v51 = vmul.f32 %v5349_v53, %v6893_v42  ;;  %v5091_v42 = vld [vmem:[#allocation9 + $0x30] ss:$8 sps:$4 sm:$0xff]   ;;  %v5123_v17 = vld [vmem:[#allocation9 + $0x94] ss:$8 sps:$4 sm:$0xff]  }
 0x6a6   : > { %3810 = vmatpush1.bf16.msra.mxu0 %v5088_v33  ;;  %v5124_v33 = vld [vmem:[#allocation9 + $0x80] ss:$8 sps:$4 sm:$0xff]  }
 0x6a7   : > { %2698 = vadd.xlane.f32.xlu0 %v6768_v63  ;;  %v4388_v43 = vpack.c.bf16 %v2832_v51, %v2832_v51  ;;  %v5351_v63 = vpop.eup %5350  ;;  %3811 = vmatprep.subr.bf16.mxu0 %v5093_v5 }
 0x6a8   : > { %v2324_v19 = vmul.f32 %v5351_v63, %v6838_v45  ;;  %v5103_v45 = vld [vmem:[#allocation9 + $0xf0] ss:$8 sps:$4 sm:$0xff]   ;;  %v5353_v48 = vpop.eup %5352 }
 0x6a9   : > { %2912 = vst.msk [vmem:[#allocation2 + $0x5c] sm:$0xf] %vm1839_vm1, %v4388_v43  ;;  %v5355_v46 = vpop.eup %5354 }
 0x6aa   : > { %3812 = vmatpush1.bf16.msra.mxu0 %v5091_v42  ;;  %v4371_v16 = vpack.c.bf16 %v2324_v19, %v2324_v19 }
 0x6ab   : > { %3813 = vmatprep.subr.bf16.mxu0 %v5096_v14 }
 0x6ae   : > { %3814 = vmatpush1.bf16.msra.mxu0 %v5094_v60 }
 0x6af   : > { %3815 = vmatprep.subr.bf16.mxu0 %v5099_v61 }
 0x6b2   : > { %3816 = vmatpush1.bf16.msra.mxu0 %v5097_v54 }
 0x6b3   : > { %3817 = vmatprep.subr.bf16.mxu0 %v5102_v31 }
 0x6b6   : > { %3818 = vmatpush1.bf16.msra.mxu0 %v5100_v52 }
 0x6b7   : > { %3819 = vmatprep.subr.bf16.mxu0 %v5105_v36 }
 0x6ba   : > { %3820 = vmatpush2.bf16.msra.mxu0 %v5103_v45 }
 0x6bb   : > { %3821 = vmatprep.subr.bf16.mxu0 %v5108_v6 }
 0x6bd   : > { %2396 = vrot.lane.b32.xlu0 %v4370_v39, %s5594_s24 }
 0x6be   : > { %3822 = vmatpush2.bf16.msra.mxu0 %v5106_v44 }
 0x6bf   : > { %3823 = vmatprep.subr.bf16.mxu0 %v5111_v58 }
 0x6c1   : > { %2398 = vrot.lane.b32.xlu0 %v4371_v16, %s5594_s24 }
 0x6c2   : > { %3824 = vmatpush2.bf16.msra.mxu0 %v5109_v38 }
 0x6c3   : > { %3825 = vmatprep.subr.bf16.mxu0 %v5114_v7 }
 0x6c6   : > { %3826 = vmatpush2.bf16.msra.mxu0 %v5112_v56 }
 0x6c7   : > { %3827 = vmatprep.subr.bf16.mxu0 %v5117_v21 }
 0x6c9   : > { %v3203_v11 = vpop.xlane.xlu1 %3202 }
 0x6ca   : > { %3828 = vmatpush2.bf16.msra.mxu0 %v5115_v20 }
 0x6cb   : > { %v1631_v9 = vpop.xlane.xlu0 %1630  ;;  %3829 = vmatprep.subr.bf16.mxu0 %v5120_v13 }
 0x6cc   : > { %5356 = vrcp.f32 %v1631_v9 }
 0x6cd   : > { %v3199_v4 = vpop.xlane.xlu1 %3198 }
 0x6ce   : > { %3830 = vmatpush2.bf16.msra.mxu0 %v5118_v15 }
 0x6cf   : > { %v2693_v0 = vpop.xlane.xlu0 %2692  ;;  %3831 = vmatprep.subr.bf16.mxu0 %v5123_v17 }
 0x6d0   : > { %5358 = vrcp.f32 %v2693_v0 }
 0x6d1   : > { %v4781_v41 = vpop.f32.mrf.mxu0  ;;  %v3211_v1 = vpop.xlane.xlu1 %3210 }
 0x6d2   : > { %v3377_v22 = vmul.f32 %v5353_v48, %v4781_v41 }
 0x6d3   : > { %v3312_v28 = vpop.f32.mrf.mxu0  ;;  %v3197_v37 = vpop.xlane.xlu0 %3196 }
 0x6d4   : > { %v4395_v23 = vpack.c.bf16 %v3377_v22, %v3377_v22  ;;  %v3375_v27 = vmul.f32 %v5355_v46, %v3312_v28  ;;  %5360 = vrcp.f32 %v3197_v37 }
 0x6d5   : > { %v4782_v50 = vpop.f32.mrf.mxu0  ;;  %v3207_v18 = vpop.xlane.xlu1 %3206 }
 0x6d6   : > { %3443 = vrot.lane.b32.xlu1 %v4395_v23, %s5594_s24  ;;  %v4393_v40 = vpack.c.bf16 %v3375_v27, %v3375_v27 }
 0x6d7   : > { %v3193_v59 = vpop.xlane.xlu0 %3192  ;;  %v3315_v8 = vpop.f32.mrf.mxu0 }
 0x6d8   : > { %5362 = vrcp.f32 %v3193_v59 }
 0x6d9   : > { %v5357_v10 = vpop.eup %5356  ;;  %5364 = vrcp.f32 %v3203_v11  ;;  %v3219_v53 = vpop.xlane.xlu1 %3218 }
 0x6da   : > { %5366 = vrcp.f32 %v6879_v35  ;;  %3439 = vrot.lane.b32.xlu1 %v4393_v40, %s5594_s24  ;;  %v1771_v24 = vmul.f32 %v5357_v10, %v6798_v55  ;;  %v5121_v35 = vld [vmem:[#allocation9 + $0x90] ss:$8 sps:$4 sm:$0xff]  }
 0x6db   : > { %5368 = vrcp.f32 %v3211_v1  ;;  %v2695_v3 = vpop.xlane.xlu0 %2694  ;;  %3832 = vmatpush2.bf16.msra.mxu0 %v5121_v35  ;;  %v7358_v35 = vld [vmem:[#allocation21_spill] sm:$0xff] }
 0x6dc   : > { %5370 = vrcp.f32 %v2695_v3  ;;  %v4357_v30 = vpack.c.bf16 %v1771_v24, %v1771_v24  ;;  %3833 = vmatprep.subr.bf16.mxu0 %v5126_v26  ;;  %v7356_v24 = vld [vmem:[#allocation27_spill] sm:$0xff] }
 0x6dd   : > { %v5359_v49 = vpop.eup %5358  ;;  %5372 = vrcp.f32 %v3199_v4  ;;  %v4785_v2 = vpop.f32.mrf.mxu0 }
 0x6de   : > { %5374 = vrcp.f32 %v3207_v18  ;;  %1852 = vst.msk [vmem:[#allocation2 + $0x60] sm:$0xf] %vm1839_vm1, %v4357_v30  ;;  %v2833_v51 = vmul.f32 %v5359_v49, %v6899_v29  ;;  %v3215_v63 = vpop.xlane.xlu1 %3214 }
 0x6df   : > { %v3328_v43 = vpop.f32.mrf.mxu0  ;;  %v3205_v55 = vpop.xlane.xlu0 %3204  ;;  %3834 = vmatpush2.bf16.msra.mxu0 %v5124_v33 }
 0x6e0   : > { %5376 = vrcp.f32 %v3205_v55  ;;  %v4389_v34 = vpack.c.bf16 %v2833_v51, %v2833_v51  ;;  %v7359_v51 = vld [vmem:[#allocation31_spill] sm:$0xff] }
 0x6e1   : > { %v5361_v32 = vpop.eup %5360  ;;  %v4786_v47 = vpop.f32.mrf.mxu0 }
 0x6e2   : > { %v3378_v12 = vmul.f32 %v5361_v32, %v4782_v50  ;;  %2913 = vst.msk [vmem:[#allocation2 + $0x64] sm:$0xf] %vm1839_vm1, %v4389_v34  ;;  %v7360_v34 = vld [vmem:[#allocation30_spill] sm:$0xff] }
 0x6e3   : > { %v3201_v42 = vpop.xlane.xlu0 %3200  ;;  %v3331_v16 = vpop.f32.mrf.mxu0 }
 0x6e4   : > { %v4396_v5 = vpack.c.bf16 %v3378_v12, %v3378_v12  ;;  %5378 = vrcp.f32 %v3201_v42 }
 0x6e5   : > { %v5363_v39 = vpop.eup %5362  ;;  %5380 = vrcp.f32 %v6877_v25 }
 0x6e6   : > { %v5365_v29 = vpop.eup %5364  ;;  %3445 = vrot.lane.b32.xlu1 %v4396_v5, %s5594_s24  ;;  %v3376_v19 = vmul.f32 %v5363_v39, %v3315_v8  ;;  %5382 = vrcp.f32 %v3215_v63 }
 0x6e7   : > { %v5367_v60 = vpop.eup %5366  ;;  %v3381_v14 = vmul.f32 %v5365_v29, %v4785_v2  ;;  %v3213_v54 = vpop.xlane.xlu0 %3212  ;;  %v7361_v29 = vld [vmem:[#allocation29_spill] sm:$0xff] }
 0x6e8   : > { %v5369_v61 = vpop.eup %5368  ;;  %5384 = vrcp.f32 %v3213_v54  ;;  %v4394_v52 = vpack.c.bf16 %v3376_v19, %v3376_v19  ;;  %v2326_v0 = vmul.f32 %v5367_v60, %v6849_v62 }
 0x6e9   : > { %v5371_v31 = vpop.eup %5370  ;;  %v4789_v45 = vpop.f32.mrf.mxu0  ;;  %v4399_v44 = vpack.c.bf16 %v3381_v14, %v3381_v14  ;;  %5386 = vrcp.f32 %v3219_v53  ;;  %v7357_v53 = vld [vmem:[#allocation20_spill] sm:$0xff] }
 0x6ea   : > { %v5373_v36 = vpop.eup %5372  ;;  %v3385_v11 = vmul.f32 %v5369_v61, %v4789_v45  ;;  %3441 = vrot.lane.b32.xlu1 %v4394_v52, %s5594_s24  ;;  %v2834_v25 = vmul.f32 %v5371_v31, %v6903_v57  ;;  %v4373_v28 = vpack.c.bf16 %v2326_v0, %v2326_v0  ;;  %5388 = vrcp.f32 %v7357_v53  ;;  %v7364_v0 = vld [vmem:[#allocation17_spill] sm:$0xff] }
 0x6eb   : > { %v5375_v9 = vpop.eup %5374  ;;  %v3344_v6 = vpop.f32.mrf.mxu0  ;;  %v3379_v38 = vmul.f32 %v5373_v36, %v3328_v43  ;;  %v7363_v36 = vld [vmem:[#allocation18_spill] sm:$0xff] }
 0x6ec   : > { %v3209_v4 = vpop.xlane.xlu0 %3208  ;;  %v4403_v58 = vpack.c.bf16 %v3385_v11, %v3385_v11  ;;  %v3383_v7 = vmul.f32 %v5375_v9, %v3344_v6  ;;  %v4390_v48 = vpack.c.bf16 %v2834_v25, %v2834_v25 }
 0x6ed   : > { %v5377_v41 = vpop.eup %5376  ;;  %v4790_v22 = vpop.f32.mrf.mxu0  ;;  %v4397_v56 = vpack.c.bf16 %v3379_v38, %v3379_v38  ;;  %5390 = vrcp.f32 %v3209_v4 }
 0x6ee   : > { %3459 = vrot.lane.b32.xlu0 %v4403_v58, %s5594_s24  ;;  %3451 = vrot.lane.b32.xlu1 %v4399_v44, %s5594_s24  ;;  %2914 = vst.msk [vmem:[#allocation2 + $0x6c] sm:$0xf] %vm1839_vm1, %v4390_v48  ;;  %v3382_v46 = vmul.f32 %v5377_v41, %v4786_v47  ;;  %5392 = vrcp.f32 %v7359_v51  ;;  %v4401_v42 = vpack.c.bf16 %v3383_v7, %v3383_v7  ;;  %v7365_v48 = vld [vmem:[#allocation22_spill] sm:$0xff] }
 0x6ef   : > { %v3347_v57 = vpop.f32.mrf.mxu0  ;;  %v4374_v41 = vpack.c.bf16 %v7365_v48, %v7365_v48 }
 0x6f0   : > { %v3221_v1 = vpop.xlane.xlu0 %3220  ;;  %v4400_v20 = vpack.c.bf16 %v3382_v46, %v3382_v46  ;;  %v7366_v46 = vld [vmem:[#allocation25_spill] sm:$0xff] }
 0x6f1   : > { %v5379_v37 = vpop.eup %5378 }
 0x6f2   : > { %2402 = vrot.lane.b32.xlu0 %v4373_v28, %s5594_s24  ;;  %v4793_v62 = vpop.f32.mrf.mxu0  ;;  %3447 = vrot.lane.b32.xlu1 %v4397_v56, %s5594_s24  ;;  %v5381_v21 = vpop.eup %5380  ;;  %v3380_v59 = vmul.f32 %v5379_v37, %v3331_v16  ;;  %v7362_v16 = vld [vmem:[#allocation19_spill] sm:$0xff]  ;;  %v4376_v28 = vpack.c.bf16 %v7366_v46, %v7366_v46 }
 0x6f3   : > { %v5383_v27 = vpop.eup %5382  ;;  %v2328_v8 = vmul.f32 %v5381_v21, %v7356_v24 }
 0x6f4   : > { %v3217_v23 = vpop.xlane.xlu0 %3216  ;;  %v3360_v50 = vpop.f32.mrf.mxu0  ;;  %v4398_v3 = vpack.c.bf16 %v3380_v59, %v3380_v59 }
 0x6f5   : > { %v5385_v40 = vpop.eup %5384  ;;  %v3387_v18 = vmul.f32 %v5383_v27, %v3360_v50  ;;  %v4375_v2 = vpack.c.bf16 %v2328_v8, %v2328_v8 }
 0x6f6   : > { %v3386_v10 = vmul.f32 %v5385_v40, %v4790_v22  ;;  %3453 = vrot.lane.b32.xlu1 %v4400_v20, %s5594_s24  ;;  %v5387_v30 = vpop.eup %5386  ;;  %v4794_v25 = vpop.f32.mrf.mxu0 }
 0x6f7   : > { %v4405_v13 = vpack.c.bf16 %v3387_v18, %v3387_v18  ;;  %v3389_v49 = vmul.f32 %v5387_v30, %v4793_v62  ;;  %v5389_v43 = vpop.eup %5388  ;;  %v5127_v18 = vld [vmem:[#allocation2] ss:$8 sps:$4 sm:$0xff]  }
 0x6f8   : > { %v2393_v15 = vpop.permute.xlu0 %2392  ;;  %v2322_v32 = vmul.f32 %v5389_v43, %v7360_v34  ;;  %v4404_v44 = vpack.c.bf16 %v3386_v10, %v3386_v10  ;;  %v3363_v58 = vpop.f32.mrf.mxu0 }
 0x6f9   : > { %2434 = vst.msk [vmem:[#allocation2 + $0x38] sm:$0xf] %vm2426_vm2, %v2393_v15  ;;  %3463 = vrot.lane.b32.xlu0 %v4405_v13, %s5594_s24  ;;  %v4407_v17 = vpack.c.bf16 %v3389_v49, %v3389_v49 }
 0x6fa   : > { %3449 = vrot.lane.b32.xlu1 %v4398_v3, %s5594_s24  ;;  %v4369_v12 = vpack.c.bf16 %v2322_v32, %v2322_v32  ;;  %v5391_v33 = vpop.eup %5390 }
 0x6fb   : > { %v3384_v5 = vmul.f32 %v5391_v33, %v3347_v57  ;;  %v5393_v63 = vpop.eup %5392  ;;  %v7367_v33 = vld [vmem:[#allocation32_spill] sm:$0xff] }
 0x6fc   : > { %v2325_v19 = vmul.f32 %v5393_v63, %v7361_v29 }
 0x6fd   : > { %2406 = vrot.lane.b32.xlu0 %v4375_v2, %s5594_s24  ;;  %v4402_v60 = vpack.c.bf16 %v3384_v5, %v3384_v5 }
 0x6fe   : > { %v4372_v52 = vpack.c.bf16 %v2325_v19, %v2325_v19 }
 0x700   : > { %v5137_v43 = vld [vmem:[#allocation2 + $0x30] ss:$8 sps:$4 sm:$0xff]  }
 0x701   : > { %3467 = vrot.lane.b32.xlu0 %v4407_v17, %s5594_s24 }
 0x71e   : > { %1636 = vadd.xlane.f32.xlu1 %v7358_v35  ;;  %v5134_v35 = vld [vmem:[#allocation2 + $0x20] ss:$8 sps:$4 sm:$0xff]  }
 0x728   : > { %v1635_v55 = vpop.xlane.xlu0 %1634 }
 0x729   : > { %5394 = vrcp.f32 %v1635_v55 }
 0x72c   : > { %v2697_v26 = vpop.xlane.xlu0 %2696 }
 0x72d   : > { %5396 = vrcp.f32 %v2697_v26 }
 0x72e   : > { %5398 = vrcp.f32 %v3217_v23 }
 0x72f   : > { %2394 = vrot.lane.b32.xlu1 %v4369_v12, %s5594_s24 }
 0x730   : > { %v2699_v47 = vpop.xlane.xlu0 %2698 }
 0x731   : > { %5400 = vrcp.f32 %v2699_v47 }
 0x732   : > { %5402 = vrcp.f32 %v3221_v1 }
 0x733   : > { %3455 = vrot.lane.b32.xlu1 %v4401_v42, %s5594_s24 }
 0x734   : > { %v2397_v39 = vpop.permute.xlu0 %2396 }
 0x735   : > { %2436 = vst.msk [vmem:[#allocation2 + $0x48] sm:$0xf] %vm2426_vm2, %v2397_v39 }
 0x736   : > { %v5395_v14 = vpop.eup %5394 }
 0x737   : > { %3457 = vrot.lane.b32.xlu1 %v4402_v60, %s5594_s24  ;;  %v1773_v54 = vmul.f32 %v5395_v14, %v7362_v16 }
 0x738   : > { %v2399_v61 = vpop.permute.xlu0 %2398 }
 0x739   : > { %2437 = vst.msk [vmem:[#allocation2 + $0x50] sm:$0xf] %vm2426_vm2, %v2399_v61  ;;  %v4359_v31 = vpack.c.bf16 %v1773_v54, %v1773_v54 }
 0x73a   : > { %v5397_v45 = vpop.eup %5396 }
 0x73b   : > { %2400 = vrot.lane.b32.xlu1 %v4372_v52, %s5594_s24  ;;  %1854 = vst.msk [vmem:[#allocation2 + $0x70] sm:$0xf] %vm1839_vm1, %v4359_v31  ;;  %v2835_v11 = vmul.f32 %v5397_v45, %v7363_v36  ;;  %v5399_v9 = vpop.eup %5398 }
 0x73c   : > { %v3388_v7 = vmul.f32 %v5399_v9, %v3363_v58 }
 0x73d   : > { %v4391_v6 = vpack.c.bf16 %v2835_v11, %v2835_v11  ;;  %v3551_v11 = vld [vmem:[%s7253_s4] sm:$0x3] }
 0x73e   : > { %v5401_v4 = vpop.eup %5400  ;;  %v4406_v57 = vpack.c.bf16 %v3388_v7, %v3388_v7 }
 0x73f   : > { %3461 = vrot.lane.b32.xlu1 %v4404_v44, %s5594_s24  ;;  %2915 = vst.msk [vmem:[#allocation2 + $0x74] sm:$0xf] %vm1839_vm1, %v4391_v6  ;;  %v2836_v38 = vmul.f32 %v5401_v4, %v7364_v0  ;;  %v5403_v1 = vpop.eup %5402 }
 0x740   : > { %v3390_v37 = vmul.f32 %v5403_v1, %v4794_v25  ;;  %v7368_v25 = vld [vmem:[#allocation16_spill] sm:$0xff] }
 0x741   : > { %v4392_v22 = vpack.c.bf16 %v2836_v38, %v2836_v38  ;;  %v7369_v9 = vsub.s32 0, %v7368_v25  ;;  %v7370_v6 = vsub.s32 1, %v7368_v25 }
 0x742   : > { %v4408_v21 = vpack.c.bf16 %v3390_v37, %v3390_v37 }
 0x743   : > { %2404 = vrot.lane.b32.xlu1 %v4374_v41, %s5594_s24  ;;  %2916 = vst.msk [vmem:[#allocation2 + $0x7c] sm:$0xf] %vm1839_vm1, %v4392_v22  ;;  %v7127_v44 = vrot.slane %v3551_v11, %v7369_v9  ;;  %v7131_v4 = vrot.slane %v3551_v11, %v7370_v6 }
 0x747   : > { %3465 = vrot.lane.b32.xlu1 %v4406_v57, %s5594_s24 }
 0x748   : > { %v3444_v56 = vpop.permute.xlu1 %3443 }
 0x749   : > { %3489 = vst.msk [vmem:[#allocation2 + $0x14] sm:$0xf] %vm2426_vm2, %v3444_v56 }
 0x74b   : > { %2408 = vrot.lane.b32.xlu1 %v4376_v28, %s5594_s24 }
 0x74c   : > { %v3440_v62 = vpop.permute.xlu1 %3439 }
 0x74d   : > { %3487 = vst.msk [vmem:[#allocation2 + $0x4] sm:$0xf] %vm2426_vm2, %v3440_v62 }
 0x74f   : > { %3469 = vrot.lane.b32.xlu1 %v4408_v21, %s5594_s24 }
 0x750   : > { %v3505_v3 = vld [vmem:[#allocation2 + $0x10] sm:$0xff] }
 0x758   : > { %v3446_v23 = vpop.permute.xlu1 %3445 }
 0x759   : > { %3490 = vst.msk [vmem:[#allocation2 + $0x1c] sm:$0xf] %vm2426_vm2, %v3446_v23 }
 0x75c   : > { %v3442_v27 = vpop.permute.xlu1 %3441 }
 0x75d   : > { %3488 = vst.msk [vmem:[#allocation2 + $0xc] sm:$0xf] %vm2426_vm2, %v3442_v27 }
 0x760   : > { %v3452_v20 = vpop.permute.xlu1 %3451  ;;  %v3460_v50 = vpop.permute.xlu0 %3459  ;;  %v5130_v13 = vld [vmem:[#allocation2 + $0x14] ss:$8 sps:$4 sm:$0xff]  }
 0x761   : > { %3493 = vst.msk [vmem:[#allocation2 + $0x34] sm:$0xf] %vm2426_vm2, %v3452_v20  ;;  %3497 = vst.msk [vmem:[#allocation2 + $0x54] sm:$0xf] %vm2426_vm2, %v3460_v50  ;;  %v3506_v24 = vld [vmem:[#allocation2 + $0x18] sm:$0xff] }
 0x762   : > { %v4291_v49 = vcombine.low %v3505_v3, %v3506_v24 }
 0x764   : > { %v3448_v59 = vpop.permute.xlu1 %3447  ;;  %v2403_v40 = vpop.permute.xlu0 %2402  ;;  %v5129_v10 = vld [vmem:[#allocation2 + $0x4] ss:$8 sps:$4 sm:$0xff]  }
 0x765   : > { %3491 = vst.msk [vmem:[#allocation2 + $0x24] sm:$0xf] %vm2426_vm2, %v3448_v59  ;;  %2439 = vst.msk [vmem:[#allocation2 + $0x60] sm:$0xf] %vm2426_vm2, %v2403_v40  ;;  %3835 = vmatprep.mubr.bf16.mxu0 %v5129_v10 }
 0x766   : > { %3836 = vmatmul.mubr.bf16.vlgmr.msra.gmra.mxu0 %v5127_v18 }
 0x767   : > { %3845 = vmatprep.mubr.bf16.mxu0 %v5130_v13 }
 0x768   : > { %v3454_v15 = vpop.permute.xlu1 %3453 }
 0x769   : > { %3494 = vst.msk [vmem:[#allocation2 + $0x3c] sm:$0xf] %vm2426_vm2, %v3454_v15 }
 0x76b   : > { %v3464_v8 = vpop.permute.xlu0 %3463 }
 0x76c   : > { %3499 = vst.msk [vmem:[#allocation2 + $0x64] sm:$0xf] %vm2426_vm2, %v3464_v8  ;;  %v3450_v30 = vpop.permute.xlu1 %3449 }
 0x76d   : > { %3492 = vst.msk [vmem:[#allocation2 + $0x2c] sm:$0xf] %vm2426_vm2, %v3450_v30 }
 0x76e   : > { %3846 = vmatmul.mubr.bf16.gmra.mxu0 %v4291_v49 }
 0x76f   : > { %v2407_v2 = vpop.permute.xlu0 %2406 }
 0x770   : > { %2441 = vst.msk [vmem:[#allocation2 + $0x70] sm:$0xf] %vm2426_vm2, %v2407_v2  ;;  %v5135_v51 = vld [vmem:[#allocation2 + $0x34] ss:$8 sps:$4 sm:$0xff]  }
 0x773   : > { %v3468_v17 = vpop.permute.xlu0 %3467 }
 0x774   : > { %3501 = vst.msk [vmem:[#allocation2 + $0x74] sm:$0xf] %vm2426_vm2, %v3468_v17  ;;  %v5132_v53 = vld [vmem:[#allocation2 + $0x24] ss:$8 sps:$4 sm:$0xff]  }
 0x775   : > { %3855 = vmatprep.mubr.bf16.mxu0 %v5132_v53 }
 0x776   : > { %3856 = vmatmul.mubr.bf16.gmra.mxu0 %v5134_v35 }
 0x777   : > { %3865 = vmatprep.mubr.bf16.mxu0 %v5135_v51 }
 0x77e   : > { %3866 = vmatmul.mubr.bf16.gmra.mxu0 %v5137_v43 }
 0x7a7   : > { %v1637_v55 = vpop.xlane.xlu1 %1636 }
 0x7a8   : > { %5404 = vrcp.f32 %v1637_v55 }
 0x7ab   : > { %v2395_v34 = vpop.permute.xlu1 %2394 }
 0x7ac   : > { %2435 = vst.msk [vmem:[#allocation2 + $0x40] sm:$0xf] %vm2426_vm2, %v2395_v34 }
 0x7af   : > { %v3456_v32 = vpop.permute.xlu1 %3455 }
 0x7b0   : > { %3495 = vst.msk [vmem:[#allocation2 + $0x44] sm:$0xf] %vm2426_vm2, %v3456_v32 }
 0x7b3   : > { %v3458_v26 = vpop.permute.xlu1 %3457  ;;  %v5140_v29 = vld [vmem:[#allocation2 + $0x40] ss:$8 sps:$4 sm:$0xff]  }
 0x7b4   : > { %3496 = vst.msk [vmem:[#allocation2 + $0x4c] sm:$0xf] %vm2426_vm2, %v3458_v26 }
 0x7b5   : > { %v5405_v12 = vpop.eup %5404 }
 0x7b6   : > { %v1774_v47 = vmul.f32 %v5405_v12, %v7367_v33 }
 0x7b7   : > { %v2401_v42 = vpop.permute.xlu1 %2400 }
 0x7b8   : > { %2438 = vst.msk [vmem:[#allocation2 + $0x58] sm:$0xf] %vm2426_vm2, %v2401_v42  ;;  %v4360_v5 = vpack.c.bf16 %v1774_v47, %v1774_v47 }
 0x7ba   : > { %1855 = vst.msk [vmem:[#allocation2 + $0x78] sm:$0xf] %vm1839_vm1, %v4360_v5 }
 0x7bb   : > { %v3462_v63 = vpop.permute.xlu1 %3461  ;;  %v5138_v39 = vld [vmem:[#allocation2 + $0x44] ss:$8 sps:$4 sm:$0xff]  }
 0x7bc   : > { %3498 = vst.msk [vmem:[#allocation2 + $0x5c] sm:$0xf] %vm2426_vm2, %v3462_v63  ;;  %3875 = vmatprep.mubr.bf16.mxu0 %v5138_v39 }
 0x7bd   : > { %3876 = vmatmul.mubr.bf16.gmra.mxu0 %v5140_v29 }
 0x7bf   : > { %v2405_v19 = vpop.permute.xlu1 %2404  ;;  %v5143_v16 = vld [vmem:[#allocation2 + $0x50] ss:$8 sps:$4 sm:$0xff]  }
 0x7c0   : > { %2440 = vst.msk [vmem:[#allocation2 + $0x68] sm:$0xf] %vm2426_vm2, %v2405_v19 }
 0x7c3   : > { %v3466_v60 = vpop.permute.xlu1 %3465  ;;  %v5141_v14 = vld [vmem:[#allocation2 + $0x54] ss:$8 sps:$4 sm:$0xff]  }
 0x7c4   : > { %3500 = vst.msk [vmem:[#allocation2 + $0x6c] sm:$0xf] %vm2426_vm2, %v3466_v60  ;;  %3885 = vmatprep.mubr.bf16.mxu0 %v5141_v14 }
 0x7c5   : > { %3886 = vmatmul.mubr.bf16.gmra.mxu0 %v5143_v16 }
 0x7c7   : > { %v2409_v54 = vpop.permute.xlu1 %2408  ;;  %v5146_v31 = vld [vmem:[#allocation2 + $0x60] ss:$8 sps:$4 sm:$0xff]  }
 0x7c8   : > { %2442 = vst.msk [vmem:[#allocation2 + $0x78] sm:$0xf] %vm2426_vm2, %v2409_v54 }
 0x7cb   : > { %v3470_v61 = vpop.permute.xlu1 %3469  ;;  %v5144_v52 = vld [vmem:[#allocation2 + $0x64] ss:$8 sps:$4 sm:$0xff]  }
 0x7cc   : > { %3502 = vst.msk [vmem:[#allocation2 + $0x7c] sm:$0xf] %vm2426_vm2, %v3470_v61  ;;  %3895 = vmatprep.mubr.bf16.mxu0 %v5144_v52 }
 0x7cd   : > { %3896 = vmatmul.mubr.bf16.gmra.mxu0 %v5146_v31 }
 0x7cf   : > { %v5149_v36 = vld [vmem:[#allocation2 + $0x70] ss:$8 sps:$4 sm:$0xff]  }
 0x7d3   : > { %v5147_v45 = vld [vmem:[#allocation2 + $0x74] ss:$8 sps:$4 sm:$0xff]  }
 0x7d4   : > { %3905 = vmatprep.mubr.bf16.mxu0 %v5147_v45 }
 0x7d5   : > { %3906 = vmatmul.mubr.bf16.gmra.mxu0 %v5149_v36 }
 0x826   : > { %v3837_v0 = vpop.f32.mrf.mxu0 }
 0x827   : > { %v3838_v38 = vadd.f32 %v3837_v0, %v7127_v44 }
 0x828   : > { %v3839_v58 = vpop.f32.mrf.mxu0 }
 0x829   : > { %3916 = vst [vmem:[%s7134_s17] sm:$0xff] %v3838_v38  ;;  %v3840_v7 = vadd.f32 %v3839_v58, %v7131_v4 }
 0x82a   : > { %v3841_v48 = vpop.f32.mrf.mxu0 }
 0x82b   : > { %3917 = vst [vmem:[%s7134_s17 + $0x8] sm:$0xff] %v3840_v7  ;;  %v3842_v41 = vadd.f32 %v3841_v48, %v7127_v44 }
 0x82c   : > { %v3843_v22 = vpop.f32.mrf.mxu0 }
 0x82d   : > { %3918 = vst [vmem:[%s7134_s17 + $0x10] sm:$0xff] %v3842_v41  ;;  %v3844_v57 = vadd.f32 %v3843_v22, %v7131_v4 }
 0x82e   : > { %v3847_v1 = vpop.f32.mrf.mxu0 }
 0x82f   : > { %3919 = vst [vmem:[%s7134_s17 + $0x18] sm:$0xff] %v3844_v57  ;;  %v3848_v56 = vadd.f32 %v3847_v1, %v7127_v44 }
 0x830   : > { %v3849_v46 = vpop.f32.mrf.mxu0 }
 0x831   : > { %3920 = vst [vmem:[%s7134_s17 + $0x20] sm:$0xff] %v3848_v56  ;;  %v3850_v28 = vadd.f32 %v3849_v46, %v7131_v4 }
 0x832   : > { %v3851_v37 = vpop.f32.mrf.mxu0 }
 0x833   : > { %3921 = vst [vmem:[%s7134_s17 + $0x28] sm:$0xff] %v3850_v28  ;;  %v3852_v62 = vadd.f32 %v3851_v37, %v7127_v44 }
 0x834   : > { %v3853_v21 = vpop.f32.mrf.mxu0 }
 0x835   : > { %3922 = vst [vmem:[%s7134_s17 + $0x30] sm:$0xff] %v3852_v62  ;;  %v3854_v23 = vadd.f32 %v3853_v21, %v7131_v4 }
 0x836   : > { %v3857_v27 = vpop.f32.mrf.mxu0 }
 0x837   : > { %3923 = vst [vmem:[%s7134_s17 + $0x38] sm:$0xff] %v3854_v23  ;;  %v3858_v20 = vadd.f32 %v3857_v27, %v7127_v44 }
 0x838   : > { %v3859_v50 = vpop.f32.mrf.mxu0 }
 0x839   : > { %3924 = vst [vmem:[%s7134_s17 + $0x40] sm:$0xff] %v3858_v20  ;;  %v3860_v59 = vadd.f32 %v3859_v50, %v7131_v4 }
 0x83a   : > { %v3861_v40 = vpop.f32.mrf.mxu0 }
 0x83b   : > { %3925 = vst [vmem:[%s7134_s17 + $0x48] sm:$0xff] %v3860_v59  ;;  %v3862_v18 = vadd.f32 %v3861_v40, %v7127_v44 }
 0x83c   : > { %v3863_v10 = vpop.f32.mrf.mxu0 }
 0x83d   : > { %3926 = vst [vmem:[%s7134_s17 + $0x50] sm:$0xff] %v3862_v18  ;;  %v3864_v13 = vadd.f32 %v3863_v10, %v7131_v4 }
 0x83e   : > { %v3867_v15 = vpop.f32.mrf.mxu0 }
 0x83f   : > { %3927 = vst [vmem:[%s7134_s17 + $0x58] sm:$0xff] %v3864_v13  ;;  %v3868_v24 = vadd.f32 %v3867_v15, %v7127_v44 }
 0x840   : > { %v3869_v8 = vpop.f32.mrf.mxu0 }
 0x841   : > { %3928 = vst [vmem:[%s7134_s17 + $0x60] sm:$0xff] %v3868_v24  ;;  %v3870_v3 = vadd.f32 %v3869_v8, %v7131_v4 }
 0x842   : > { %v3871_v30 = vpop.f32.mrf.mxu0 }
 0x843   : > { %3929 = vst [vmem:[%s7134_s17 + $0x68] sm:$0xff] %v3870_v3  ;;  %v3872_v49 = vadd.f32 %v3871_v30, %v7127_v44 }
 0x844   : > { %v3873_v2 = vpop.f32.mrf.mxu0 }
 0x845   : > { %3930 = vst [vmem:[%s7134_s17 + $0x70] sm:$0xff] %v3872_v49  ;;  %v3874_v17 = vadd.f32 %v3873_v2, %v7131_v4 }
 0x847   : > { %3931 = vst [vmem:[%s7134_s17 + $0x78] sm:$0xff] %v3874_v17 }
 0x87d   : > { %v3877_v53 = vpop.f32.mrf.mxu0 }
 0x87e   : > { %v3878_v35 = vadd.f32 %v3877_v53, %v7127_v44 }
 0x87f   : > { %v3879_v51 = vpop.f32.mrf.mxu0 }
 0x880   : > { %3932 = vst [vmem:[%s7134_s17 + $0x80] sm:$0xff] %v3878_v35  ;;  %v3880_v43 = vadd.f32 %v3879_v51, %v7131_v4 }
 0x881   : > { %v3881_v55 = vpop.f32.mrf.mxu0 }
 0x882   : > { %3933 = vst [vmem:[%s7134_s17 + $0x88] sm:$0xff] %v3880_v43  ;;  %v3882_v34 = vadd.f32 %v3881_v55, %v7127_v44 }
 0x883   : > { %v3883_v32 = vpop.f32.mrf.mxu0 }
 0x884   : > { %3934 = vst [vmem:[%s7134_s17 + $0x90] sm:$0xff] %v3882_v34  ;;  %v3884_v26 = vadd.f32 %v3883_v32, %v7131_v4 }
 0x885   : > { %v3887_v12 = vpop.f32.mrf.mxu0 }
 0x886   : > { %3935 = vst [vmem:[%s7134_s17 + $0x98] sm:$0xff] %v3884_v26  ;;  %v3888_v33 = vadd.f32 %v3887_v12, %v7127_v44 }
 0x887   : > { %v3889_v47 = vpop.f32.mrf.mxu0 }
 0x888   : > { %3936 = vst [vmem:[%s7134_s17 + $0xa0] sm:$0xff] %v3888_v33  ;;  %v3890_v42 = vadd.f32 %v3889_v47, %v7131_v4 }
 0x889   : > { %v3891_v5 = vpop.f32.mrf.mxu0 }
 0x88a   : > { %3937 = vst [vmem:[%s7134_s17 + $0xa8] sm:$0xff] %v3890_v42  ;;  %v3892_v63 = vadd.f32 %v3891_v5, %v7127_v44 }
 0x88b   : > { %v3893_v39 = vpop.f32.mrf.mxu0 }
 0x88c   : > { %3938 = vst [vmem:[%s7134_s17 + $0xb0] sm:$0xff] %v3892_v63  ;;  %v3894_v29 = vadd.f32 %v3893_v39, %v7131_v4 }
 0x88d   : > { %v3897_v19 = vpop.f32.mrf.mxu0 }
 0x88e   : > { %3939 = vst [vmem:[%s7134_s17 + $0xb8] sm:$0xff] %v3894_v29  ;;  %v3898_v60 = vadd.f32 %v3897_v19, %v7127_v44 }
 0x88f   : > { %v3899_v14 = vpop.f32.mrf.mxu0 }
 0x890   : > { %3940 = vst [vmem:[%s7134_s17 + $0xc0] sm:$0xff] %v3898_v60  ;;  %v3900_v16 = vadd.f32 %v3899_v14, %v7131_v4 }
 0x891   : > { %v3901_v54 = vpop.f32.mrf.mxu0 }
 0x892   : > { %3941 = vst [vmem:[%s7134_s17 + $0xc8] sm:$0xff] %v3900_v16  ;;  %v3902_v61 = vadd.f32 %v3901_v54, %v7127_v44 }
 0x893   : > { %v3903_v52 = vpop.f32.mrf.mxu0 }
 0x894   : > { %3942 = vst [vmem:[%s7134_s17 + $0xd0] sm:$0xff] %v3902_v61  ;;  %v3904_v31 = vadd.f32 %v3903_v52, %v7131_v4 }
 0x895   : > { %v3907_v45 = vpop.f32.mrf.mxu0 }
 0x896   : > { %3943 = vst [vmem:[%s7134_s17 + $0xd8] sm:$0xff] %v3904_v31  ;;  %v3908_v36 = vadd.f32 %v3907_v45, %v7127_v44 }
 0x897   : > { %v3909_v11 = vpop.f32.mrf.mxu0 }
 0x898   : > { %3944 = vst [vmem:[%s7134_s17 + $0xe0] sm:$0xff] %v3908_v36  ;;  %v3910_v25 = vadd.f32 %v3909_v11, %v7131_v4 }
 0x899   : > { %v3911_v9 = vpop.f32.mrf.mxu0 }
 0x89a   : > { %3945 = vst [vmem:[%s7134_s17 + $0xe8] sm:$0xff] %v3910_v25  ;;  %v3912_v6 = vadd.f32 %v3911_v9, %v7127_v44 }
 0x89b   : > { %v3913_v0 = vpop.f32.mrf.mxu0 }
 0x89c   : > { %3946 = vst [vmem:[%s7134_s17 + $0xf0] sm:$0xff] %v3912_v6  ;;  %v3914_v38 = vadd.f32 %v3913_v0, %v7131_v4 }
 0x89e   : > { %3947 = vst [vmem:[%s7134_s17 + $0xf8] sm:$0xff] %v3914_v38 }
 0x89f   : > { %5525 = shalt.err (!%p5522_p9)
}
 0x8a0   : > { %s5526_s13 = scalar_lea.hbm %s7201_s16, 4096  ;;  %s5530_s27 = scalar_lea.hbm %s7254_s5, 8192 }
 0x8a1   : > { %p5527_p1 = scmp.ne.s32.totalorder %s7201_s16, %s5526_s13  ;;  %p5531_p11 = scmp.lt.s32.totalorder %s7201_s16, %s7254_s5 }
 0x8a2   : > { %p5532_p13 = scmp.lt.s32.totalorder %s5530_s27, %s5526_s13 }
 0x8a3   : > { %p5528_p8 = pnand %p5527_p1, %p7371_p6 }
 0x8a4   : > { %p5533_p2 = por %p5532_p13, %p5531_p11 }
 0x8a5   : > { %p5529_p10 = pneg %p5528_p8 }
 0x8a7   : > { %p5534_p4 = pnand %p5533_p2, %p5529_p10 }
 0x8a9   : > { %5537 = shalt.err (!%p5534_p4)
}
 0x8aa   : > { %s5596_s28 = smov 256   ;;  %s5597_s14 = smov 16  }
 0x8ab   : > { %4841 = dma.vmem_to_hbm [thread:$0]  (%p7371_p6), %s7203_s30, 4096, %s7201_s16, %s3949_s22, %s5596_s28, %s5596_s28, %s5597_s14  }
 0x8ac PF: > { %s3978_s11 = sand.u32 1, %s5572_s18   ;;  %p7372_p12 = scmp.ne.s32.totalorder %s7283_s25, 0 }
 0x8ad   : > { %p7373_p0 = scmp.ge.s32.totalorder %s5584_s21, 2  ;;  %s3979_s9 = scalar_lea.sflag [#allocation5], %s3978_s11 }
 0x8af   : > { %p4858_p5 = pnand %p7373_p0, %p7372_p12 }
 0x8b1   : > { %p4859_p3 = pneg %p4858_p5 }
 0x8b3   : > { %5567 = dma.done.wait (%p4859_p3), %s3979_s9, 4096  }
 0x8b4   : > { %5569 = vsyncadd (%p4859_p3), %s3979_s9, 4294963200  ;;  %p20_p7 = scmp.ge.s32.totalorder %s5711_s6, 4   ;;  %s7374_s18 = smov %s5576_s19 }
 0x8b5   : > { %s7375_s19 = smov %s5580_s20  ;;  %s7376_s20 = smov %s5721_s10 }
 0x8b6   : > { %s7377_s21 = smov %s5711_s6  ;;  %22 = sbr.rel (!%p20_p7) target bundleno = 7 (0x7), region = 97 }
 0x8bb   :  { %3984 = vsyncpa [#allocation4], 1 }
 0x8bc   :  { %3986 = vsyncpa [#allocation4 + $0x1], 1 }
 0x8bd   :  { %3987 = vsyncpa [#allocation7], 1 }
 0x8be   :  { %3988 = vsyncpa [#allocation10], 1 }
 0x8bf   :  { %3989 = vsyncpa [#allocation5], 1 }
 0x8c0   :  { %3991 = vsyncpa [#allocation5 + $0x1], 1 }

</bundles_post_ra>
